<compile_context>
chip_gen: v6e
topology: v6e:2x2x1
jax: 0.10.0
libtpu: 0.0.40
codegen_flags: <defaults>
</compile_context>

<pallas_src>
import functools
import math

import jax
import jax.numpy as jnp
from jax.experimental import pallas as pl
from jax.experimental.pallas import tpu as pltpu

LANES = 128
TARGET_BLOCK_ELEMS = 512 * 1024      # ~2 MiB (f32) per input buffer per grid step
ACC_ROWS = 8                         # folded f32 accumulator height (one vreg tile)


def _mse_kernel(p_ref, t_ref, o_ref, acc_ref):
    """Accumulate sum((p - t)^2) across the grid; emit the scalar on the last step."""
    i = pl.program_id(0)

    @pl.when(i == 0)
    def _init():
        acc_ref[...] = jnp.zeros_like(acc_ref)

    d = p_ref[...].astype(jnp.float32) - t_ref[...].astype(jnp.float32)
    sq = d * d
    rows, cols = sq.shape
    acc_rows = acc_ref.shape[0]
    if rows != acc_rows:
        # Fold sublane-tiles into the small (ACC_ROWS, LANES) accumulator: removes
        # the per-vreg accumulator load/store and keeps the VMEM scratch tiny.
        sq = jnp.sum(sq.reshape(rows // acc_rows, acc_rows, cols), axis=0)
    acc_ref[...] += sq

    @pl.when(i == pl.num_programs(0) - 1)
    def _finalize():
        o_ref[0, 0] = jnp.sum(acc_ref[...])   # single final cross-lane reduce


def _pick_block_rows(num_rows, target_rows):
    """Largest sublane-friendly block height <= target that (preferably) divides num_rows."""
    if num_rows <= target_rows:
        return num_rows                       # single full-extent block
    hi = max(8, (target_rows // 8) * 8)
    lo = max(8, hi // 2)
    best_br, best_rem = hi, num_rows % hi
    br = hi
    while br >= lo and best_rem != 0:
        rem = num_rows % br
        if rem < best_rem:
            best_br, best_rem = br, rem
        br -= 8
    return best_br


def mse_pallas(predictions, targets, *, target_block_elems=TARGET_BLOCK_ELEMS):
    """Returns mean((predictions - targets)**2) as a float32 scalar."""
    assert predictions.shape == targets.shape, "shape mismatch"
    n = math.prod(predictions.shape)
    if n == 0:
        return jnp.float32(0.0)

    p_flat = predictions.reshape(-1)
    t_flat = targets.reshape(-1)

    num_rows = n // LANES
    main = num_rows * LANES
    total = jnp.float32(0.0)

    if num_rows > 0:
        p_slab = (p_flat if main == n else p_flat[:main]).reshape(num_rows, LANES)
        t_slab = (t_flat if main == n else t_flat[:main]).reshape(num_rows, LANES)

        target_rows = max(8, target_block_elems // LANES)
        block_rows = _pick_block_rows(num_rows, target_rows)
        row_tiles = num_rows // block_rows
        rows_main = row_tiles * block_rows

        acc_rows = ACC_ROWS if block_rows % ACC_ROWS == 0 else block_rows

        p_item = jnp.dtype(predictions.dtype).itemsize
        t_item = jnp.dtype(targets.dtype).itemsize
        block_in_bytes = block_rows * LANES * max(p_item, t_item)
        # 2 inputs x double buffer + accumulator + headroom (capped for v7x's 64 MiB).
        vmem_limit = int(min(48 << 20, max(32 << 20, 4 * block_in_bytes + (8 << 20))))

        partial = pl.pallas_call(
            _mse_kernel,
            out_shape=jax.ShapeDtypeStruct((1, 1), jnp.float32),
            grid_spec=pltpu.PrefetchScalarGridSpec(
                num_scalar_prefetch=0,
                grid=(row_tiles,),
                in_specs=[
                    pl.BlockSpec((block_rows, LANES), lambda i: (i, 0)),
                    pl.BlockSpec((block_rows, LANES), lambda i: (i, 0)),
                ],
                out_specs=pl.BlockSpec((1, 1), lambda i: (0, 0),
                                       memory_space=pltpu.MemorySpace.SMEM),
                scratch_shapes=[pltpu.VMEM((acc_rows, LANES), jnp.float32)],
            ),
            compiler_params=pltpu.CompilerParams(
                dimension_semantics=("arbitrary",),
                vmem_limit_bytes=vmem_limit,
            ),
            cost_estimate=pl.CostEstimate(
                flops=3 * rows_main * LANES,
                transcendentals=0,
                bytes_accessed=(p_item + t_item) * rows_main * LANES + 4,
            ),
        )(p_slab, t_slab)
        total = total + partial[0, 0]

        # Rows not covered by full blocks (empty or tiny thanks to the divisor search).
        if rows_main != num_rows:
            pr = p_slab[rows_main:].astype(jnp.float32)
            tr = t_slab[rows_main:].astype(jnp.float32)
            total = total + jnp.sum((pr - tr) ** 2)

    # Elements that did not fill a whole 128-lane row (< 128 of them): plain JAX.
    if main != n:
        dt = p_flat[main:].astype(jnp.float32) - t_flat[main:].astype(jnp.float32)
        total = total + jnp.sum(dt * dt)

    return (total / jnp.float32(n)).astype(jnp.float32)


if __name__ == "__main__":
    key = jax.random.PRNGKey(0)
    k1, k2 = jax.random.split(key)

    def check(shape, **kw):
        p = jax.random.normal(k1, shape, dtype=jnp.float32)
        t = jax.random.normal(k2, shape, dtype=jnp.float32)
        fn = jax.jit(functools.partial(mse_pallas, **kw)) if kw else jax.jit(mse_pallas)
        out = fn(p, t)
        jax.block_until_ready(out)
        ref = jnp.mean((p - t) ** 2)
        assert jnp.allclose(out, ref, rtol=1e-4, atol=1e-6), (shape, out, ref)

    # Canonical MSE benchmark shape: one contiguous 2 MiB block per input, folded acc.
    check((128, 4096))
    # Small NCHW-style shape (flatten path, single small block).
    check((2, 4, 16, 16))
    # Ragged shape: non-multiple-of-8 row count + <128-element tail epilogue.
    check((3, 1000))
    # Multi-block accumulation path (small block-size override exercises init/finalize).
    check((64, 4096), target_block_elems=64 * LANES)

    print("KERNEL_OK")
</pallas_src>

<mosaic_0001>
module attributes {stable_mosaic.version = 11 : i64} {
  func.func @_mse_kernel(%arg0: i32, %arg1: memref<4096x128xf32, #tpu.memory_space<vmem>>, %arg2: memref<4096x128xf32, #tpu.memory_space<vmem>>, %arg3: memref<1x1xf32, #tpu.memory_space<smem>>, %arg4: memref<8x128xf32, #tpu.memory_space<vmem>>) attributes {dimension_semantics = [#tpu.dimension_semantics<arbitrary>], iteration_bounds = array<i64: 1>, scalar_prefetch = 0 : i64, scratch_operands = 1 : i64, tpu.core_type = #tpu.core_type<tc>, window_params = [{transform_indices = @transform_0, window_bounds = array<i64: 4096, 128>}, {transform_indices = @transform_1, window_bounds = array<i64: 4096, 128>}, {transform_indices = @transform_2, window_bounds = array<i64: 1, 1>}]} {
    %c0_i32 = arith.constant 0 : i32
    %0 = arith.cmpi eq, %arg0, %c0_i32 : i32
    %1 = arith.extui %0 : i1 to i32
    %c0_i32_0 = arith.constant 0 : i32
    %2 = arith.cmpi ne, %1, %c0_i32_0 : i32
    scf.if %2 {
      %cst_10 = arith.constant 0.000000e+00 : f32
      %15 = vector.broadcast %cst_10 : f32 to vector<8x128xf32>
      %c0_11 = arith.constant 0 : index
      %c0_12 = arith.constant 0 : index
      %16 = vector.load %arg4[%c0_11, %c0_12] : memref<8x128xf32, #tpu.memory_space<vmem>>, vector<8x128xf32>
      tpu.vector_store %arg4[%c0_11, %c0_12], %15 {strides = array<i32>} : memref<8x128xf32, #tpu.memory_space<vmem>>, vector<8x128xf32>,
    } else {
    }
    %c0 = arith.constant 0 : index
    %c0_1 = arith.constant 0 : index
    %3 = vector.load %arg1[%c0, %c0_1] : memref<4096x128xf32, #tpu.memory_space<vmem>>, vector<4096x128xf32>
    %c0_2 = arith.constant 0 : index
    %c0_3 = arith.constant 0 : index
    %4 = vector.load %arg2[%c0_2, %c0_3] : memref<4096x128xf32, #tpu.memory_space<vmem>>, vector<4096x128xf32>
    %5 = arith.subf %3, %4 : vector<4096x128xf32>
    %6 = arith.mulf %5, %5 : vector<4096x128xf32>
    %7 = vector.shape_cast %6 : vector<4096x128xf32> to vector<512x8x128xf32>
    %cst = arith.constant dense<0.000000e+00> : vector<8x128xf32>
    %8 = vector.multi_reduction <add>, %7, %cst [0] : vector<512x8x128xf32> to vector<8x128xf32>
    %c0_4 = arith.constant 0 : index
    %c0_5 = arith.constant 0 : index
    %9 = vector.load %arg4[%c0_4, %c0_5] : memref<8x128xf32, #tpu.memory_space<vmem>>, vector<8x128xf32>
    %10 = arith.addf %9, %8 : vector<8x128xf32>
    %c0_6 = arith.constant 0 : index
    %c0_7 = arith.constant 0 : index
    %11 = vector.load %arg4[%c0_6, %c0_7] : memref<8x128xf32, #tpu.memory_space<vmem>>, vector<8x128xf32>
    tpu.vector_store %arg4[%c0_6, %c0_7], %10 {strides = array<i32>} : memref<8x128xf32, #tpu.memory_space<vmem>>, vector<8x128xf32>,
    %c0_i32_8 = arith.constant 0 : i32
    %12 = arith.cmpi eq, %arg0, %c0_i32_8 : i32
    %13 = arith.extui %12 : i1 to i32
    %c0_i32_9 = arith.constant 0 : i32
    %14 = arith.cmpi ne, %13, %c0_i32_9 : i32
    scf.if %14 {
      %c0_10 = arith.constant 0 : index
      %c0_11 = arith.constant 0 : index
      %15 = vector.load %arg4[%c0_10, %c0_11] : memref<8x128xf32, #tpu.memory_space<vmem>>, vector<8x128xf32>
      %16 = vector.shape_cast %15 : vector<8x128xf32> to vector<1x8x128xf32>
      %cst_12 = arith.constant dense<0.000000e+00> : vector<1xf32>
      %17 = vector.multi_reduction <add>, %16, %cst_12 [1, 2] : vector<1x8x128xf32> to vector<1xf32>
      %18 = vector.shape_cast %17 : vector<1xf32> to vector<1x1x1xf32>
      %19 = vector.extract %18[0, 0, 0] : f32 from vector<1x1x1xf32>
      %c0_13 = arith.constant 0 : index
      %c0_14 = arith.constant 0 : index
      %20 = memref.load %arg3[%c0_13, %c0_14] : memref<1x1xf32, #tpu.memory_space<smem>>
      memref.store %19, %arg3[%c0_13, %c0_14] : memref<1x1xf32, #tpu.memory_space<smem>>
    } else {
    }
    return
  }
  func.func @transform_0(%arg0: i32) -> (i32, i32) {
    %c0_i32 = arith.constant 0 : i32
    %c0_i32_0 = arith.constant 0 : i32
    return %arg0, %c0_i32 : i32, i32
  }
  func.func @transform_1(%arg0: i32) -> (i32, i32) {
    %c0_i32 = arith.constant 0 : i32
    %c0_i32_0 = arith.constant 0 : i32
    return %arg0, %c0_i32 : i32, i32
  }
  func.func @transform_2(%arg0: i32) -> (i32, i32) {
    %c0_i32 = arith.constant 0 : i32
    %c0_i32_0 = arith.constant 0 : i32
    %c0_i32_1 = arith.constant 0 : i32
    return %c0_i32, %c0_i32_0 : i32, i32
  }
}

</mosaic_0001>

<bundles_post_ra>
// kernel: mse_pallas.1
= control target key start
LH: loop header
LB: loop body
LE: loop exit
PB: predicated region body
PF: predicated region fallthrough
CT: control target
= control target key end

     0   :  { %7 = vsyncpa [#allocation4], 0  ;;  %s5711_s0 = inlined_call_operand.vmem [shape: f32[4096,128], index: 0, kind: input, shape index: {}]   ;;  %s5712_s1 = inlined_call_operand.vmem [shape: f32[4096,128], index: 1, kind: input, shape index: {}]   ;;  %s5713_s2 = inlined_call_operand.hbm [shape: f32[1,1], index: 2, kind: output, shape index: {}]  }
   0x1   :  { %v17_v0 = vld [vmem:[%s5711_s0] sm:$0xff]  ;;  %v18_v1 = vld [vmem:[%s5711_s0 + $0x8] sm:$0xff]  ;;  %v19_v4 = vld [vmem:[%s5711_s0 + $0x10] sm:$0xff] }
   0x2   :  { %v529_v2 = vld [vmem:[%s5712_s1] sm:$0xff]  ;;  %v530_v3 = vld [vmem:[%s5712_s1 + $0x8] sm:$0xff]  ;;  %v531_v5 = vld [vmem:[%s5712_s1 + $0x10] sm:$0xff] }
   0x3   :  { %v1041_v6 = vsub.f32 %v17_v0, %v529_v2  ;;  %v1042_v7 = vsub.f32 %v18_v1, %v530_v3  ;;  %v20_v8 = vld [vmem:[%s5711_s0 + $0x18] sm:$0xff]  ;;  %v1043_v10 = vsub.f32 %v19_v4, %v531_v5  ;;  %v21_v11 = vld [vmem:[%s5711_s0 + $0x20] sm:$0xff]  ;;  %v22_v16 = vld [vmem:[%s5711_s0 + $0x28] sm:$0xff] }
   0x4   :  { %v532_v9 = vld [vmem:[%s5712_s1 + $0x18] sm:$0xff]  ;;  %v533_v12 = vld [vmem:[%s5712_s1 + $0x20] sm:$0xff]  ;;  %v534_v17 = vld [vmem:[%s5712_s1 + $0x28] sm:$0xff] }
   0x5   :  { %v1044_v13 = vsub.f32 %v20_v8, %v532_v9  ;;  %v1553_v14 = vmul.f32 %v1041_v6, %v1041_v6  ;;  %v1554_v15 = vmul.f32 %v1042_v7, %v1042_v7  ;;  %v1045_v18 = vsub.f32 %v21_v11, %v533_v12  ;;  %v23_v20 = vld [vmem:[%s5711_s0 + $0x30] sm:$0xff]  ;;  %v24_v25 = vld [vmem:[%s5711_s0 + $0x38] sm:$0xff]  ;;  %v25_v30 = vld [vmem:[%s5711_s0 + $0x40] sm:$0xff] }
   0x6   :  { %v1555_v19 = vmul.f32 %v1043_v10, %v1043_v10  ;;  %v535_v21 = vld [vmem:[%s5712_s1 + $0x30] sm:$0xff]  ;;  %v1046_v22 = vsub.f32 %v22_v16, %v534_v17  ;;  %v536_v26 = vld [vmem:[%s5712_s1 + $0x38] sm:$0xff]  ;;  %v537_v31 = vld [vmem:[%s5712_s1 + $0x40] sm:$0xff] }
   0x7   :  { %v1556_v23 = vmul.f32 %v1044_v13, %v1044_v13  ;;  %v2065_v24 = vadd.f32 %v1554_v15, %v1553_v14  ;;  %v1047_v27 = vsub.f32 %v23_v20, %v535_v21  ;;  %v1557_v28 = vmul.f32 %v1045_v18, %v1045_v18  ;;  %v26_v35 = vld [vmem:[%s5711_s0 + $0x48] sm:$0xff]  ;;  %v27_v40 = vld [vmem:[%s5711_s0 + $0x50] sm:$0xff]  ;;  %v28_v45 = vld [vmem:[%s5711_s0 + $0x58] sm:$0xff] }
   0x8   :  { %v1048_v32 = vsub.f32 %v24_v25, %v536_v26  ;;  %v1558_v33 = vmul.f32 %v1046_v22, %v1046_v22  ;;  %v538_v36 = vld [vmem:[%s5712_s1 + $0x48] sm:$0xff]  ;;  %v1049_v37 = vsub.f32 %v25_v30, %v537_v31  ;;  %v539_v41 = vld [vmem:[%s5712_s1 + $0x50] sm:$0xff]  ;;  %v540_v46 = vld [vmem:[%s5712_s1 + $0x58] sm:$0xff] }
   0x9   :  { %v2066_v29 = vadd.f32 %v2065_v24, %v1555_v19  ;;  %v1559_v38 = vmul.f32 %v1047_v27, %v1047_v27  ;;  %v1050_v42 = vsub.f32 %v26_v35, %v538_v36  ;;  %v1051_v47 = vsub.f32 %v27_v40, %v539_v41  ;;  %v29_v50 = vld [vmem:[%s5711_s0 + $0x60] sm:$0xff]  ;;  %v30_v55 = vld [vmem:[%s5711_s0 + $0x68] sm:$0xff]  ;;  %v31_v60 = vld [vmem:[%s5711_s0 + $0x70] sm:$0xff] }
   0xa   :  { %v1560_v43 = vmul.f32 %v1048_v32, %v1048_v32  ;;  %v1561_v48 = vmul.f32 %v1049_v37, %v1049_v37  ;;  %v541_v51 = vld [vmem:[%s5712_s1 + $0x60] sm:$0xff]  ;;  %v1052_v52 = vsub.f32 %v28_v45, %v540_v46  ;;  %v542_v56 = vld [vmem:[%s5712_s1 + $0x68] sm:$0xff]  ;;  %v543_v61 = vld [vmem:[%s5712_s1 + $0x70] sm:$0xff] }
   0xb   :  { %v2067_v34 = vadd.f32 %v2066_v29, %v1556_v23  ;;  %v1562_v53 = vmul.f32 %v1050_v42, %v1050_v42  ;;  %v1053_v57 = vsub.f32 %v29_v50, %v541_v51  ;;  %v1563_v58 = vmul.f32 %v1051_v47, %v1051_v47  ;;  %v32_v1 = vld [vmem:[%s5711_s0 + $0x78] sm:$0xff]  ;;  %v33_v6 = vld [vmem:[%s5711_s0 + $0x80] sm:$0xff]  ;;  %v34_v11 = vld [vmem:[%s5711_s0 + $0x88] sm:$0xff] }
   0xc   :  { %v1054_v62 = vsub.f32 %v30_v55, %v542_v56  ;;  %v1564_v63 = vmul.f32 %v1052_v52, %v1052_v52  ;;  %v544_v2 = vld [vmem:[%s5712_s1 + $0x78] sm:$0xff]  ;;  %v1055_v3 = vsub.f32 %v31_v60, %v543_v61  ;;  %v545_v7 = vld [vmem:[%s5712_s1 + $0x80] sm:$0xff]  ;;  %v546_v12 = vld [vmem:[%s5712_s1 + $0x88] sm:$0xff] }
   0xd   :  { %v2068_v39 = vadd.f32 %v2067_v34, %v1557_v28  ;;  %v1565_v4 = vmul.f32 %v1053_v57, %v1053_v57  ;;  %v1056_v8 = vsub.f32 %v32_v1, %v544_v2  ;;  %v1057_v13 = vsub.f32 %v33_v6, %v545_v7  ;;  %v35_v16 = vld [vmem:[%s5711_s0 + $0x90] sm:$0xff]  ;;  %v36_v21 = vld [vmem:[%s5711_s0 + $0x98] sm:$0xff]  ;;  %v37_v26 = vld [vmem:[%s5711_s0 + $0xa0] sm:$0xff] }
   0xe   :  { %v1566_v9 = vmul.f32 %v1054_v62, %v1054_v62  ;;  %v1567_v14 = vmul.f32 %v1055_v3, %v1055_v3  ;;  %v547_v17 = vld [vmem:[%s5712_s1 + $0x90] sm:$0xff]  ;;  %v1058_v18 = vsub.f32 %v34_v11, %v546_v12  ;;  %v548_v22 = vld [vmem:[%s5712_s1 + $0x98] sm:$0xff]  ;;  %v549_v27 = vld [vmem:[%s5712_s1 + $0xa0] sm:$0xff] }
   0xf   :  { %v2069_v44 = vadd.f32 %v2068_v39, %v1558_v33  ;;  %v1568_v19 = vmul.f32 %v1056_v8, %v1056_v8  ;;  %v1059_v23 = vsub.f32 %v35_v16, %v547_v17  ;;  %v1569_v24 = vmul.f32 %v1057_v13, %v1057_v13  ;;  %v38_v31 = vld [vmem:[%s5711_s0 + $0xa8] sm:$0xff]  ;;  %v39_v36 = vld [vmem:[%s5711_s0 + $0xb0] sm:$0xff]  ;;  %v40_v41 = vld [vmem:[%s5711_s0 + $0xb8] sm:$0xff] }
  0x10   :  { %v1060_v28 = vsub.f32 %v36_v21, %v548_v22  ;;  %v1570_v29 = vmul.f32 %v1058_v18, %v1058_v18  ;;  %v550_v32 = vld [vmem:[%s5712_s1 + $0xa8] sm:$0xff]  ;;  %v1061_v33 = vsub.f32 %v37_v26, %v549_v27  ;;  %v551_v37 = vld [vmem:[%s5712_s1 + $0xb0] sm:$0xff]  ;;  %v552_v42 = vld [vmem:[%s5712_s1 + $0xb8] sm:$0xff] }
  0x11   :  { %v2070_v49 = vadd.f32 %v2069_v44, %v1559_v38  ;;  %v1571_v34 = vmul.f32 %v1059_v23, %v1059_v23  ;;  %v1062_v38 = vsub.f32 %v38_v31, %v550_v32  ;;  %v41_v46 = vld [vmem:[%s5711_s0 + $0xc0] sm:$0xff]  ;;  %v42_v51 = vld [vmem:[%s5711_s0 + $0xc8] sm:$0xff]  ;;  %v43_v56 = vld [vmem:[%s5711_s0 + $0xd0] sm:$0xff] }
  0x12   :  { %v1572_v39 = vmul.f32 %v1060_v28, %v1060_v28  ;;  %v1573_v44 = vmul.f32 %v1061_v33, %v1061_v33  ;;  %v553_v47 = vld [vmem:[%s5712_s1 + $0xc0] sm:$0xff]  ;;  %v554_v52 = vld [vmem:[%s5712_s1 + $0xc8] sm:$0xff]  ;;  %v555_v57 = vld [vmem:[%s5712_s1 + $0xd0] sm:$0xff] }
  0x13   :  { %v2071_v54 = vadd.f32 %v2070_v49, %v1560_v43  ;;  %v1063_v43 = vsub.f32 %v39_v36, %v551_v37  ;;  %v1574_v49 = vmul.f32 %v1062_v38, %v1062_v38  ;;  %v44_v61 = vld [vmem:[%s5711_s0 + $0xd8] sm:$0xff]  ;;  %v45_v2 = vld [vmem:[%s5711_s0 + $0xe0] sm:$0xff]  ;;  %v46_v7 = vld [vmem:[%s5711_s0 + $0xe8] sm:$0xff] }
  0x14   :  { %v556_v62 = vld [vmem:[%s5712_s1 + $0xd8] sm:$0xff]  ;;  %v557_v3 = vld [vmem:[%s5712_s1 + $0xe0] sm:$0xff]  ;;  %v558_v8 = vld [vmem:[%s5712_s1 + $0xe8] sm:$0xff] }
  0x15   :  { %v2072_v59 = vadd.f32 %v2071_v54, %v1561_v48  ;;  %v1064_v48 = vsub.f32 %v40_v41, %v552_v42  ;;  %v1575_v54 = vmul.f32 %v1063_v43, %v1063_v43  ;;  %v47_v12 = vld [vmem:[%s5711_s0 + $0xf0] sm:$0xff]  ;;  %v48_v17 = vld [vmem:[%s5711_s0 + $0xf8] sm:$0xff]  ;;  %v49_v22 = vld [vmem:[%s5711_s0 + $0x100] sm:$0xff] }
  0x16   :  { %v559_v13 = vld [vmem:[%s5712_s1 + $0xf0] sm:$0xff]  ;;  %v560_v18 = vld [vmem:[%s5712_s1 + $0xf8] sm:$0xff]  ;;  %v561_v23 = vld [vmem:[%s5712_s1 + $0x100] sm:$0xff] }
  0x17   :  { %v2073_v0 = vadd.f32 %v2072_v59, %v1562_v53  ;;  %v1065_v53 = vsub.f32 %v41_v46, %v553_v47  ;;  %v1576_v59 = vmul.f32 %v1064_v48, %v1064_v48  ;;  %v50_v27 = vld [vmem:[%s5711_s0 + $0x108] sm:$0xff]  ;;  %v51_v32 = vld [vmem:[%s5711_s0 + $0x110] sm:$0xff]  ;;  %v52_v37 = vld [vmem:[%s5711_s0 + $0x118] sm:$0xff] }
  0x18   :  { %v562_v28 = vld [vmem:[%s5712_s1 + $0x108] sm:$0xff]  ;;  %v563_v33 = vld [vmem:[%s5712_s1 + $0x110] sm:$0xff]  ;;  %v564_v38 = vld [vmem:[%s5712_s1 + $0x118] sm:$0xff] }
  0x19   :  { %v2074_v5 = vadd.f32 %v2073_v0, %v1563_v58  ;;  %v1066_v58 = vsub.f32 %v42_v51, %v554_v52  ;;  %v1577_v0 = vmul.f32 %v1065_v53, %v1065_v53  ;;  %v53_v42 = vld [vmem:[%s5711_s0 + $0x120] sm:$0xff]  ;;  %v54_v47 = vld [vmem:[%s5711_s0 + $0x128] sm:$0xff]  ;;  %v55_v52 = vld [vmem:[%s5711_s0 + $0x130] sm:$0xff] }
  0x1a   :  { %v565_v43 = vld [vmem:[%s5712_s1 + $0x120] sm:$0xff]  ;;  %v566_v48 = vld [vmem:[%s5712_s1 + $0x128] sm:$0xff]  ;;  %v567_v53 = vld [vmem:[%s5712_s1 + $0x130] sm:$0xff] }
  0x1b   :  { %v2075_v10 = vadd.f32 %v2074_v5, %v1564_v63  ;;  %v1067_v63 = vsub.f32 %v43_v56, %v555_v57  ;;  %v1578_v5 = vmul.f32 %v1066_v58, %v1066_v58  ;;  %v56_v57 = vld [vmem:[%s5711_s0 + $0x138] sm:$0xff] }
  0x1c   :  { %v568_v58 = vld [vmem:[%s5712_s1 + $0x138] sm:$0xff] }
  0x1d   :  { %v2076_v15 = vadd.f32 %v2075_v10, %v1565_v4  ;;  %v1068_v4 = vsub.f32 %v44_v61, %v556_v62  ;;  %v1579_v10 = vmul.f32 %v1067_v63, %v1067_v63  ;;  %v57_v62 = vld [vmem:[%s5711_s0 + $0x140] sm:$0xff] }
  0x1e   :  { %v569_v63 = vld [vmem:[%s5712_s1 + $0x140] sm:$0xff] }
  0x1f   :  { %v2077_v20 = vadd.f32 %v2076_v15, %v1566_v9  ;;  %v1069_v9 = vsub.f32 %v45_v2, %v557_v3  ;;  %v1580_v15 = vmul.f32 %v1068_v4, %v1068_v4  ;;  %v58_v3 = vld [vmem:[%s5711_s0 + $0x148] sm:$0xff] }
  0x20   :  { %v570_v4 = vld [vmem:[%s5712_s1 + $0x148] sm:$0xff] }
  0x21   :  { %v2078_v25 = vadd.f32 %v2077_v20, %v1567_v14  ;;  %v1070_v14 = vsub.f32 %v46_v7, %v558_v8  ;;  %v1581_v20 = vmul.f32 %v1069_v9, %v1069_v9  ;;  %v59_v8 = vld [vmem:[%s5711_s0 + $0x150] sm:$0xff] }
  0x22   :  { %v571_v9 = vld [vmem:[%s5712_s1 + $0x150] sm:$0xff] }
  0x23   :  { %v2079_v30 = vadd.f32 %v2078_v25, %v1568_v19  ;;  %v1071_v19 = vsub.f32 %v47_v12, %v559_v13  ;;  %v1582_v25 = vmul.f32 %v1070_v14, %v1070_v14  ;;  %v60_v13 = vld [vmem:[%s5711_s0 + $0x158] sm:$0xff] }
  0x24   :  { %v572_v14 = vld [vmem:[%s5712_s1 + $0x158] sm:$0xff] }
  0x25   :  { %v2080_v35 = vadd.f32 %v2079_v30, %v1569_v24  ;;  %v1072_v24 = vsub.f32 %v48_v17, %v560_v18  ;;  %v1583_v30 = vmul.f32 %v1071_v19, %v1071_v19  ;;  %v61_v18 = vld [vmem:[%s5711_s0 + $0x160] sm:$0xff] }
  0x26   :  { %v573_v19 = vld [vmem:[%s5712_s1 + $0x160] sm:$0xff] }
  0x27   :  { %v2081_v40 = vadd.f32 %v2080_v35, %v1570_v29  ;;  %v1073_v29 = vsub.f32 %v49_v22, %v561_v23  ;;  %v1584_v35 = vmul.f32 %v1072_v24, %v1072_v24  ;;  %v62_v23 = vld [vmem:[%s5711_s0 + $0x168] sm:$0xff] }
  0x28   :  { %v574_v24 = vld [vmem:[%s5712_s1 + $0x168] sm:$0xff] }
  0x29   :  { %v2082_v45 = vadd.f32 %v2081_v40, %v1571_v34  ;;  %v1074_v34 = vsub.f32 %v50_v27, %v562_v28  ;;  %v1585_v40 = vmul.f32 %v1073_v29, %v1073_v29  ;;  %v63_v28 = vld [vmem:[%s5711_s0 + $0x170] sm:$0xff] }
  0x2a   :  { %v575_v29 = vld [vmem:[%s5712_s1 + $0x170] sm:$0xff] }
  0x2b   :  { %v2083_v50 = vadd.f32 %v2082_v45, %v1572_v39  ;;  %v1075_v39 = vsub.f32 %v51_v32, %v563_v33  ;;  %v1586_v45 = vmul.f32 %v1074_v34, %v1074_v34  ;;  %v64_v33 = vld [vmem:[%s5711_s0 + $0x178] sm:$0xff] }
  0x2c   :  { %v576_v34 = vld [vmem:[%s5712_s1 + $0x178] sm:$0xff] }
  0x2d   :  { %v2084_v55 = vadd.f32 %v2083_v50, %v1573_v44  ;;  %v1076_v44 = vsub.f32 %v52_v37, %v564_v38  ;;  %v1587_v50 = vmul.f32 %v1075_v39, %v1075_v39  ;;  %v65_v38 = vld [vmem:[%s5711_s0 + $0x180] sm:$0xff] }
  0x2e   :  { %v577_v39 = vld [vmem:[%s5712_s1 + $0x180] sm:$0xff] }
  0x2f   :  { %v2085_v60 = vadd.f32 %v2084_v55, %v1574_v49  ;;  %v1077_v49 = vsub.f32 %v53_v42, %v565_v43  ;;  %v1588_v55 = vmul.f32 %v1076_v44, %v1076_v44  ;;  %v66_v43 = vld [vmem:[%s5711_s0 + $0x188] sm:$0xff] }
  0x30   :  { %v578_v44 = vld [vmem:[%s5712_s1 + $0x188] sm:$0xff] }
  0x31   :  { %v2086_v1 = vadd.f32 %v2085_v60, %v1575_v54  ;;  %v1078_v54 = vsub.f32 %v54_v47, %v566_v48  ;;  %v1589_v60 = vmul.f32 %v1077_v49, %v1077_v49  ;;  %v67_v48 = vld [vmem:[%s5711_s0 + $0x190] sm:$0xff] }
  0x32   :  { %v579_v49 = vld [vmem:[%s5712_s1 + $0x190] sm:$0xff] }
  0x33   :  { %v2087_v6 = vadd.f32 %v2086_v1, %v1576_v59  ;;  %v1079_v59 = vsub.f32 %v55_v52, %v567_v53  ;;  %v1590_v1 = vmul.f32 %v1078_v54, %v1078_v54  ;;  %v68_v53 = vld [vmem:[%s5711_s0 + $0x198] sm:$0xff] }
  0x34   :  { %v580_v54 = vld [vmem:[%s5712_s1 + $0x198] sm:$0xff] }
  0x35   :  { %v2088_v11 = vadd.f32 %v2087_v6, %v1577_v0  ;;  %v1080_v0 = vsub.f32 %v56_v57, %v568_v58  ;;  %v1591_v6 = vmul.f32 %v1079_v59, %v1079_v59  ;;  %v69_v58 = vld [vmem:[%s5711_s0 + $0x1a0] sm:$0xff] }
  0x36   :  { %v581_v59 = vld [vmem:[%s5712_s1 + $0x1a0] sm:$0xff] }
  0x37   :  { %v2089_v16 = vadd.f32 %v2088_v11, %v1578_v5  ;;  %v1081_v5 = vsub.f32 %v57_v62, %v569_v63  ;;  %v1592_v11 = vmul.f32 %v1080_v0, %v1080_v0  ;;  %v70_v63 = vld [vmem:[%s5711_s0 + $0x1a8] sm:$0xff] }
  0x38   :  { %v582_v0 = vld [vmem:[%s5712_s1 + $0x1a8] sm:$0xff] }
  0x39   :  { %v2090_v21 = vadd.f32 %v2089_v16, %v1579_v10  ;;  %v1082_v10 = vsub.f32 %v58_v3, %v570_v4  ;;  %v1593_v16 = vmul.f32 %v1081_v5, %v1081_v5  ;;  %v71_v4 = vld [vmem:[%s5711_s0 + $0x1b0] sm:$0xff] }
  0x3a   :  { %v583_v5 = vld [vmem:[%s5712_s1 + $0x1b0] sm:$0xff] }
  0x3b   :  { %v2091_v26 = vadd.f32 %v2090_v21, %v1580_v15  ;;  %v1083_v15 = vsub.f32 %v59_v8, %v571_v9  ;;  %v1594_v21 = vmul.f32 %v1082_v10, %v1082_v10  ;;  %v72_v9 = vld [vmem:[%s5711_s0 + $0x1b8] sm:$0xff] }
  0x3c   :  { %v584_v10 = vld [vmem:[%s5712_s1 + $0x1b8] sm:$0xff] }
  0x3d   :  { %v2092_v31 = vadd.f32 %v2091_v26, %v1581_v20  ;;  %v1084_v20 = vsub.f32 %v60_v13, %v572_v14  ;;  %v1595_v26 = vmul.f32 %v1083_v15, %v1083_v15  ;;  %v73_v14 = vld [vmem:[%s5711_s0 + $0x1c0] sm:$0xff] }
  0x3e   :  { %v585_v15 = vld [vmem:[%s5712_s1 + $0x1c0] sm:$0xff] }
  0x3f   :  { %v2093_v36 = vadd.f32 %v2092_v31, %v1582_v25  ;;  %v1085_v25 = vsub.f32 %v61_v18, %v573_v19  ;;  %v1596_v31 = vmul.f32 %v1084_v20, %v1084_v20  ;;  %v74_v19 = vld [vmem:[%s5711_s0 + $0x1c8] sm:$0xff] }
  0x40   :  { %v586_v20 = vld [vmem:[%s5712_s1 + $0x1c8] sm:$0xff] }
  0x41   :  { %v2094_v41 = vadd.f32 %v2093_v36, %v1583_v30  ;;  %v1086_v30 = vsub.f32 %v62_v23, %v574_v24  ;;  %v1597_v36 = vmul.f32 %v1085_v25, %v1085_v25  ;;  %v75_v24 = vld [vmem:[%s5711_s0 + $0x1d0] sm:$0xff] }
  0x42   :  { %v587_v25 = vld [vmem:[%s5712_s1 + $0x1d0] sm:$0xff] }
  0x43   :  { %v2095_v46 = vadd.f32 %v2094_v41, %v1584_v35  ;;  %v1087_v35 = vsub.f32 %v63_v28, %v575_v29  ;;  %v1598_v41 = vmul.f32 %v1086_v30, %v1086_v30  ;;  %v76_v29 = vld [vmem:[%s5711_s0 + $0x1d8] sm:$0xff] }
  0x44   :  { %v588_v30 = vld [vmem:[%s5712_s1 + $0x1d8] sm:$0xff] }
  0x45   :  { %v2096_v51 = vadd.f32 %v2095_v46, %v1585_v40  ;;  %v1088_v40 = vsub.f32 %v64_v33, %v576_v34  ;;  %v1599_v46 = vmul.f32 %v1087_v35, %v1087_v35  ;;  %v77_v34 = vld [vmem:[%s5711_s0 + $0x1e0] sm:$0xff] }
  0x46   :  { %v589_v35 = vld [vmem:[%s5712_s1 + $0x1e0] sm:$0xff] }
  0x47   :  { %v2097_v56 = vadd.f32 %v2096_v51, %v1586_v45  ;;  %v1089_v45 = vsub.f32 %v65_v38, %v577_v39  ;;  %v1600_v51 = vmul.f32 %v1088_v40, %v1088_v40  ;;  %v78_v39 = vld [vmem:[%s5711_s0 + $0x1e8] sm:$0xff] }
  0x48   :  { %v590_v40 = vld [vmem:[%s5712_s1 + $0x1e8] sm:$0xff] }
  0x49   :  { %v2098_v61 = vadd.f32 %v2097_v56, %v1587_v50  ;;  %v1090_v50 = vsub.f32 %v66_v43, %v578_v44  ;;  %v1601_v56 = vmul.f32 %v1089_v45, %v1089_v45  ;;  %v79_v44 = vld [vmem:[%s5711_s0 + $0x1f0] sm:$0xff] }
  0x4a   :  { %v591_v45 = vld [vmem:[%s5712_s1 + $0x1f0] sm:$0xff] }
  0x4b   :  { %v2099_v2 = vadd.f32 %v2098_v61, %v1588_v55  ;;  %v1091_v55 = vsub.f32 %v67_v48, %v579_v49  ;;  %v1602_v61 = vmul.f32 %v1090_v50, %v1090_v50  ;;  %v80_v49 = vld [vmem:[%s5711_s0 + $0x1f8] sm:$0xff] }
  0x4c   :  { %v592_v50 = vld [vmem:[%s5712_s1 + $0x1f8] sm:$0xff] }
  0x4d   :  { %v2100_v7 = vadd.f32 %v2099_v2, %v1589_v60  ;;  %v1092_v60 = vsub.f32 %v68_v53, %v580_v54  ;;  %v1603_v2 = vmul.f32 %v1091_v55, %v1091_v55  ;;  %v81_v54 = vld [vmem:[%s5711_s0 + $0x200] sm:$0xff] }
  0x4e   :  { %v593_v55 = vld [vmem:[%s5712_s1 + $0x200] sm:$0xff] }
  0x4f   :  { %v2101_v12 = vadd.f32 %v2100_v7, %v1590_v1  ;;  %v1093_v1 = vsub.f32 %v69_v58, %v581_v59  ;;  %v1604_v7 = vmul.f32 %v1092_v60, %v1092_v60  ;;  %v82_v59 = vld [vmem:[%s5711_s0 + $0x208] sm:$0xff] }
  0x50   :  { %v594_v60 = vld [vmem:[%s5712_s1 + $0x208] sm:$0xff] }
  0x51   :  { %v2102_v17 = vadd.f32 %v2101_v12, %v1591_v6  ;;  %v1094_v6 = vsub.f32 %v70_v63, %v582_v0  ;;  %v1605_v12 = vmul.f32 %v1093_v1, %v1093_v1  ;;  %v83_v0 = vld [vmem:[%s5711_s0 + $0x210] sm:$0xff] }
  0x52   :  { %v595_v1 = vld [vmem:[%s5712_s1 + $0x210] sm:$0xff] }
  0x53   :  { %v2103_v22 = vadd.f32 %v2102_v17, %v1592_v11  ;;  %v1095_v11 = vsub.f32 %v71_v4, %v583_v5  ;;  %v1606_v17 = vmul.f32 %v1094_v6, %v1094_v6  ;;  %v84_v5 = vld [vmem:[%s5711_s0 + $0x218] sm:$0xff] }
  0x54   :  { %v596_v6 = vld [vmem:[%s5712_s1 + $0x218] sm:$0xff] }
  0x55   :  { %v2104_v27 = vadd.f32 %v2103_v22, %v1593_v16  ;;  %v1096_v16 = vsub.f32 %v72_v9, %v584_v10  ;;  %v1607_v22 = vmul.f32 %v1095_v11, %v1095_v11  ;;  %v85_v10 = vld [vmem:[%s5711_s0 + $0x220] sm:$0xff] }
  0x56   :  { %v597_v11 = vld [vmem:[%s5712_s1 + $0x220] sm:$0xff] }
  0x57   :  { %v2105_v32 = vadd.f32 %v2104_v27, %v1594_v21  ;;  %v1097_v21 = vsub.f32 %v73_v14, %v585_v15  ;;  %v1608_v27 = vmul.f32 %v1096_v16, %v1096_v16  ;;  %v86_v15 = vld [vmem:[%s5711_s0 + $0x228] sm:$0xff] }
  0x58   :  { %v598_v16 = vld [vmem:[%s5712_s1 + $0x228] sm:$0xff] }
  0x59   :  { %v2106_v37 = vadd.f32 %v2105_v32, %v1595_v26  ;;  %v1098_v26 = vsub.f32 %v74_v19, %v586_v20  ;;  %v1609_v32 = vmul.f32 %v1097_v21, %v1097_v21  ;;  %v87_v20 = vld [vmem:[%s5711_s0 + $0x230] sm:$0xff] }
  0x5a   :  { %v599_v21 = vld [vmem:[%s5712_s1 + $0x230] sm:$0xff] }
  0x5b   :  { %v2107_v42 = vadd.f32 %v2106_v37, %v1596_v31  ;;  %v1099_v31 = vsub.f32 %v75_v24, %v587_v25  ;;  %v1610_v37 = vmul.f32 %v1098_v26, %v1098_v26  ;;  %v88_v25 = vld [vmem:[%s5711_s0 + $0x238] sm:$0xff] }
  0x5c   :  { %v600_v26 = vld [vmem:[%s5712_s1 + $0x238] sm:$0xff] }
  0x5d   :  { %v2108_v47 = vadd.f32 %v2107_v42, %v1597_v36  ;;  %v1100_v36 = vsub.f32 %v76_v29, %v588_v30  ;;  %v1611_v42 = vmul.f32 %v1099_v31, %v1099_v31  ;;  %v89_v30 = vld [vmem:[%s5711_s0 + $0x240] sm:$0xff] }
  0x5e   :  { %v601_v31 = vld [vmem:[%s5712_s1 + $0x240] sm:$0xff] }
  0x5f   :  { %v2109_v52 = vadd.f32 %v2108_v47, %v1598_v41  ;;  %v1101_v41 = vsub.f32 %v77_v34, %v589_v35  ;;  %v1612_v47 = vmul.f32 %v1100_v36, %v1100_v36  ;;  %v90_v35 = vld [vmem:[%s5711_s0 + $0x248] sm:$0xff] }
  0x60   :  { %v602_v36 = vld [vmem:[%s5712_s1 + $0x248] sm:$0xff] }
  0x61   :  { %v2110_v57 = vadd.f32 %v2109_v52, %v1599_v46  ;;  %v1102_v46 = vsub.f32 %v78_v39, %v590_v40  ;;  %v1613_v52 = vmul.f32 %v1101_v41, %v1101_v41  ;;  %v91_v40 = vld [vmem:[%s5711_s0 + $0x250] sm:$0xff] }
  0x62   :  { %v603_v41 = vld [vmem:[%s5712_s1 + $0x250] sm:$0xff] }
  0x63   :  { %v2111_v62 = vadd.f32 %v2110_v57, %v1600_v51  ;;  %v1103_v51 = vsub.f32 %v79_v44, %v591_v45  ;;  %v1614_v57 = vmul.f32 %v1102_v46, %v1102_v46  ;;  %v92_v45 = vld [vmem:[%s5711_s0 + $0x258] sm:$0xff] }
  0x64   :  { %v604_v46 = vld [vmem:[%s5712_s1 + $0x258] sm:$0xff] }
  0x65   :  { %v2112_v3 = vadd.f32 %v2111_v62, %v1601_v56  ;;  %v1104_v56 = vsub.f32 %v80_v49, %v592_v50  ;;  %v1615_v62 = vmul.f32 %v1103_v51, %v1103_v51  ;;  %v93_v50 = vld [vmem:[%s5711_s0 + $0x260] sm:$0xff] }
  0x66   :  { %v605_v51 = vld [vmem:[%s5712_s1 + $0x260] sm:$0xff] }
  0x67   :  { %v2113_v8 = vadd.f32 %v2112_v3, %v1602_v61  ;;  %v1105_v61 = vsub.f32 %v81_v54, %v593_v55  ;;  %v1616_v3 = vmul.f32 %v1104_v56, %v1104_v56  ;;  %v94_v55 = vld [vmem:[%s5711_s0 + $0x268] sm:$0xff] }
  0x68   :  { %v606_v56 = vld [vmem:[%s5712_s1 + $0x268] sm:$0xff] }
  0x69   :  { %v2114_v13 = vadd.f32 %v2113_v8, %v1603_v2  ;;  %v1106_v2 = vsub.f32 %v82_v59, %v594_v60  ;;  %v1617_v8 = vmul.f32 %v1105_v61, %v1105_v61  ;;  %v95_v60 = vld [vmem:[%s5711_s0 + $0x270] sm:$0xff] }
  0x6a   :  { %v607_v61 = vld [vmem:[%s5712_s1 + $0x270] sm:$0xff] }
  0x6b   :  { %v2115_v18 = vadd.f32 %v2114_v13, %v1604_v7  ;;  %v1107_v7 = vsub.f32 %v83_v0, %v595_v1  ;;  %v1618_v13 = vmul.f32 %v1106_v2, %v1106_v2  ;;  %v96_v1 = vld [vmem:[%s5711_s0 + $0x278] sm:$0xff] }
  0x6c   :  { %v608_v2 = vld [vmem:[%s5712_s1 + $0x278] sm:$0xff] }
  0x6d   :  { %v2116_v23 = vadd.f32 %v2115_v18, %v1605_v12  ;;  %v1108_v12 = vsub.f32 %v84_v5, %v596_v6  ;;  %v1619_v18 = vmul.f32 %v1107_v7, %v1107_v7  ;;  %v97_v6 = vld [vmem:[%s5711_s0 + $0x280] sm:$0xff] }
  0x6e   :  { %v609_v7 = vld [vmem:[%s5712_s1 + $0x280] sm:$0xff] }
  0x6f   :  { %v2117_v28 = vadd.f32 %v2116_v23, %v1606_v17  ;;  %v1109_v17 = vsub.f32 %v85_v10, %v597_v11  ;;  %v1620_v23 = vmul.f32 %v1108_v12, %v1108_v12  ;;  %v98_v11 = vld [vmem:[%s5711_s0 + $0x288] sm:$0xff] }
  0x70   :  { %v610_v12 = vld [vmem:[%s5712_s1 + $0x288] sm:$0xff] }
  0x71   :  { %v2118_v33 = vadd.f32 %v2117_v28, %v1607_v22  ;;  %v1110_v22 = vsub.f32 %v86_v15, %v598_v16  ;;  %v1621_v28 = vmul.f32 %v1109_v17, %v1109_v17  ;;  %v99_v16 = vld [vmem:[%s5711_s0 + $0x290] sm:$0xff] }
  0x72   :  { %v611_v17 = vld [vmem:[%s5712_s1 + $0x290] sm:$0xff] }
  0x73   :  { %v2119_v38 = vadd.f32 %v2118_v33, %v1608_v27  ;;  %v1111_v27 = vsub.f32 %v87_v20, %v599_v21  ;;  %v1622_v33 = vmul.f32 %v1110_v22, %v1110_v22  ;;  %v100_v21 = vld [vmem:[%s5711_s0 + $0x298] sm:$0xff] }
  0x74   :  { %v612_v22 = vld [vmem:[%s5712_s1 + $0x298] sm:$0xff] }
  0x75   :  { %v2120_v43 = vadd.f32 %v2119_v38, %v1609_v32  ;;  %v1112_v32 = vsub.f32 %v88_v25, %v600_v26  ;;  %v1623_v38 = vmul.f32 %v1111_v27, %v1111_v27  ;;  %v101_v26 = vld [vmem:[%s5711_s0 + $0x2a0] sm:$0xff] }
  0x76   :  { %v613_v27 = vld [vmem:[%s5712_s1 + $0x2a0] sm:$0xff] }
  0x77   :  { %v2121_v48 = vadd.f32 %v2120_v43, %v1610_v37  ;;  %v1113_v37 = vsub.f32 %v89_v30, %v601_v31  ;;  %v1624_v43 = vmul.f32 %v1112_v32, %v1112_v32  ;;  %v102_v31 = vld [vmem:[%s5711_s0 + $0x2a8] sm:$0xff] }
  0x78   :  { %v614_v32 = vld [vmem:[%s5712_s1 + $0x2a8] sm:$0xff] }
  0x79   :  { %v2122_v53 = vadd.f32 %v2121_v48, %v1611_v42  ;;  %v1114_v42 = vsub.f32 %v90_v35, %v602_v36  ;;  %v1625_v48 = vmul.f32 %v1113_v37, %v1113_v37  ;;  %v103_v36 = vld [vmem:[%s5711_s0 + $0x2b0] sm:$0xff] }
  0x7a   :  { %v615_v37 = vld [vmem:[%s5712_s1 + $0x2b0] sm:$0xff] }
  0x7b   :  { %v2123_v58 = vadd.f32 %v2122_v53, %v1612_v47  ;;  %v1115_v47 = vsub.f32 %v91_v40, %v603_v41  ;;  %v1626_v53 = vmul.f32 %v1114_v42, %v1114_v42  ;;  %v104_v41 = vld [vmem:[%s5711_s0 + $0x2b8] sm:$0xff] }
  0x7c   :  { %v616_v42 = vld [vmem:[%s5712_s1 + $0x2b8] sm:$0xff] }
  0x7d   :  { %v2124_v63 = vadd.f32 %v2123_v58, %v1613_v52  ;;  %v1116_v52 = vsub.f32 %v92_v45, %v604_v46  ;;  %v1627_v58 = vmul.f32 %v1115_v47, %v1115_v47  ;;  %v105_v46 = vld [vmem:[%s5711_s0 + $0x2c0] sm:$0xff] }
  0x7e   :  { %v617_v47 = vld [vmem:[%s5712_s1 + $0x2c0] sm:$0xff] }
  0x7f   :  { %v2125_v4 = vadd.f32 %v2124_v63, %v1614_v57  ;;  %v1117_v57 = vsub.f32 %v93_v50, %v605_v51  ;;  %v1628_v63 = vmul.f32 %v1116_v52, %v1116_v52  ;;  %v106_v51 = vld [vmem:[%s5711_s0 + $0x2c8] sm:$0xff] }
  0x80   :  { %v618_v52 = vld [vmem:[%s5712_s1 + $0x2c8] sm:$0xff] }
  0x81   :  { %v2126_v9 = vadd.f32 %v2125_v4, %v1615_v62  ;;  %v1118_v62 = vsub.f32 %v94_v55, %v606_v56  ;;  %v1629_v4 = vmul.f32 %v1117_v57, %v1117_v57  ;;  %v107_v56 = vld [vmem:[%s5711_s0 + $0x2d0] sm:$0xff] }
  0x82   :  { %v619_v57 = vld [vmem:[%s5712_s1 + $0x2d0] sm:$0xff] }
  0x83   :  { %v2127_v14 = vadd.f32 %v2126_v9, %v1616_v3  ;;  %v1119_v3 = vsub.f32 %v95_v60, %v607_v61  ;;  %v1630_v9 = vmul.f32 %v1118_v62, %v1118_v62  ;;  %v108_v61 = vld [vmem:[%s5711_s0 + $0x2d8] sm:$0xff] }
  0x84   :  { %v620_v62 = vld [vmem:[%s5712_s1 + $0x2d8] sm:$0xff] }
  0x85   :  { %v2128_v19 = vadd.f32 %v2127_v14, %v1617_v8  ;;  %v1120_v8 = vsub.f32 %v96_v1, %v608_v2  ;;  %v1631_v14 = vmul.f32 %v1119_v3, %v1119_v3  ;;  %v109_v2 = vld [vmem:[%s5711_s0 + $0x2e0] sm:$0xff] }
  0x86   :  { %v621_v3 = vld [vmem:[%s5712_s1 + $0x2e0] sm:$0xff] }
  0x87   :  { %v2129_v24 = vadd.f32 %v2128_v19, %v1618_v13  ;;  %v1121_v13 = vsub.f32 %v97_v6, %v609_v7  ;;  %v1632_v19 = vmul.f32 %v1120_v8, %v1120_v8  ;;  %v110_v7 = vld [vmem:[%s5711_s0 + $0x2e8] sm:$0xff] }
  0x88   :  { %v622_v8 = vld [vmem:[%s5712_s1 + $0x2e8] sm:$0xff] }
  0x89   :  { %v2130_v29 = vadd.f32 %v2129_v24, %v1619_v18  ;;  %v1122_v18 = vsub.f32 %v98_v11, %v610_v12  ;;  %v1633_v24 = vmul.f32 %v1121_v13, %v1121_v13  ;;  %v111_v12 = vld [vmem:[%s5711_s0 + $0x2f0] sm:$0xff] }
  0x8a   :  { %v623_v13 = vld [vmem:[%s5712_s1 + $0x2f0] sm:$0xff] }
  0x8b   :  { %v2131_v34 = vadd.f32 %v2130_v29, %v1620_v23  ;;  %v1123_v23 = vsub.f32 %v99_v16, %v611_v17  ;;  %v1634_v29 = vmul.f32 %v1122_v18, %v1122_v18  ;;  %v112_v17 = vld [vmem:[%s5711_s0 + $0x2f8] sm:$0xff] }
  0x8c   :  { %v624_v18 = vld [vmem:[%s5712_s1 + $0x2f8] sm:$0xff] }
  0x8d   :  { %v2132_v39 = vadd.f32 %v2131_v34, %v1621_v28  ;;  %v1124_v28 = vsub.f32 %v100_v21, %v612_v22  ;;  %v1635_v34 = vmul.f32 %v1123_v23, %v1123_v23  ;;  %v113_v22 = vld [vmem:[%s5711_s0 + $0x300] sm:$0xff] }
  0x8e   :  { %v625_v23 = vld [vmem:[%s5712_s1 + $0x300] sm:$0xff] }
  0x8f   :  { %v2133_v44 = vadd.f32 %v2132_v39, %v1622_v33  ;;  %v1125_v33 = vsub.f32 %v101_v26, %v613_v27  ;;  %v1636_v39 = vmul.f32 %v1124_v28, %v1124_v28  ;;  %v114_v27 = vld [vmem:[%s5711_s0 + $0x308] sm:$0xff] }
  0x90   :  { %v626_v28 = vld [vmem:[%s5712_s1 + $0x308] sm:$0xff] }
  0x91   :  { %v2134_v49 = vadd.f32 %v2133_v44, %v1623_v38  ;;  %v1126_v38 = vsub.f32 %v102_v31, %v614_v32  ;;  %v1637_v44 = vmul.f32 %v1125_v33, %v1125_v33  ;;  %v115_v32 = vld [vmem:[%s5711_s0 + $0x310] sm:$0xff] }
  0x92   :  { %v627_v33 = vld [vmem:[%s5712_s1 + $0x310] sm:$0xff] }
  0x93   :  { %v2135_v54 = vadd.f32 %v2134_v49, %v1624_v43  ;;  %v1127_v43 = vsub.f32 %v103_v36, %v615_v37  ;;  %v1638_v49 = vmul.f32 %v1126_v38, %v1126_v38  ;;  %v116_v37 = vld [vmem:[%s5711_s0 + $0x318] sm:$0xff] }
  0x94   :  { %v628_v38 = vld [vmem:[%s5712_s1 + $0x318] sm:$0xff] }
  0x95   :  { %v2136_v59 = vadd.f32 %v2135_v54, %v1625_v48  ;;  %v1128_v48 = vsub.f32 %v104_v41, %v616_v42  ;;  %v1639_v54 = vmul.f32 %v1127_v43, %v1127_v43  ;;  %v117_v42 = vld [vmem:[%s5711_s0 + $0x320] sm:$0xff] }
  0x96   :  { %v629_v43 = vld [vmem:[%s5712_s1 + $0x320] sm:$0xff] }
  0x97   :  { %v2137_v0 = vadd.f32 %v2136_v59, %v1626_v53  ;;  %v1129_v53 = vsub.f32 %v105_v46, %v617_v47  ;;  %v1640_v59 = vmul.f32 %v1128_v48, %v1128_v48  ;;  %v118_v47 = vld [vmem:[%s5711_s0 + $0x328] sm:$0xff] }
  0x98   :  { %v630_v48 = vld [vmem:[%s5712_s1 + $0x328] sm:$0xff] }
  0x99   :  { %v2138_v5 = vadd.f32 %v2137_v0, %v1627_v58  ;;  %v1130_v58 = vsub.f32 %v106_v51, %v618_v52  ;;  %v1641_v0 = vmul.f32 %v1129_v53, %v1129_v53  ;;  %v119_v52 = vld [vmem:[%s5711_s0 + $0x330] sm:$0xff] }
  0x9a   :  { %v631_v53 = vld [vmem:[%s5712_s1 + $0x330] sm:$0xff] }
  0x9b   :  { %v2139_v10 = vadd.f32 %v2138_v5, %v1628_v63  ;;  %v1131_v63 = vsub.f32 %v107_v56, %v619_v57  ;;  %v1642_v5 = vmul.f32 %v1130_v58, %v1130_v58  ;;  %v120_v57 = vld [vmem:[%s5711_s0 + $0x338] sm:$0xff] }
  0x9c   :  { %v632_v58 = vld [vmem:[%s5712_s1 + $0x338] sm:$0xff] }
  0x9d   :  { %v2140_v15 = vadd.f32 %v2139_v10, %v1629_v4  ;;  %v1132_v4 = vsub.f32 %v108_v61, %v620_v62  ;;  %v1643_v10 = vmul.f32 %v1131_v63, %v1131_v63  ;;  %v121_v62 = vld [vmem:[%s5711_s0 + $0x340] sm:$0xff] }
  0x9e   :  { %v633_v63 = vld [vmem:[%s5712_s1 + $0x340] sm:$0xff] }
  0x9f   :  { %v2141_v20 = vadd.f32 %v2140_v15, %v1630_v9  ;;  %v1133_v9 = vsub.f32 %v109_v2, %v621_v3  ;;  %v1644_v15 = vmul.f32 %v1132_v4, %v1132_v4  ;;  %v122_v3 = vld [vmem:[%s5711_s0 + $0x348] sm:$0xff] }
  0xa0   :  { %v634_v4 = vld [vmem:[%s5712_s1 + $0x348] sm:$0xff] }
  0xa1   :  { %v2142_v25 = vadd.f32 %v2141_v20, %v1631_v14  ;;  %v1134_v14 = vsub.f32 %v110_v7, %v622_v8  ;;  %v1645_v20 = vmul.f32 %v1133_v9, %v1133_v9  ;;  %v123_v8 = vld [vmem:[%s5711_s0 + $0x350] sm:$0xff] }
  0xa2   :  { %v635_v9 = vld [vmem:[%s5712_s1 + $0x350] sm:$0xff] }
  0xa3   :  { %v2143_v30 = vadd.f32 %v2142_v25, %v1632_v19  ;;  %v1135_v19 = vsub.f32 %v111_v12, %v623_v13  ;;  %v1646_v25 = vmul.f32 %v1134_v14, %v1134_v14  ;;  %v124_v13 = vld [vmem:[%s5711_s0 + $0x358] sm:$0xff] }
  0xa4   :  { %v636_v14 = vld [vmem:[%s5712_s1 + $0x358] sm:$0xff] }
  0xa5   :  { %v2144_v35 = vadd.f32 %v2143_v30, %v1633_v24  ;;  %v1136_v24 = vsub.f32 %v112_v17, %v624_v18  ;;  %v1647_v30 = vmul.f32 %v1135_v19, %v1135_v19  ;;  %v125_v18 = vld [vmem:[%s5711_s0 + $0x360] sm:$0xff] }
  0xa6   :  { %v637_v19 = vld [vmem:[%s5712_s1 + $0x360] sm:$0xff] }
  0xa7   :  { %v2145_v40 = vadd.f32 %v2144_v35, %v1634_v29  ;;  %v1137_v29 = vsub.f32 %v113_v22, %v625_v23  ;;  %v1648_v35 = vmul.f32 %v1136_v24, %v1136_v24  ;;  %v126_v23 = vld [vmem:[%s5711_s0 + $0x368] sm:$0xff] }
  0xa8   :  { %v638_v24 = vld [vmem:[%s5712_s1 + $0x368] sm:$0xff] }
  0xa9   :  { %v2146_v45 = vadd.f32 %v2145_v40, %v1635_v34  ;;  %v1138_v34 = vsub.f32 %v114_v27, %v626_v28  ;;  %v1649_v40 = vmul.f32 %v1137_v29, %v1137_v29  ;;  %v127_v28 = vld [vmem:[%s5711_s0 + $0x370] sm:$0xff] }
  0xaa   :  { %v639_v29 = vld [vmem:[%s5712_s1 + $0x370] sm:$0xff] }
  0xab   :  { %v2147_v50 = vadd.f32 %v2146_v45, %v1636_v39  ;;  %v1139_v39 = vsub.f32 %v115_v32, %v627_v33  ;;  %v1650_v45 = vmul.f32 %v1138_v34, %v1138_v34  ;;  %v128_v33 = vld [vmem:[%s5711_s0 + $0x378] sm:$0xff] }
  0xac   :  { %v640_v34 = vld [vmem:[%s5712_s1 + $0x378] sm:$0xff] }
  0xad   :  { %v2148_v55 = vadd.f32 %v2147_v50, %v1637_v44  ;;  %v1140_v44 = vsub.f32 %v116_v37, %v628_v38  ;;  %v1651_v50 = vmul.f32 %v1139_v39, %v1139_v39  ;;  %v129_v38 = vld [vmem:[%s5711_s0 + $0x380] sm:$0xff] }
  0xae   :  { %v641_v39 = vld [vmem:[%s5712_s1 + $0x380] sm:$0xff] }
  0xaf   :  { %v2149_v60 = vadd.f32 %v2148_v55, %v1638_v49  ;;  %v1141_v49 = vsub.f32 %v117_v42, %v629_v43  ;;  %v1652_v55 = vmul.f32 %v1140_v44, %v1140_v44  ;;  %v130_v43 = vld [vmem:[%s5711_s0 + $0x388] sm:$0xff] }
  0xb0   :  { %v642_v44 = vld [vmem:[%s5712_s1 + $0x388] sm:$0xff] }
  0xb1   :  { %v2150_v1 = vadd.f32 %v2149_v60, %v1639_v54  ;;  %v1142_v54 = vsub.f32 %v118_v47, %v630_v48  ;;  %v1653_v60 = vmul.f32 %v1141_v49, %v1141_v49  ;;  %v131_v48 = vld [vmem:[%s5711_s0 + $0x390] sm:$0xff] }
  0xb2   :  { %v643_v49 = vld [vmem:[%s5712_s1 + $0x390] sm:$0xff] }
  0xb3   :  { %v2151_v6 = vadd.f32 %v2150_v1, %v1640_v59  ;;  %v1143_v59 = vsub.f32 %v119_v52, %v631_v53  ;;  %v1654_v1 = vmul.f32 %v1142_v54, %v1142_v54  ;;  %v132_v53 = vld [vmem:[%s5711_s0 + $0x398] sm:$0xff] }
  0xb4   :  { %v644_v54 = vld [vmem:[%s5712_s1 + $0x398] sm:$0xff] }
  0xb5   :  { %v2152_v11 = vadd.f32 %v2151_v6, %v1641_v0  ;;  %v1144_v0 = vsub.f32 %v120_v57, %v632_v58  ;;  %v1655_v6 = vmul.f32 %v1143_v59, %v1143_v59  ;;  %v133_v58 = vld [vmem:[%s5711_s0 + $0x3a0] sm:$0xff] }
  0xb6   :  { %v645_v59 = vld [vmem:[%s5712_s1 + $0x3a0] sm:$0xff] }
  0xb7   :  { %v2153_v16 = vadd.f32 %v2152_v11, %v1642_v5  ;;  %v1145_v5 = vsub.f32 %v121_v62, %v633_v63  ;;  %v1656_v11 = vmul.f32 %v1144_v0, %v1144_v0  ;;  %v134_v63 = vld [vmem:[%s5711_s0 + $0x3a8] sm:$0xff] }
  0xb8   :  { %v646_v0 = vld [vmem:[%s5712_s1 + $0x3a8] sm:$0xff] }
  0xb9   :  { %v2154_v21 = vadd.f32 %v2153_v16, %v1643_v10  ;;  %v1146_v10 = vsub.f32 %v122_v3, %v634_v4  ;;  %v1657_v16 = vmul.f32 %v1145_v5, %v1145_v5  ;;  %v135_v4 = vld [vmem:[%s5711_s0 + $0x3b0] sm:$0xff] }
  0xba   :  { %v647_v5 = vld [vmem:[%s5712_s1 + $0x3b0] sm:$0xff] }
  0xbb   :  { %v2155_v26 = vadd.f32 %v2154_v21, %v1644_v15  ;;  %v1147_v15 = vsub.f32 %v123_v8, %v635_v9  ;;  %v1658_v21 = vmul.f32 %v1146_v10, %v1146_v10  ;;  %v136_v9 = vld [vmem:[%s5711_s0 + $0x3b8] sm:$0xff] }
  0xbc   :  { %v648_v10 = vld [vmem:[%s5712_s1 + $0x3b8] sm:$0xff] }
  0xbd   :  { %v2156_v31 = vadd.f32 %v2155_v26, %v1645_v20  ;;  %v1148_v20 = vsub.f32 %v124_v13, %v636_v14  ;;  %v1659_v26 = vmul.f32 %v1147_v15, %v1147_v15  ;;  %v137_v14 = vld [vmem:[%s5711_s0 + $0x3c0] sm:$0xff] }
  0xbe   :  { %v649_v15 = vld [vmem:[%s5712_s1 + $0x3c0] sm:$0xff] }
  0xbf   :  { %v2157_v36 = vadd.f32 %v2156_v31, %v1646_v25  ;;  %v1149_v25 = vsub.f32 %v125_v18, %v637_v19  ;;  %v1660_v31 = vmul.f32 %v1148_v20, %v1148_v20  ;;  %v138_v19 = vld [vmem:[%s5711_s0 + $0x3c8] sm:$0xff] }
  0xc0   :  { %v650_v20 = vld [vmem:[%s5712_s1 + $0x3c8] sm:$0xff] }
  0xc1   :  { %v2158_v41 = vadd.f32 %v2157_v36, %v1647_v30  ;;  %v1150_v30 = vsub.f32 %v126_v23, %v638_v24  ;;  %v1661_v36 = vmul.f32 %v1149_v25, %v1149_v25  ;;  %v139_v24 = vld [vmem:[%s5711_s0 + $0x3d0] sm:$0xff] }
  0xc2   :  { %v651_v25 = vld [vmem:[%s5712_s1 + $0x3d0] sm:$0xff] }
  0xc3   :  { %v2159_v46 = vadd.f32 %v2158_v41, %v1648_v35  ;;  %v1151_v35 = vsub.f32 %v127_v28, %v639_v29  ;;  %v1662_v41 = vmul.f32 %v1150_v30, %v1150_v30  ;;  %v140_v29 = vld [vmem:[%s5711_s0 + $0x3d8] sm:$0xff] }
  0xc4   :  { %v652_v30 = vld [vmem:[%s5712_s1 + $0x3d8] sm:$0xff] }
  0xc5   :  { %v2160_v51 = vadd.f32 %v2159_v46, %v1649_v40  ;;  %v1152_v40 = vsub.f32 %v128_v33, %v640_v34  ;;  %v1663_v46 = vmul.f32 %v1151_v35, %v1151_v35  ;;  %v141_v34 = vld [vmem:[%s5711_s0 + $0x3e0] sm:$0xff] }
  0xc6   :  { %v653_v35 = vld [vmem:[%s5712_s1 + $0x3e0] sm:$0xff] }
  0xc7   :  { %v2161_v56 = vadd.f32 %v2160_v51, %v1650_v45  ;;  %v1153_v45 = vsub.f32 %v129_v38, %v641_v39  ;;  %v1664_v51 = vmul.f32 %v1152_v40, %v1152_v40  ;;  %v142_v39 = vld [vmem:[%s5711_s0 + $0x3e8] sm:$0xff] }
  0xc8   :  { %v654_v40 = vld [vmem:[%s5712_s1 + $0x3e8] sm:$0xff] }
  0xc9   :  { %v2162_v61 = vadd.f32 %v2161_v56, %v1651_v50  ;;  %v1154_v50 = vsub.f32 %v130_v43, %v642_v44  ;;  %v1665_v56 = vmul.f32 %v1153_v45, %v1153_v45  ;;  %v143_v44 = vld [vmem:[%s5711_s0 + $0x3f0] sm:$0xff] }
  0xca   :  { %v655_v45 = vld [vmem:[%s5712_s1 + $0x3f0] sm:$0xff] }
  0xcb   :  { %v2163_v2 = vadd.f32 %v2162_v61, %v1652_v55  ;;  %v1155_v55 = vsub.f32 %v131_v48, %v643_v49  ;;  %v1666_v61 = vmul.f32 %v1154_v50, %v1154_v50  ;;  %v144_v49 = vld [vmem:[%s5711_s0 + $0x3f8] sm:$0xff] }
  0xcc   :  { %v656_v50 = vld [vmem:[%s5712_s1 + $0x3f8] sm:$0xff] }
  0xcd   :  { %v2164_v7 = vadd.f32 %v2163_v2, %v1653_v60  ;;  %v1156_v60 = vsub.f32 %v132_v53, %v644_v54  ;;  %v1667_v2 = vmul.f32 %v1155_v55, %v1155_v55  ;;  %v145_v54 = vld [vmem:[%s5711_s0 + $0x400] sm:$0xff] }
  0xce   :  { %v657_v55 = vld [vmem:[%s5712_s1 + $0x400] sm:$0xff] }
  0xcf   :  { %v2165_v12 = vadd.f32 %v2164_v7, %v1654_v1  ;;  %v1157_v1 = vsub.f32 %v133_v58, %v645_v59  ;;  %v1668_v7 = vmul.f32 %v1156_v60, %v1156_v60  ;;  %v146_v59 = vld [vmem:[%s5711_s0 + $0x408] sm:$0xff] }
  0xd0   :  { %v658_v60 = vld [vmem:[%s5712_s1 + $0x408] sm:$0xff] }
  0xd1   :  { %v2166_v17 = vadd.f32 %v2165_v12, %v1655_v6  ;;  %v1158_v6 = vsub.f32 %v134_v63, %v646_v0  ;;  %v1669_v12 = vmul.f32 %v1157_v1, %v1157_v1  ;;  %v147_v0 = vld [vmem:[%s5711_s0 + $0x410] sm:$0xff] }
  0xd2   :  { %v659_v1 = vld [vmem:[%s5712_s1 + $0x410] sm:$0xff] }
  0xd3   :  { %v2167_v22 = vadd.f32 %v2166_v17, %v1656_v11  ;;  %v1159_v11 = vsub.f32 %v135_v4, %v647_v5  ;;  %v1670_v17 = vmul.f32 %v1158_v6, %v1158_v6  ;;  %v148_v5 = vld [vmem:[%s5711_s0 + $0x418] sm:$0xff] }
  0xd4   :  { %v660_v6 = vld [vmem:[%s5712_s1 + $0x418] sm:$0xff] }
  0xd5   :  { %v2168_v27 = vadd.f32 %v2167_v22, %v1657_v16  ;;  %v1160_v16 = vsub.f32 %v136_v9, %v648_v10  ;;  %v1671_v22 = vmul.f32 %v1159_v11, %v1159_v11  ;;  %v149_v10 = vld [vmem:[%s5711_s0 + $0x420] sm:$0xff] }
  0xd6   :  { %v661_v11 = vld [vmem:[%s5712_s1 + $0x420] sm:$0xff] }
  0xd7   :  { %v2169_v32 = vadd.f32 %v2168_v27, %v1658_v21  ;;  %v1161_v21 = vsub.f32 %v137_v14, %v649_v15  ;;  %v1672_v27 = vmul.f32 %v1160_v16, %v1160_v16  ;;  %v150_v15 = vld [vmem:[%s5711_s0 + $0x428] sm:$0xff] }
  0xd8   :  { %v662_v16 = vld [vmem:[%s5712_s1 + $0x428] sm:$0xff] }
  0xd9   :  { %v2170_v37 = vadd.f32 %v2169_v32, %v1659_v26  ;;  %v1162_v26 = vsub.f32 %v138_v19, %v650_v20  ;;  %v1673_v32 = vmul.f32 %v1161_v21, %v1161_v21  ;;  %v151_v20 = vld [vmem:[%s5711_s0 + $0x430] sm:$0xff] }
  0xda   :  { %v663_v21 = vld [vmem:[%s5712_s1 + $0x430] sm:$0xff] }
  0xdb   :  { %v2171_v42 = vadd.f32 %v2170_v37, %v1660_v31  ;;  %v1163_v31 = vsub.f32 %v139_v24, %v651_v25  ;;  %v1674_v37 = vmul.f32 %v1162_v26, %v1162_v26  ;;  %v152_v25 = vld [vmem:[%s5711_s0 + $0x438] sm:$0xff] }
  0xdc   :  { %v664_v26 = vld [vmem:[%s5712_s1 + $0x438] sm:$0xff] }
  0xdd   :  { %v2172_v47 = vadd.f32 %v2171_v42, %v1661_v36  ;;  %v1164_v36 = vsub.f32 %v140_v29, %v652_v30  ;;  %v1675_v42 = vmul.f32 %v1163_v31, %v1163_v31  ;;  %v153_v30 = vld [vmem:[%s5711_s0 + $0x440] sm:$0xff] }
  0xde   :  { %v665_v31 = vld [vmem:[%s5712_s1 + $0x440] sm:$0xff] }
  0xdf   :  { %v2173_v52 = vadd.f32 %v2172_v47, %v1662_v41  ;;  %v1165_v41 = vsub.f32 %v141_v34, %v653_v35  ;;  %v1676_v47 = vmul.f32 %v1164_v36, %v1164_v36  ;;  %v154_v35 = vld [vmem:[%s5711_s0 + $0x448] sm:$0xff] }
  0xe0   :  { %v666_v36 = vld [vmem:[%s5712_s1 + $0x448] sm:$0xff] }
  0xe1   :  { %v2174_v57 = vadd.f32 %v2173_v52, %v1663_v46  ;;  %v1166_v46 = vsub.f32 %v142_v39, %v654_v40  ;;  %v1677_v52 = vmul.f32 %v1165_v41, %v1165_v41  ;;  %v155_v40 = vld [vmem:[%s5711_s0 + $0x450] sm:$0xff] }
  0xe2   :  { %v667_v41 = vld [vmem:[%s5712_s1 + $0x450] sm:$0xff] }
  0xe3   :  { %v2175_v62 = vadd.f32 %v2174_v57, %v1664_v51  ;;  %v1167_v51 = vsub.f32 %v143_v44, %v655_v45  ;;  %v1678_v57 = vmul.f32 %v1166_v46, %v1166_v46  ;;  %v156_v45 = vld [vmem:[%s5711_s0 + $0x458] sm:$0xff] }
  0xe4   :  { %v668_v46 = vld [vmem:[%s5712_s1 + $0x458] sm:$0xff] }
  0xe5   :  { %v2176_v3 = vadd.f32 %v2175_v62, %v1665_v56  ;;  %v1168_v56 = vsub.f32 %v144_v49, %v656_v50  ;;  %v1679_v62 = vmul.f32 %v1167_v51, %v1167_v51  ;;  %v157_v50 = vld [vmem:[%s5711_s0 + $0x460] sm:$0xff] }
  0xe6   :  { %v669_v51 = vld [vmem:[%s5712_s1 + $0x460] sm:$0xff] }
  0xe7   :  { %v2177_v8 = vadd.f32 %v2176_v3, %v1666_v61  ;;  %v1169_v61 = vsub.f32 %v145_v54, %v657_v55  ;;  %v1680_v3 = vmul.f32 %v1168_v56, %v1168_v56  ;;  %v158_v55 = vld [vmem:[%s5711_s0 + $0x468] sm:$0xff] }
  0xe8   :  { %v670_v56 = vld [vmem:[%s5712_s1 + $0x468] sm:$0xff] }
  0xe9   :  { %v2178_v13 = vadd.f32 %v2177_v8, %v1667_v2  ;;  %v1170_v2 = vsub.f32 %v146_v59, %v658_v60  ;;  %v1681_v8 = vmul.f32 %v1169_v61, %v1169_v61  ;;  %v159_v60 = vld [vmem:[%s5711_s0 + $0x470] sm:$0xff] }
  0xea   :  { %v671_v61 = vld [vmem:[%s5712_s1 + $0x470] sm:$0xff] }
  0xeb   :  { %v2179_v18 = vadd.f32 %v2178_v13, %v1668_v7  ;;  %v1171_v7 = vsub.f32 %v147_v0, %v659_v1  ;;  %v1682_v13 = vmul.f32 %v1170_v2, %v1170_v2  ;;  %v160_v1 = vld [vmem:[%s5711_s0 + $0x478] sm:$0xff] }
  0xec   :  { %v672_v2 = vld [vmem:[%s5712_s1 + $0x478] sm:$0xff] }
  0xed   :  { %v2180_v23 = vadd.f32 %v2179_v18, %v1669_v12  ;;  %v1172_v12 = vsub.f32 %v148_v5, %v660_v6  ;;  %v1683_v18 = vmul.f32 %v1171_v7, %v1171_v7  ;;  %v161_v6 = vld [vmem:[%s5711_s0 + $0x480] sm:$0xff] }
  0xee   :  { %v673_v7 = vld [vmem:[%s5712_s1 + $0x480] sm:$0xff] }
  0xef   :  { %v2181_v28 = vadd.f32 %v2180_v23, %v1670_v17  ;;  %v1173_v17 = vsub.f32 %v149_v10, %v661_v11  ;;  %v1684_v23 = vmul.f32 %v1172_v12, %v1172_v12  ;;  %v162_v11 = vld [vmem:[%s5711_s0 + $0x488] sm:$0xff] }
  0xf0   :  { %v674_v12 = vld [vmem:[%s5712_s1 + $0x488] sm:$0xff] }
  0xf1   :  { %v2182_v33 = vadd.f32 %v2181_v28, %v1671_v22  ;;  %v1174_v22 = vsub.f32 %v150_v15, %v662_v16  ;;  %v1685_v28 = vmul.f32 %v1173_v17, %v1173_v17  ;;  %v163_v16 = vld [vmem:[%s5711_s0 + $0x490] sm:$0xff] }
  0xf2   :  { %v675_v17 = vld [vmem:[%s5712_s1 + $0x490] sm:$0xff] }
  0xf3   :  { %v2183_v38 = vadd.f32 %v2182_v33, %v1672_v27  ;;  %v1175_v27 = vsub.f32 %v151_v20, %v663_v21  ;;  %v1686_v33 = vmul.f32 %v1174_v22, %v1174_v22  ;;  %v164_v21 = vld [vmem:[%s5711_s0 + $0x498] sm:$0xff] }
  0xf4   :  { %v676_v22 = vld [vmem:[%s5712_s1 + $0x498] sm:$0xff] }
  0xf5   :  { %v2184_v43 = vadd.f32 %v2183_v38, %v1673_v32  ;;  %v1176_v32 = vsub.f32 %v152_v25, %v664_v26  ;;  %v1687_v38 = vmul.f32 %v1175_v27, %v1175_v27  ;;  %v165_v26 = vld [vmem:[%s5711_s0 + $0x4a0] sm:$0xff] }
  0xf6   :  { %v677_v27 = vld [vmem:[%s5712_s1 + $0x4a0] sm:$0xff] }
  0xf7   :  { %v2185_v48 = vadd.f32 %v2184_v43, %v1674_v37  ;;  %v1177_v37 = vsub.f32 %v153_v30, %v665_v31  ;;  %v1688_v43 = vmul.f32 %v1176_v32, %v1176_v32  ;;  %v166_v31 = vld [vmem:[%s5711_s0 + $0x4a8] sm:$0xff] }
  0xf8   :  { %v678_v32 = vld [vmem:[%s5712_s1 + $0x4a8] sm:$0xff] }
  0xf9   :  { %v2186_v53 = vadd.f32 %v2185_v48, %v1675_v42  ;;  %v1178_v42 = vsub.f32 %v154_v35, %v666_v36  ;;  %v1689_v48 = vmul.f32 %v1177_v37, %v1177_v37  ;;  %v167_v36 = vld [vmem:[%s5711_s0 + $0x4b0] sm:$0xff] }
  0xfa   :  { %v679_v37 = vld [vmem:[%s5712_s1 + $0x4b0] sm:$0xff] }
  0xfb   :  { %v2187_v58 = vadd.f32 %v2186_v53, %v1676_v47  ;;  %v1179_v47 = vsub.f32 %v155_v40, %v667_v41  ;;  %v1690_v53 = vmul.f32 %v1178_v42, %v1178_v42  ;;  %v168_v41 = vld [vmem:[%s5711_s0 + $0x4b8] sm:$0xff] }
  0xfc   :  { %v680_v42 = vld [vmem:[%s5712_s1 + $0x4b8] sm:$0xff] }
  0xfd   :  { %v2188_v63 = vadd.f32 %v2187_v58, %v1677_v52  ;;  %v1180_v52 = vsub.f32 %v156_v45, %v668_v46  ;;  %v1691_v58 = vmul.f32 %v1179_v47, %v1179_v47  ;;  %v169_v46 = vld [vmem:[%s5711_s0 + $0x4c0] sm:$0xff] }
  0xfe   :  { %v681_v47 = vld [vmem:[%s5712_s1 + $0x4c0] sm:$0xff] }
  0xff   :  { %v2189_v4 = vadd.f32 %v2188_v63, %v1678_v57  ;;  %v1181_v57 = vsub.f32 %v157_v50, %v669_v51  ;;  %v1692_v63 = vmul.f32 %v1180_v52, %v1180_v52  ;;  %v170_v51 = vld [vmem:[%s5711_s0 + $0x4c8] sm:$0xff] }
 0x100   :  { %v682_v52 = vld [vmem:[%s5712_s1 + $0x4c8] sm:$0xff] }
 0x101   :  { %v2190_v9 = vadd.f32 %v2189_v4, %v1679_v62  ;;  %v1182_v62 = vsub.f32 %v158_v55, %v670_v56  ;;  %v1693_v4 = vmul.f32 %v1181_v57, %v1181_v57  ;;  %v171_v56 = vld [vmem:[%s5711_s0 + $0x4d0] sm:$0xff] }
 0x102   :  { %v683_v57 = vld [vmem:[%s5712_s1 + $0x4d0] sm:$0xff] }
 0x103   :  { %v2191_v14 = vadd.f32 %v2190_v9, %v1680_v3  ;;  %v1183_v3 = vsub.f32 %v159_v60, %v671_v61  ;;  %v1694_v9 = vmul.f32 %v1182_v62, %v1182_v62  ;;  %v172_v61 = vld [vmem:[%s5711_s0 + $0x4d8] sm:$0xff] }
 0x104   :  { %v684_v62 = vld [vmem:[%s5712_s1 + $0x4d8] sm:$0xff] }
 0x105   :  { %v2192_v19 = vadd.f32 %v2191_v14, %v1681_v8  ;;  %v1184_v8 = vsub.f32 %v160_v1, %v672_v2  ;;  %v1695_v14 = vmul.f32 %v1183_v3, %v1183_v3  ;;  %v173_v2 = vld [vmem:[%s5711_s0 + $0x4e0] sm:$0xff] }
 0x106   :  { %v685_v3 = vld [vmem:[%s5712_s1 + $0x4e0] sm:$0xff] }
 0x107   :  { %v2193_v24 = vadd.f32 %v2192_v19, %v1682_v13  ;;  %v1185_v13 = vsub.f32 %v161_v6, %v673_v7  ;;  %v1696_v19 = vmul.f32 %v1184_v8, %v1184_v8  ;;  %v174_v7 = vld [vmem:[%s5711_s0 + $0x4e8] sm:$0xff] }
 0x108   :  { %v686_v8 = vld [vmem:[%s5712_s1 + $0x4e8] sm:$0xff] }
 0x109   :  { %v2194_v29 = vadd.f32 %v2193_v24, %v1683_v18  ;;  %v1186_v18 = vsub.f32 %v162_v11, %v674_v12  ;;  %v1697_v24 = vmul.f32 %v1185_v13, %v1185_v13  ;;  %v175_v12 = vld [vmem:[%s5711_s0 + $0x4f0] sm:$0xff] }
 0x10a   :  { %v687_v13 = vld [vmem:[%s5712_s1 + $0x4f0] sm:$0xff] }
 0x10b   :  { %v2195_v34 = vadd.f32 %v2194_v29, %v1684_v23  ;;  %v1187_v23 = vsub.f32 %v163_v16, %v675_v17  ;;  %v1698_v29 = vmul.f32 %v1186_v18, %v1186_v18  ;;  %v176_v17 = vld [vmem:[%s5711_s0 + $0x4f8] sm:$0xff] }
 0x10c   :  { %v688_v18 = vld [vmem:[%s5712_s1 + $0x4f8] sm:$0xff] }
 0x10d   :  { %v2196_v39 = vadd.f32 %v2195_v34, %v1685_v28  ;;  %v1188_v28 = vsub.f32 %v164_v21, %v676_v22  ;;  %v1699_v34 = vmul.f32 %v1187_v23, %v1187_v23  ;;  %v177_v22 = vld [vmem:[%s5711_s0 + $0x500] sm:$0xff] }
 0x10e   :  { %v689_v23 = vld [vmem:[%s5712_s1 + $0x500] sm:$0xff] }
 0x10f   :  { %v2197_v44 = vadd.f32 %v2196_v39, %v1686_v33  ;;  %v1189_v33 = vsub.f32 %v165_v26, %v677_v27  ;;  %v1700_v39 = vmul.f32 %v1188_v28, %v1188_v28  ;;  %v178_v27 = vld [vmem:[%s5711_s0 + $0x508] sm:$0xff] }
 0x110   :  { %v690_v28 = vld [vmem:[%s5712_s1 + $0x508] sm:$0xff] }
 0x111   :  { %v2198_v49 = vadd.f32 %v2197_v44, %v1687_v38  ;;  %v1190_v38 = vsub.f32 %v166_v31, %v678_v32  ;;  %v1701_v44 = vmul.f32 %v1189_v33, %v1189_v33  ;;  %v179_v32 = vld [vmem:[%s5711_s0 + $0x510] sm:$0xff] }
 0x112   :  { %v691_v33 = vld [vmem:[%s5712_s1 + $0x510] sm:$0xff] }
 0x113   :  { %v2199_v54 = vadd.f32 %v2198_v49, %v1688_v43  ;;  %v1191_v43 = vsub.f32 %v167_v36, %v679_v37  ;;  %v1702_v49 = vmul.f32 %v1190_v38, %v1190_v38  ;;  %v180_v37 = vld [vmem:[%s5711_s0 + $0x518] sm:$0xff] }
 0x114   :  { %v692_v38 = vld [vmem:[%s5712_s1 + $0x518] sm:$0xff] }
 0x115   :  { %v2200_v59 = vadd.f32 %v2199_v54, %v1689_v48  ;;  %v1192_v48 = vsub.f32 %v168_v41, %v680_v42  ;;  %v1703_v54 = vmul.f32 %v1191_v43, %v1191_v43  ;;  %v181_v42 = vld [vmem:[%s5711_s0 + $0x520] sm:$0xff] }
 0x116   :  { %v693_v43 = vld [vmem:[%s5712_s1 + $0x520] sm:$0xff] }
 0x117   :  { %v2201_v0 = vadd.f32 %v2200_v59, %v1690_v53  ;;  %v1193_v53 = vsub.f32 %v169_v46, %v681_v47  ;;  %v1704_v59 = vmul.f32 %v1192_v48, %v1192_v48  ;;  %v182_v47 = vld [vmem:[%s5711_s0 + $0x528] sm:$0xff] }
 0x118   :  { %v694_v48 = vld [vmem:[%s5712_s1 + $0x528] sm:$0xff] }
 0x119   :  { %v2202_v5 = vadd.f32 %v2201_v0, %v1691_v58  ;;  %v1194_v58 = vsub.f32 %v170_v51, %v682_v52  ;;  %v1705_v0 = vmul.f32 %v1193_v53, %v1193_v53  ;;  %v183_v52 = vld [vmem:[%s5711_s0 + $0x530] sm:$0xff] }
 0x11a   :  { %v695_v53 = vld [vmem:[%s5712_s1 + $0x530] sm:$0xff] }
 0x11b   :  { %v2203_v10 = vadd.f32 %v2202_v5, %v1692_v63  ;;  %v1195_v63 = vsub.f32 %v171_v56, %v683_v57  ;;  %v1706_v5 = vmul.f32 %v1194_v58, %v1194_v58  ;;  %v184_v57 = vld [vmem:[%s5711_s0 + $0x538] sm:$0xff] }
 0x11c   :  { %v696_v58 = vld [vmem:[%s5712_s1 + $0x538] sm:$0xff] }
 0x11d   :  { %v2204_v15 = vadd.f32 %v2203_v10, %v1693_v4  ;;  %v1196_v4 = vsub.f32 %v172_v61, %v684_v62  ;;  %v1707_v10 = vmul.f32 %v1195_v63, %v1195_v63  ;;  %v185_v62 = vld [vmem:[%s5711_s0 + $0x540] sm:$0xff] }
 0x11e   :  { %v697_v63 = vld [vmem:[%s5712_s1 + $0x540] sm:$0xff] }
 0x11f   :  { %v2205_v20 = vadd.f32 %v2204_v15, %v1694_v9  ;;  %v1197_v9 = vsub.f32 %v173_v2, %v685_v3  ;;  %v1708_v15 = vmul.f32 %v1196_v4, %v1196_v4  ;;  %v186_v3 = vld [vmem:[%s5711_s0 + $0x548] sm:$0xff] }
 0x120   :  { %v698_v4 = vld [vmem:[%s5712_s1 + $0x548] sm:$0xff] }
 0x121   :  { %v2206_v25 = vadd.f32 %v2205_v20, %v1695_v14  ;;  %v1198_v14 = vsub.f32 %v174_v7, %v686_v8  ;;  %v1709_v20 = vmul.f32 %v1197_v9, %v1197_v9  ;;  %v187_v8 = vld [vmem:[%s5711_s0 + $0x550] sm:$0xff] }
 0x122   :  { %v699_v9 = vld [vmem:[%s5712_s1 + $0x550] sm:$0xff] }
 0x123   :  { %v2207_v30 = vadd.f32 %v2206_v25, %v1696_v19  ;;  %v1199_v19 = vsub.f32 %v175_v12, %v687_v13  ;;  %v1710_v25 = vmul.f32 %v1198_v14, %v1198_v14  ;;  %v188_v13 = vld [vmem:[%s5711_s0 + $0x558] sm:$0xff] }
 0x124   :  { %v700_v14 = vld [vmem:[%s5712_s1 + $0x558] sm:$0xff] }
 0x125   :  { %v2208_v35 = vadd.f32 %v2207_v30, %v1697_v24  ;;  %v1200_v24 = vsub.f32 %v176_v17, %v688_v18  ;;  %v1711_v30 = vmul.f32 %v1199_v19, %v1199_v19  ;;  %v189_v18 = vld [vmem:[%s5711_s0 + $0x560] sm:$0xff] }
 0x126   :  { %v701_v19 = vld [vmem:[%s5712_s1 + $0x560] sm:$0xff] }
 0x127   :  { %v2209_v40 = vadd.f32 %v2208_v35, %v1698_v29  ;;  %v1201_v29 = vsub.f32 %v177_v22, %v689_v23  ;;  %v1712_v35 = vmul.f32 %v1200_v24, %v1200_v24  ;;  %v190_v23 = vld [vmem:[%s5711_s0 + $0x568] sm:$0xff] }
 0x128   :  { %v702_v24 = vld [vmem:[%s5712_s1 + $0x568] sm:$0xff] }
 0x129   :  { %v2210_v45 = vadd.f32 %v2209_v40, %v1699_v34  ;;  %v1202_v34 = vsub.f32 %v178_v27, %v690_v28  ;;  %v1713_v40 = vmul.f32 %v1201_v29, %v1201_v29  ;;  %v191_v28 = vld [vmem:[%s5711_s0 + $0x570] sm:$0xff] }
 0x12a   :  { %v703_v29 = vld [vmem:[%s5712_s1 + $0x570] sm:$0xff] }
 0x12b   :  { %v2211_v50 = vadd.f32 %v2210_v45, %v1700_v39  ;;  %v1203_v39 = vsub.f32 %v179_v32, %v691_v33  ;;  %v1714_v45 = vmul.f32 %v1202_v34, %v1202_v34  ;;  %v192_v33 = vld [vmem:[%s5711_s0 + $0x578] sm:$0xff] }
 0x12c   :  { %v704_v34 = vld [vmem:[%s5712_s1 + $0x578] sm:$0xff] }
 0x12d   :  { %v2212_v55 = vadd.f32 %v2211_v50, %v1701_v44  ;;  %v1204_v44 = vsub.f32 %v180_v37, %v692_v38  ;;  %v1715_v50 = vmul.f32 %v1203_v39, %v1203_v39  ;;  %v193_v38 = vld [vmem:[%s5711_s0 + $0x580] sm:$0xff] }
 0x12e   :  { %v705_v39 = vld [vmem:[%s5712_s1 + $0x580] sm:$0xff] }
 0x12f   :  { %v2213_v60 = vadd.f32 %v2212_v55, %v1702_v49  ;;  %v1205_v49 = vsub.f32 %v181_v42, %v693_v43  ;;  %v1716_v55 = vmul.f32 %v1204_v44, %v1204_v44  ;;  %v194_v43 = vld [vmem:[%s5711_s0 + $0x588] sm:$0xff] }
 0x130   :  { %v706_v44 = vld [vmem:[%s5712_s1 + $0x588] sm:$0xff] }
 0x131   :  { %v2214_v1 = vadd.f32 %v2213_v60, %v1703_v54  ;;  %v1206_v54 = vsub.f32 %v182_v47, %v694_v48  ;;  %v1717_v60 = vmul.f32 %v1205_v49, %v1205_v49  ;;  %v195_v48 = vld [vmem:[%s5711_s0 + $0x590] sm:$0xff] }
 0x132   :  { %v707_v49 = vld [vmem:[%s5712_s1 + $0x590] sm:$0xff] }
 0x133   :  { %v2215_v6 = vadd.f32 %v2214_v1, %v1704_v59  ;;  %v1207_v59 = vsub.f32 %v183_v52, %v695_v53  ;;  %v1718_v1 = vmul.f32 %v1206_v54, %v1206_v54  ;;  %v196_v53 = vld [vmem:[%s5711_s0 + $0x598] sm:$0xff] }
 0x134   :  { %v708_v54 = vld [vmem:[%s5712_s1 + $0x598] sm:$0xff] }
 0x135   :  { %v2216_v11 = vadd.f32 %v2215_v6, %v1705_v0  ;;  %v1208_v0 = vsub.f32 %v184_v57, %v696_v58  ;;  %v1719_v6 = vmul.f32 %v1207_v59, %v1207_v59  ;;  %v197_v58 = vld [vmem:[%s5711_s0 + $0x5a0] sm:$0xff] }
 0x136   :  { %v709_v59 = vld [vmem:[%s5712_s1 + $0x5a0] sm:$0xff] }
 0x137   :  { %v2217_v16 = vadd.f32 %v2216_v11, %v1706_v5  ;;  %v1209_v5 = vsub.f32 %v185_v62, %v697_v63  ;;  %v1720_v11 = vmul.f32 %v1208_v0, %v1208_v0  ;;  %v198_v63 = vld [vmem:[%s5711_s0 + $0x5a8] sm:$0xff] }
 0x138   :  { %v710_v0 = vld [vmem:[%s5712_s1 + $0x5a8] sm:$0xff] }
 0x139   :  { %v2218_v21 = vadd.f32 %v2217_v16, %v1707_v10  ;;  %v1210_v10 = vsub.f32 %v186_v3, %v698_v4  ;;  %v1721_v16 = vmul.f32 %v1209_v5, %v1209_v5  ;;  %v199_v4 = vld [vmem:[%s5711_s0 + $0x5b0] sm:$0xff] }
 0x13a   :  { %v711_v5 = vld [vmem:[%s5712_s1 + $0x5b0] sm:$0xff] }
 0x13b   :  { %v2219_v26 = vadd.f32 %v2218_v21, %v1708_v15  ;;  %v1211_v15 = vsub.f32 %v187_v8, %v699_v9  ;;  %v1722_v21 = vmul.f32 %v1210_v10, %v1210_v10  ;;  %v200_v9 = vld [vmem:[%s5711_s0 + $0x5b8] sm:$0xff] }
 0x13c   :  { %v712_v10 = vld [vmem:[%s5712_s1 + $0x5b8] sm:$0xff] }
 0x13d   :  { %v2220_v31 = vadd.f32 %v2219_v26, %v1709_v20  ;;  %v1212_v20 = vsub.f32 %v188_v13, %v700_v14  ;;  %v1723_v26 = vmul.f32 %v1211_v15, %v1211_v15  ;;  %v201_v14 = vld [vmem:[%s5711_s0 + $0x5c0] sm:$0xff] }
 0x13e   :  { %v713_v15 = vld [vmem:[%s5712_s1 + $0x5c0] sm:$0xff] }
 0x13f   :  { %v2221_v36 = vadd.f32 %v2220_v31, %v1710_v25  ;;  %v1213_v25 = vsub.f32 %v189_v18, %v701_v19  ;;  %v1724_v31 = vmul.f32 %v1212_v20, %v1212_v20  ;;  %v202_v19 = vld [vmem:[%s5711_s0 + $0x5c8] sm:$0xff] }
 0x140   :  { %v714_v20 = vld [vmem:[%s5712_s1 + $0x5c8] sm:$0xff] }
 0x141   :  { %v2222_v41 = vadd.f32 %v2221_v36, %v1711_v30  ;;  %v1214_v30 = vsub.f32 %v190_v23, %v702_v24  ;;  %v1725_v36 = vmul.f32 %v1213_v25, %v1213_v25  ;;  %v203_v24 = vld [vmem:[%s5711_s0 + $0x5d0] sm:$0xff] }
 0x142   :  { %v715_v25 = vld [vmem:[%s5712_s1 + $0x5d0] sm:$0xff] }
 0x143   :  { %v2223_v46 = vadd.f32 %v2222_v41, %v1712_v35  ;;  %v1215_v35 = vsub.f32 %v191_v28, %v703_v29  ;;  %v1726_v41 = vmul.f32 %v1214_v30, %v1214_v30  ;;  %v204_v29 = vld [vmem:[%s5711_s0 + $0x5d8] sm:$0xff] }
 0x144   :  { %v716_v30 = vld [vmem:[%s5712_s1 + $0x5d8] sm:$0xff] }
 0x145   :  { %v2224_v51 = vadd.f32 %v2223_v46, %v1713_v40  ;;  %v1216_v40 = vsub.f32 %v192_v33, %v704_v34  ;;  %v1727_v46 = vmul.f32 %v1215_v35, %v1215_v35  ;;  %v205_v34 = vld [vmem:[%s5711_s0 + $0x5e0] sm:$0xff] }
 0x146   :  { %v717_v35 = vld [vmem:[%s5712_s1 + $0x5e0] sm:$0xff] }
 0x147   :  { %v2225_v56 = vadd.f32 %v2224_v51, %v1714_v45  ;;  %v1217_v45 = vsub.f32 %v193_v38, %v705_v39  ;;  %v1728_v51 = vmul.f32 %v1216_v40, %v1216_v40  ;;  %v206_v39 = vld [vmem:[%s5711_s0 + $0x5e8] sm:$0xff] }
 0x148   :  { %v718_v40 = vld [vmem:[%s5712_s1 + $0x5e8] sm:$0xff] }
 0x149   :  { %v2226_v61 = vadd.f32 %v2225_v56, %v1715_v50  ;;  %v1218_v50 = vsub.f32 %v194_v43, %v706_v44  ;;  %v1729_v56 = vmul.f32 %v1217_v45, %v1217_v45  ;;  %v207_v44 = vld [vmem:[%s5711_s0 + $0x5f0] sm:$0xff] }
 0x14a   :  { %v719_v45 = vld [vmem:[%s5712_s1 + $0x5f0] sm:$0xff] }
 0x14b   :  { %v2227_v2 = vadd.f32 %v2226_v61, %v1716_v55  ;;  %v1219_v55 = vsub.f32 %v195_v48, %v707_v49  ;;  %v1730_v61 = vmul.f32 %v1218_v50, %v1218_v50  ;;  %v208_v49 = vld [vmem:[%s5711_s0 + $0x5f8] sm:$0xff] }
 0x14c   :  { %v720_v50 = vld [vmem:[%s5712_s1 + $0x5f8] sm:$0xff] }
 0x14d   :  { %v2228_v7 = vadd.f32 %v2227_v2, %v1717_v60  ;;  %v1220_v60 = vsub.f32 %v196_v53, %v708_v54  ;;  %v1731_v2 = vmul.f32 %v1219_v55, %v1219_v55  ;;  %v209_v54 = vld [vmem:[%s5711_s0 + $0x600] sm:$0xff] }
 0x14e   :  { %v721_v55 = vld [vmem:[%s5712_s1 + $0x600] sm:$0xff] }
 0x14f   :  { %v2229_v12 = vadd.f32 %v2228_v7, %v1718_v1  ;;  %v1221_v1 = vsub.f32 %v197_v58, %v709_v59  ;;  %v1732_v7 = vmul.f32 %v1220_v60, %v1220_v60  ;;  %v210_v59 = vld [vmem:[%s5711_s0 + $0x608] sm:$0xff] }
 0x150   :  { %v722_v60 = vld [vmem:[%s5712_s1 + $0x608] sm:$0xff] }
 0x151   :  { %v2230_v17 = vadd.f32 %v2229_v12, %v1719_v6  ;;  %v1222_v6 = vsub.f32 %v198_v63, %v710_v0  ;;  %v1733_v12 = vmul.f32 %v1221_v1, %v1221_v1  ;;  %v211_v0 = vld [vmem:[%s5711_s0 + $0x610] sm:$0xff] }
 0x152   :  { %v723_v1 = vld [vmem:[%s5712_s1 + $0x610] sm:$0xff] }
 0x153   :  { %v2231_v22 = vadd.f32 %v2230_v17, %v1720_v11  ;;  %v1223_v11 = vsub.f32 %v199_v4, %v711_v5  ;;  %v1734_v17 = vmul.f32 %v1222_v6, %v1222_v6  ;;  %v212_v5 = vld [vmem:[%s5711_s0 + $0x618] sm:$0xff] }
 0x154   :  { %v724_v6 = vld [vmem:[%s5712_s1 + $0x618] sm:$0xff] }
 0x155   :  { %v2232_v27 = vadd.f32 %v2231_v22, %v1721_v16  ;;  %v1224_v16 = vsub.f32 %v200_v9, %v712_v10  ;;  %v1735_v22 = vmul.f32 %v1223_v11, %v1223_v11  ;;  %v213_v10 = vld [vmem:[%s5711_s0 + $0x620] sm:$0xff] }
 0x156   :  { %v725_v11 = vld [vmem:[%s5712_s1 + $0x620] sm:$0xff] }
 0x157   :  { %v2233_v32 = vadd.f32 %v2232_v27, %v1722_v21  ;;  %v1225_v21 = vsub.f32 %v201_v14, %v713_v15  ;;  %v1736_v27 = vmul.f32 %v1224_v16, %v1224_v16  ;;  %v214_v15 = vld [vmem:[%s5711_s0 + $0x628] sm:$0xff] }
 0x158   :  { %v726_v16 = vld [vmem:[%s5712_s1 + $0x628] sm:$0xff] }
 0x159   :  { %v2234_v37 = vadd.f32 %v2233_v32, %v1723_v26  ;;  %v1226_v26 = vsub.f32 %v202_v19, %v714_v20  ;;  %v1737_v32 = vmul.f32 %v1225_v21, %v1225_v21  ;;  %v215_v20 = vld [vmem:[%s5711_s0 + $0x630] sm:$0xff] }
 0x15a   :  { %v727_v21 = vld [vmem:[%s5712_s1 + $0x630] sm:$0xff] }
 0x15b   :  { %v2235_v42 = vadd.f32 %v2234_v37, %v1724_v31  ;;  %v1227_v31 = vsub.f32 %v203_v24, %v715_v25  ;;  %v1738_v37 = vmul.f32 %v1226_v26, %v1226_v26  ;;  %v216_v25 = vld [vmem:[%s5711_s0 + $0x638] sm:$0xff] }
 0x15c   :  { %v728_v26 = vld [vmem:[%s5712_s1 + $0x638] sm:$0xff] }
 0x15d   :  { %v2236_v47 = vadd.f32 %v2235_v42, %v1725_v36  ;;  %v1228_v36 = vsub.f32 %v204_v29, %v716_v30  ;;  %v1739_v42 = vmul.f32 %v1227_v31, %v1227_v31  ;;  %v217_v30 = vld [vmem:[%s5711_s0 + $0x640] sm:$0xff] }
 0x15e   :  { %v729_v31 = vld [vmem:[%s5712_s1 + $0x640] sm:$0xff] }
 0x15f   :  { %v2237_v52 = vadd.f32 %v2236_v47, %v1726_v41  ;;  %v1229_v41 = vsub.f32 %v205_v34, %v717_v35  ;;  %v1740_v47 = vmul.f32 %v1228_v36, %v1228_v36  ;;  %v218_v35 = vld [vmem:[%s5711_s0 + $0x648] sm:$0xff] }
 0x160   :  { %v730_v36 = vld [vmem:[%s5712_s1 + $0x648] sm:$0xff] }
 0x161   :  { %v2238_v57 = vadd.f32 %v2237_v52, %v1727_v46  ;;  %v1230_v46 = vsub.f32 %v206_v39, %v718_v40  ;;  %v1741_v52 = vmul.f32 %v1229_v41, %v1229_v41  ;;  %v219_v40 = vld [vmem:[%s5711_s0 + $0x650] sm:$0xff] }
 0x162   :  { %v731_v41 = vld [vmem:[%s5712_s1 + $0x650] sm:$0xff] }
 0x163   :  { %v2239_v62 = vadd.f32 %v2238_v57, %v1728_v51  ;;  %v1231_v51 = vsub.f32 %v207_v44, %v719_v45  ;;  %v1742_v57 = vmul.f32 %v1230_v46, %v1230_v46  ;;  %v220_v45 = vld [vmem:[%s5711_s0 + $0x658] sm:$0xff] }
 0x164   :  { %v732_v46 = vld [vmem:[%s5712_s1 + $0x658] sm:$0xff] }
 0x165   :  { %v2240_v3 = vadd.f32 %v2239_v62, %v1729_v56  ;;  %v1232_v56 = vsub.f32 %v208_v49, %v720_v50  ;;  %v1743_v62 = vmul.f32 %v1231_v51, %v1231_v51  ;;  %v221_v50 = vld [vmem:[%s5711_s0 + $0x660] sm:$0xff] }
 0x166   :  { %v733_v51 = vld [vmem:[%s5712_s1 + $0x660] sm:$0xff] }
 0x167   :  { %v2241_v8 = vadd.f32 %v2240_v3, %v1730_v61  ;;  %v1233_v61 = vsub.f32 %v209_v54, %v721_v55  ;;  %v1744_v3 = vmul.f32 %v1232_v56, %v1232_v56  ;;  %v222_v55 = vld [vmem:[%s5711_s0 + $0x668] sm:$0xff] }
 0x168   :  { %v734_v56 = vld [vmem:[%s5712_s1 + $0x668] sm:$0xff] }
 0x169   :  { %v2242_v13 = vadd.f32 %v2241_v8, %v1731_v2  ;;  %v1234_v2 = vsub.f32 %v210_v59, %v722_v60  ;;  %v1745_v8 = vmul.f32 %v1233_v61, %v1233_v61  ;;  %v223_v60 = vld [vmem:[%s5711_s0 + $0x670] sm:$0xff] }
 0x16a   :  { %v735_v61 = vld [vmem:[%s5712_s1 + $0x670] sm:$0xff] }
 0x16b   :  { %v2243_v18 = vadd.f32 %v2242_v13, %v1732_v7  ;;  %v1235_v7 = vsub.f32 %v211_v0, %v723_v1  ;;  %v1746_v13 = vmul.f32 %v1234_v2, %v1234_v2  ;;  %v224_v1 = vld [vmem:[%s5711_s0 + $0x678] sm:$0xff] }
 0x16c   :  { %v736_v2 = vld [vmem:[%s5712_s1 + $0x678] sm:$0xff] }
 0x16d   :  { %v2244_v23 = vadd.f32 %v2243_v18, %v1733_v12  ;;  %v1236_v12 = vsub.f32 %v212_v5, %v724_v6  ;;  %v1747_v18 = vmul.f32 %v1235_v7, %v1235_v7  ;;  %v225_v6 = vld [vmem:[%s5711_s0 + $0x680] sm:$0xff] }
 0x16e   :  { %v737_v7 = vld [vmem:[%s5712_s1 + $0x680] sm:$0xff] }
 0x16f   :  { %v2245_v28 = vadd.f32 %v2244_v23, %v1734_v17  ;;  %v1237_v17 = vsub.f32 %v213_v10, %v725_v11  ;;  %v1748_v23 = vmul.f32 %v1236_v12, %v1236_v12  ;;  %v226_v11 = vld [vmem:[%s5711_s0 + $0x688] sm:$0xff] }
 0x170   :  { %v738_v12 = vld [vmem:[%s5712_s1 + $0x688] sm:$0xff] }
 0x171   :  { %v2246_v33 = vadd.f32 %v2245_v28, %v1735_v22  ;;  %v1238_v22 = vsub.f32 %v214_v15, %v726_v16  ;;  %v1749_v28 = vmul.f32 %v1237_v17, %v1237_v17  ;;  %v227_v16 = vld [vmem:[%s5711_s0 + $0x690] sm:$0xff] }
 0x172   :  { %v739_v17 = vld [vmem:[%s5712_s1 + $0x690] sm:$0xff] }
 0x173   :  { %v2247_v38 = vadd.f32 %v2246_v33, %v1736_v27  ;;  %v1239_v27 = vsub.f32 %v215_v20, %v727_v21  ;;  %v1750_v33 = vmul.f32 %v1238_v22, %v1238_v22  ;;  %v228_v21 = vld [vmem:[%s5711_s0 + $0x698] sm:$0xff] }
 0x174   :  { %v740_v22 = vld [vmem:[%s5712_s1 + $0x698] sm:$0xff] }
 0x175   :  { %v2248_v43 = vadd.f32 %v2247_v38, %v1737_v32  ;;  %v1240_v32 = vsub.f32 %v216_v25, %v728_v26  ;;  %v1751_v38 = vmul.f32 %v1239_v27, %v1239_v27  ;;  %v229_v26 = vld [vmem:[%s5711_s0 + $0x6a0] sm:$0xff] }
 0x176   :  { %v741_v27 = vld [vmem:[%s5712_s1 + $0x6a0] sm:$0xff] }
 0x177   :  { %v2249_v48 = vadd.f32 %v2248_v43, %v1738_v37  ;;  %v1241_v37 = vsub.f32 %v217_v30, %v729_v31  ;;  %v1752_v43 = vmul.f32 %v1240_v32, %v1240_v32  ;;  %v230_v31 = vld [vmem:[%s5711_s0 + $0x6a8] sm:$0xff] }
 0x178   :  { %v742_v32 = vld [vmem:[%s5712_s1 + $0x6a8] sm:$0xff] }
 0x179   :  { %v2250_v53 = vadd.f32 %v2249_v48, %v1739_v42  ;;  %v1242_v42 = vsub.f32 %v218_v35, %v730_v36  ;;  %v1753_v48 = vmul.f32 %v1241_v37, %v1241_v37  ;;  %v231_v36 = vld [vmem:[%s5711_s0 + $0x6b0] sm:$0xff] }
 0x17a   :  { %v743_v37 = vld [vmem:[%s5712_s1 + $0x6b0] sm:$0xff] }
 0x17b   :  { %v2251_v58 = vadd.f32 %v2250_v53, %v1740_v47  ;;  %v1243_v47 = vsub.f32 %v219_v40, %v731_v41  ;;  %v1754_v53 = vmul.f32 %v1242_v42, %v1242_v42  ;;  %v232_v41 = vld [vmem:[%s5711_s0 + $0x6b8] sm:$0xff] }
 0x17c   :  { %v744_v42 = vld [vmem:[%s5712_s1 + $0x6b8] sm:$0xff] }
 0x17d   :  { %v2252_v63 = vadd.f32 %v2251_v58, %v1741_v52  ;;  %v1244_v52 = vsub.f32 %v220_v45, %v732_v46  ;;  %v1755_v58 = vmul.f32 %v1243_v47, %v1243_v47  ;;  %v233_v46 = vld [vmem:[%s5711_s0 + $0x6c0] sm:$0xff] }
 0x17e   :  { %v745_v47 = vld [vmem:[%s5712_s1 + $0x6c0] sm:$0xff] }
 0x17f   :  { %v2253_v4 = vadd.f32 %v2252_v63, %v1742_v57  ;;  %v1245_v57 = vsub.f32 %v221_v50, %v733_v51  ;;  %v1756_v63 = vmul.f32 %v1244_v52, %v1244_v52  ;;  %v234_v51 = vld [vmem:[%s5711_s0 + $0x6c8] sm:$0xff] }
 0x180   :  { %v746_v52 = vld [vmem:[%s5712_s1 + $0x6c8] sm:$0xff] }
 0x181   :  { %v2254_v9 = vadd.f32 %v2253_v4, %v1743_v62  ;;  %v1246_v62 = vsub.f32 %v222_v55, %v734_v56  ;;  %v1757_v4 = vmul.f32 %v1245_v57, %v1245_v57  ;;  %v235_v56 = vld [vmem:[%s5711_s0 + $0x6d0] sm:$0xff] }
 0x182   :  { %v747_v57 = vld [vmem:[%s5712_s1 + $0x6d0] sm:$0xff] }
 0x183   :  { %v2255_v14 = vadd.f32 %v2254_v9, %v1744_v3  ;;  %v1247_v3 = vsub.f32 %v223_v60, %v735_v61  ;;  %v1758_v9 = vmul.f32 %v1246_v62, %v1246_v62  ;;  %v236_v61 = vld [vmem:[%s5711_s0 + $0x6d8] sm:$0xff] }
 0x184   :  { %v748_v62 = vld [vmem:[%s5712_s1 + $0x6d8] sm:$0xff] }
 0x185   :  { %v2256_v19 = vadd.f32 %v2255_v14, %v1745_v8  ;;  %v1248_v8 = vsub.f32 %v224_v1, %v736_v2  ;;  %v1759_v14 = vmul.f32 %v1247_v3, %v1247_v3  ;;  %v237_v2 = vld [vmem:[%s5711_s0 + $0x6e0] sm:$0xff] }
 0x186   :  { %v749_v3 = vld [vmem:[%s5712_s1 + $0x6e0] sm:$0xff] }
 0x187   :  { %v2257_v24 = vadd.f32 %v2256_v19, %v1746_v13  ;;  %v1249_v13 = vsub.f32 %v225_v6, %v737_v7  ;;  %v1760_v19 = vmul.f32 %v1248_v8, %v1248_v8  ;;  %v238_v7 = vld [vmem:[%s5711_s0 + $0x6e8] sm:$0xff] }
 0x188   :  { %v750_v8 = vld [vmem:[%s5712_s1 + $0x6e8] sm:$0xff] }
 0x189   :  { %v2258_v29 = vadd.f32 %v2257_v24, %v1747_v18  ;;  %v1250_v18 = vsub.f32 %v226_v11, %v738_v12  ;;  %v1761_v24 = vmul.f32 %v1249_v13, %v1249_v13  ;;  %v239_v12 = vld [vmem:[%s5711_s0 + $0x6f0] sm:$0xff] }
 0x18a   :  { %v751_v13 = vld [vmem:[%s5712_s1 + $0x6f0] sm:$0xff] }
 0x18b   :  { %v2259_v34 = vadd.f32 %v2258_v29, %v1748_v23  ;;  %v1251_v23 = vsub.f32 %v227_v16, %v739_v17  ;;  %v1762_v29 = vmul.f32 %v1250_v18, %v1250_v18  ;;  %v240_v17 = vld [vmem:[%s5711_s0 + $0x6f8] sm:$0xff] }
 0x18c   :  { %v752_v18 = vld [vmem:[%s5712_s1 + $0x6f8] sm:$0xff] }
 0x18d   :  { %v2260_v39 = vadd.f32 %v2259_v34, %v1749_v28  ;;  %v1252_v28 = vsub.f32 %v228_v21, %v740_v22  ;;  %v1763_v34 = vmul.f32 %v1251_v23, %v1251_v23  ;;  %v241_v22 = vld [vmem:[%s5711_s0 + $0x700] sm:$0xff] }
 0x18e   :  { %v753_v23 = vld [vmem:[%s5712_s1 + $0x700] sm:$0xff] }
 0x18f   :  { %v2261_v44 = vadd.f32 %v2260_v39, %v1750_v33  ;;  %v1253_v33 = vsub.f32 %v229_v26, %v741_v27  ;;  %v1764_v39 = vmul.f32 %v1252_v28, %v1252_v28  ;;  %v242_v27 = vld [vmem:[%s5711_s0 + $0x708] sm:$0xff] }
 0x190   :  { %v754_v28 = vld [vmem:[%s5712_s1 + $0x708] sm:$0xff] }
 0x191   :  { %v2262_v49 = vadd.f32 %v2261_v44, %v1751_v38  ;;  %v1254_v38 = vsub.f32 %v230_v31, %v742_v32  ;;  %v1765_v44 = vmul.f32 %v1253_v33, %v1253_v33  ;;  %v243_v32 = vld [vmem:[%s5711_s0 + $0x710] sm:$0xff] }
 0x192   :  { %v755_v33 = vld [vmem:[%s5712_s1 + $0x710] sm:$0xff] }
 0x193   :  { %v2263_v54 = vadd.f32 %v2262_v49, %v1752_v43  ;;  %v1255_v43 = vsub.f32 %v231_v36, %v743_v37  ;;  %v1766_v49 = vmul.f32 %v1254_v38, %v1254_v38  ;;  %v244_v37 = vld [vmem:[%s5711_s0 + $0x718] sm:$0xff] }
 0x194   :  { %v756_v38 = vld [vmem:[%s5712_s1 + $0x718] sm:$0xff] }
 0x195   :  { %v2264_v59 = vadd.f32 %v2263_v54, %v1753_v48  ;;  %v1256_v48 = vsub.f32 %v232_v41, %v744_v42  ;;  %v1767_v54 = vmul.f32 %v1255_v43, %v1255_v43  ;;  %v245_v42 = vld [vmem:[%s5711_s0 + $0x720] sm:$0xff] }
 0x196   :  { %v757_v43 = vld [vmem:[%s5712_s1 + $0x720] sm:$0xff] }
 0x197   :  { %v2265_v0 = vadd.f32 %v2264_v59, %v1754_v53  ;;  %v1257_v53 = vsub.f32 %v233_v46, %v745_v47  ;;  %v1768_v59 = vmul.f32 %v1256_v48, %v1256_v48  ;;  %v246_v47 = vld [vmem:[%s5711_s0 + $0x728] sm:$0xff] }
 0x198   :  { %v758_v48 = vld [vmem:[%s5712_s1 + $0x728] sm:$0xff] }
 0x199   :  { %v2266_v5 = vadd.f32 %v2265_v0, %v1755_v58  ;;  %v1258_v58 = vsub.f32 %v234_v51, %v746_v52  ;;  %v1769_v0 = vmul.f32 %v1257_v53, %v1257_v53  ;;  %v247_v52 = vld [vmem:[%s5711_s0 + $0x730] sm:$0xff] }
 0x19a   :  { %v759_v53 = vld [vmem:[%s5712_s1 + $0x730] sm:$0xff] }
 0x19b   :  { %v2267_v10 = vadd.f32 %v2266_v5, %v1756_v63  ;;  %v1259_v63 = vsub.f32 %v235_v56, %v747_v57  ;;  %v1770_v5 = vmul.f32 %v1258_v58, %v1258_v58  ;;  %v248_v57 = vld [vmem:[%s5711_s0 + $0x738] sm:$0xff] }
 0x19c   :  { %v760_v58 = vld [vmem:[%s5712_s1 + $0x738] sm:$0xff] }
 0x19d   :  { %v2268_v15 = vadd.f32 %v2267_v10, %v1757_v4  ;;  %v1260_v4 = vsub.f32 %v236_v61, %v748_v62  ;;  %v1771_v10 = vmul.f32 %v1259_v63, %v1259_v63  ;;  %v249_v62 = vld [vmem:[%s5711_s0 + $0x740] sm:$0xff] }
 0x19e   :  { %v761_v63 = vld [vmem:[%s5712_s1 + $0x740] sm:$0xff] }
 0x19f   :  { %v2269_v20 = vadd.f32 %v2268_v15, %v1758_v9  ;;  %v1261_v9 = vsub.f32 %v237_v2, %v749_v3  ;;  %v1772_v15 = vmul.f32 %v1260_v4, %v1260_v4  ;;  %v250_v3 = vld [vmem:[%s5711_s0 + $0x748] sm:$0xff] }
 0x1a0   :  { %v762_v4 = vld [vmem:[%s5712_s1 + $0x748] sm:$0xff] }
 0x1a1   :  { %v2270_v25 = vadd.f32 %v2269_v20, %v1759_v14  ;;  %v1262_v14 = vsub.f32 %v238_v7, %v750_v8  ;;  %v1773_v20 = vmul.f32 %v1261_v9, %v1261_v9  ;;  %v251_v8 = vld [vmem:[%s5711_s0 + $0x750] sm:$0xff] }
 0x1a2   :  { %v763_v9 = vld [vmem:[%s5712_s1 + $0x750] sm:$0xff] }
 0x1a3   :  { %v2271_v30 = vadd.f32 %v2270_v25, %v1760_v19  ;;  %v1263_v19 = vsub.f32 %v239_v12, %v751_v13  ;;  %v1774_v25 = vmul.f32 %v1262_v14, %v1262_v14  ;;  %v252_v13 = vld [vmem:[%s5711_s0 + $0x758] sm:$0xff] }
 0x1a4   :  { %v764_v14 = vld [vmem:[%s5712_s1 + $0x758] sm:$0xff] }
 0x1a5   :  { %v2272_v35 = vadd.f32 %v2271_v30, %v1761_v24  ;;  %v1264_v24 = vsub.f32 %v240_v17, %v752_v18  ;;  %v1775_v30 = vmul.f32 %v1263_v19, %v1263_v19  ;;  %v253_v18 = vld [vmem:[%s5711_s0 + $0x760] sm:$0xff] }
 0x1a6   :  { %v765_v19 = vld [vmem:[%s5712_s1 + $0x760] sm:$0xff] }
 0x1a7   :  { %v2273_v40 = vadd.f32 %v2272_v35, %v1762_v29  ;;  %v1265_v29 = vsub.f32 %v241_v22, %v753_v23  ;;  %v1776_v35 = vmul.f32 %v1264_v24, %v1264_v24  ;;  %v254_v23 = vld [vmem:[%s5711_s0 + $0x768] sm:$0xff] }
 0x1a8   :  { %v766_v24 = vld [vmem:[%s5712_s1 + $0x768] sm:$0xff] }
 0x1a9   :  { %v2274_v45 = vadd.f32 %v2273_v40, %v1763_v34  ;;  %v1266_v34 = vsub.f32 %v242_v27, %v754_v28  ;;  %v1777_v40 = vmul.f32 %v1265_v29, %v1265_v29  ;;  %v255_v28 = vld [vmem:[%s5711_s0 + $0x770] sm:$0xff] }
 0x1aa   :  { %v767_v29 = vld [vmem:[%s5712_s1 + $0x770] sm:$0xff] }
 0x1ab   :  { %v2275_v50 = vadd.f32 %v2274_v45, %v1764_v39  ;;  %v1267_v39 = vsub.f32 %v243_v32, %v755_v33  ;;  %v1778_v45 = vmul.f32 %v1266_v34, %v1266_v34  ;;  %v256_v33 = vld [vmem:[%s5711_s0 + $0x778] sm:$0xff] }
 0x1ac   :  { %v768_v34 = vld [vmem:[%s5712_s1 + $0x778] sm:$0xff] }
 0x1ad   :  { %v2276_v55 = vadd.f32 %v2275_v50, %v1765_v44  ;;  %v1268_v44 = vsub.f32 %v244_v37, %v756_v38  ;;  %v1779_v50 = vmul.f32 %v1267_v39, %v1267_v39  ;;  %v257_v38 = vld [vmem:[%s5711_s0 + $0x780] sm:$0xff] }
 0x1ae   :  { %v769_v39 = vld [vmem:[%s5712_s1 + $0x780] sm:$0xff] }
 0x1af   :  { %v2277_v60 = vadd.f32 %v2276_v55, %v1766_v49  ;;  %v1269_v49 = vsub.f32 %v245_v42, %v757_v43  ;;  %v1780_v55 = vmul.f32 %v1268_v44, %v1268_v44  ;;  %v258_v43 = vld [vmem:[%s5711_s0 + $0x788] sm:$0xff] }
 0x1b0   :  { %v770_v44 = vld [vmem:[%s5712_s1 + $0x788] sm:$0xff] }
 0x1b1   :  { %v2278_v1 = vadd.f32 %v2277_v60, %v1767_v54  ;;  %v1270_v54 = vsub.f32 %v246_v47, %v758_v48  ;;  %v1781_v60 = vmul.f32 %v1269_v49, %v1269_v49  ;;  %v259_v48 = vld [vmem:[%s5711_s0 + $0x790] sm:$0xff] }
 0x1b2   :  { %v771_v49 = vld [vmem:[%s5712_s1 + $0x790] sm:$0xff] }
 0x1b3   :  { %v2279_v6 = vadd.f32 %v2278_v1, %v1768_v59  ;;  %v1271_v59 = vsub.f32 %v247_v52, %v759_v53  ;;  %v1782_v1 = vmul.f32 %v1270_v54, %v1270_v54  ;;  %v260_v53 = vld [vmem:[%s5711_s0 + $0x798] sm:$0xff] }
 0x1b4   :  { %v772_v54 = vld [vmem:[%s5712_s1 + $0x798] sm:$0xff] }
 0x1b5   :  { %v2280_v11 = vadd.f32 %v2279_v6, %v1769_v0  ;;  %v1272_v0 = vsub.f32 %v248_v57, %v760_v58  ;;  %v1783_v6 = vmul.f32 %v1271_v59, %v1271_v59  ;;  %v261_v58 = vld [vmem:[%s5711_s0 + $0x7a0] sm:$0xff] }
 0x1b6   :  { %v773_v59 = vld [vmem:[%s5712_s1 + $0x7a0] sm:$0xff] }
 0x1b7   :  { %v2281_v16 = vadd.f32 %v2280_v11, %v1770_v5  ;;  %v1273_v5 = vsub.f32 %v249_v62, %v761_v63  ;;  %v1784_v11 = vmul.f32 %v1272_v0, %v1272_v0  ;;  %v262_v63 = vld [vmem:[%s5711_s0 + $0x7a8] sm:$0xff] }
 0x1b8   :  { %v774_v0 = vld [vmem:[%s5712_s1 + $0x7a8] sm:$0xff] }
 0x1b9   :  { %v2282_v21 = vadd.f32 %v2281_v16, %v1771_v10  ;;  %v1274_v10 = vsub.f32 %v250_v3, %v762_v4  ;;  %v1785_v16 = vmul.f32 %v1273_v5, %v1273_v5  ;;  %v263_v4 = vld [vmem:[%s5711_s0 + $0x7b0] sm:$0xff] }
 0x1ba   :  { %v775_v5 = vld [vmem:[%s5712_s1 + $0x7b0] sm:$0xff] }
 0x1bb   :  { %v2283_v26 = vadd.f32 %v2282_v21, %v1772_v15  ;;  %v1275_v15 = vsub.f32 %v251_v8, %v763_v9  ;;  %v1786_v21 = vmul.f32 %v1274_v10, %v1274_v10  ;;  %v264_v9 = vld [vmem:[%s5711_s0 + $0x7b8] sm:$0xff] }
 0x1bc   :  { %v776_v10 = vld [vmem:[%s5712_s1 + $0x7b8] sm:$0xff] }
 0x1bd   :  { %v2284_v31 = vadd.f32 %v2283_v26, %v1773_v20  ;;  %v1276_v20 = vsub.f32 %v252_v13, %v764_v14  ;;  %v1787_v26 = vmul.f32 %v1275_v15, %v1275_v15  ;;  %v265_v14 = vld [vmem:[%s5711_s0 + $0x7c0] sm:$0xff] }
 0x1be   :  { %v777_v15 = vld [vmem:[%s5712_s1 + $0x7c0] sm:$0xff] }
 0x1bf   :  { %v2285_v36 = vadd.f32 %v2284_v31, %v1774_v25  ;;  %v1277_v25 = vsub.f32 %v253_v18, %v765_v19  ;;  %v1788_v31 = vmul.f32 %v1276_v20, %v1276_v20  ;;  %v266_v19 = vld [vmem:[%s5711_s0 + $0x7c8] sm:$0xff] }
 0x1c0   :  { %v778_v20 = vld [vmem:[%s5712_s1 + $0x7c8] sm:$0xff] }
 0x1c1   :  { %v2286_v41 = vadd.f32 %v2285_v36, %v1775_v30  ;;  %v1278_v30 = vsub.f32 %v254_v23, %v766_v24  ;;  %v1789_v36 = vmul.f32 %v1277_v25, %v1277_v25  ;;  %v267_v24 = vld [vmem:[%s5711_s0 + $0x7d0] sm:$0xff] }
 0x1c2   :  { %v779_v25 = vld [vmem:[%s5712_s1 + $0x7d0] sm:$0xff] }
 0x1c3   :  { %v2287_v46 = vadd.f32 %v2286_v41, %v1776_v35  ;;  %v1279_v35 = vsub.f32 %v255_v28, %v767_v29  ;;  %v1790_v41 = vmul.f32 %v1278_v30, %v1278_v30  ;;  %v268_v29 = vld [vmem:[%s5711_s0 + $0x7d8] sm:$0xff] }
 0x1c4   :  { %v780_v30 = vld [vmem:[%s5712_s1 + $0x7d8] sm:$0xff] }
 0x1c5   :  { %v2288_v51 = vadd.f32 %v2287_v46, %v1777_v40  ;;  %v1280_v40 = vsub.f32 %v256_v33, %v768_v34  ;;  %v1791_v46 = vmul.f32 %v1279_v35, %v1279_v35  ;;  %v269_v34 = vld [vmem:[%s5711_s0 + $0x7e0] sm:$0xff] }
 0x1c6   :  { %v781_v35 = vld [vmem:[%s5712_s1 + $0x7e0] sm:$0xff] }
 0x1c7   :  { %v2289_v56 = vadd.f32 %v2288_v51, %v1778_v45  ;;  %v1281_v45 = vsub.f32 %v257_v38, %v769_v39  ;;  %v1792_v51 = vmul.f32 %v1280_v40, %v1280_v40  ;;  %v270_v39 = vld [vmem:[%s5711_s0 + $0x7e8] sm:$0xff] }
 0x1c8   :  { %v782_v40 = vld [vmem:[%s5712_s1 + $0x7e8] sm:$0xff] }
 0x1c9   :  { %v2290_v61 = vadd.f32 %v2289_v56, %v1779_v50  ;;  %v1282_v50 = vsub.f32 %v258_v43, %v770_v44  ;;  %v1793_v56 = vmul.f32 %v1281_v45, %v1281_v45  ;;  %v271_v44 = vld [vmem:[%s5711_s0 + $0x7f0] sm:$0xff] }
 0x1ca   :  { %v783_v45 = vld [vmem:[%s5712_s1 + $0x7f0] sm:$0xff] }
 0x1cb   :  { %v2291_v2 = vadd.f32 %v2290_v61, %v1780_v55  ;;  %v1283_v55 = vsub.f32 %v259_v48, %v771_v49  ;;  %v1794_v61 = vmul.f32 %v1282_v50, %v1282_v50  ;;  %v272_v49 = vld [vmem:[%s5711_s0 + $0x7f8] sm:$0xff] }
 0x1cc   :  { %v784_v50 = vld [vmem:[%s5712_s1 + $0x7f8] sm:$0xff] }
 0x1cd   :  { %v2292_v7 = vadd.f32 %v2291_v2, %v1781_v60  ;;  %v1284_v60 = vsub.f32 %v260_v53, %v772_v54  ;;  %v1795_v2 = vmul.f32 %v1283_v55, %v1283_v55  ;;  %v273_v54 = vld [vmem:[%s5711_s0 + $0x800] sm:$0xff] }
 0x1ce   :  { %v785_v55 = vld [vmem:[%s5712_s1 + $0x800] sm:$0xff] }
 0x1cf   :  { %v2293_v12 = vadd.f32 %v2292_v7, %v1782_v1  ;;  %v1285_v1 = vsub.f32 %v261_v58, %v773_v59  ;;  %v1796_v7 = vmul.f32 %v1284_v60, %v1284_v60  ;;  %v274_v59 = vld [vmem:[%s5711_s0 + $0x808] sm:$0xff] }
 0x1d0   :  { %v786_v60 = vld [vmem:[%s5712_s1 + $0x808] sm:$0xff] }
 0x1d1   :  { %v2294_v17 = vadd.f32 %v2293_v12, %v1783_v6  ;;  %v1286_v6 = vsub.f32 %v262_v63, %v774_v0  ;;  %v1797_v12 = vmul.f32 %v1285_v1, %v1285_v1  ;;  %v275_v0 = vld [vmem:[%s5711_s0 + $0x810] sm:$0xff] }
 0x1d2   :  { %v787_v1 = vld [vmem:[%s5712_s1 + $0x810] sm:$0xff] }
 0x1d3   :  { %v2295_v22 = vadd.f32 %v2294_v17, %v1784_v11  ;;  %v1287_v11 = vsub.f32 %v263_v4, %v775_v5  ;;  %v1798_v17 = vmul.f32 %v1286_v6, %v1286_v6  ;;  %v276_v5 = vld [vmem:[%s5711_s0 + $0x818] sm:$0xff] }
 0x1d4   :  { %v788_v6 = vld [vmem:[%s5712_s1 + $0x818] sm:$0xff] }
 0x1d5   :  { %v2296_v27 = vadd.f32 %v2295_v22, %v1785_v16  ;;  %v1288_v16 = vsub.f32 %v264_v9, %v776_v10  ;;  %v1799_v22 = vmul.f32 %v1287_v11, %v1287_v11  ;;  %v277_v10 = vld [vmem:[%s5711_s0 + $0x820] sm:$0xff] }
 0x1d6   :  { %v789_v11 = vld [vmem:[%s5712_s1 + $0x820] sm:$0xff] }
 0x1d7   :  { %v2297_v32 = vadd.f32 %v2296_v27, %v1786_v21  ;;  %v1289_v21 = vsub.f32 %v265_v14, %v777_v15  ;;  %v1800_v27 = vmul.f32 %v1288_v16, %v1288_v16  ;;  %v278_v15 = vld [vmem:[%s5711_s0 + $0x828] sm:$0xff] }
 0x1d8   :  { %v790_v16 = vld [vmem:[%s5712_s1 + $0x828] sm:$0xff] }
 0x1d9   :  { %v2298_v37 = vadd.f32 %v2297_v32, %v1787_v26  ;;  %v1290_v26 = vsub.f32 %v266_v19, %v778_v20  ;;  %v1801_v32 = vmul.f32 %v1289_v21, %v1289_v21  ;;  %v279_v20 = vld [vmem:[%s5711_s0 + $0x830] sm:$0xff] }
 0x1da   :  { %v791_v21 = vld [vmem:[%s5712_s1 + $0x830] sm:$0xff] }
 0x1db   :  { %v2299_v42 = vadd.f32 %v2298_v37, %v1788_v31  ;;  %v1291_v31 = vsub.f32 %v267_v24, %v779_v25  ;;  %v1802_v37 = vmul.f32 %v1290_v26, %v1290_v26  ;;  %v280_v25 = vld [vmem:[%s5711_s0 + $0x838] sm:$0xff] }
 0x1dc   :  { %v792_v26 = vld [vmem:[%s5712_s1 + $0x838] sm:$0xff] }
 0x1dd   :  { %v2300_v47 = vadd.f32 %v2299_v42, %v1789_v36  ;;  %v1292_v36 = vsub.f32 %v268_v29, %v780_v30  ;;  %v1803_v42 = vmul.f32 %v1291_v31, %v1291_v31  ;;  %v281_v30 = vld [vmem:[%s5711_s0 + $0x840] sm:$0xff] }
 0x1de   :  { %v793_v31 = vld [vmem:[%s5712_s1 + $0x840] sm:$0xff] }
 0x1df   :  { %v2301_v52 = vadd.f32 %v2300_v47, %v1790_v41  ;;  %v1293_v41 = vsub.f32 %v269_v34, %v781_v35  ;;  %v1804_v47 = vmul.f32 %v1292_v36, %v1292_v36  ;;  %v282_v35 = vld [vmem:[%s5711_s0 + $0x848] sm:$0xff] }
 0x1e0   :  { %v794_v36 = vld [vmem:[%s5712_s1 + $0x848] sm:$0xff] }
 0x1e1   :  { %v2302_v57 = vadd.f32 %v2301_v52, %v1791_v46  ;;  %v1294_v46 = vsub.f32 %v270_v39, %v782_v40  ;;  %v1805_v52 = vmul.f32 %v1293_v41, %v1293_v41  ;;  %v283_v40 = vld [vmem:[%s5711_s0 + $0x850] sm:$0xff] }
 0x1e2   :  { %v795_v41 = vld [vmem:[%s5712_s1 + $0x850] sm:$0xff] }
 0x1e3   :  { %v2303_v62 = vadd.f32 %v2302_v57, %v1792_v51  ;;  %v1295_v51 = vsub.f32 %v271_v44, %v783_v45  ;;  %v1806_v57 = vmul.f32 %v1294_v46, %v1294_v46  ;;  %v284_v45 = vld [vmem:[%s5711_s0 + $0x858] sm:$0xff] }
 0x1e4   :  { %v796_v46 = vld [vmem:[%s5712_s1 + $0x858] sm:$0xff] }
 0x1e5   :  { %v2304_v3 = vadd.f32 %v2303_v62, %v1793_v56  ;;  %v1296_v56 = vsub.f32 %v272_v49, %v784_v50  ;;  %v1807_v62 = vmul.f32 %v1295_v51, %v1295_v51  ;;  %v285_v50 = vld [vmem:[%s5711_s0 + $0x860] sm:$0xff] }
 0x1e6   :  { %v797_v51 = vld [vmem:[%s5712_s1 + $0x860] sm:$0xff] }
 0x1e7   :  { %v2305_v8 = vadd.f32 %v2304_v3, %v1794_v61  ;;  %v1297_v61 = vsub.f32 %v273_v54, %v785_v55  ;;  %v1808_v3 = vmul.f32 %v1296_v56, %v1296_v56  ;;  %v286_v55 = vld [vmem:[%s5711_s0 + $0x868] sm:$0xff] }
 0x1e8   :  { %v798_v56 = vld [vmem:[%s5712_s1 + $0x868] sm:$0xff] }
 0x1e9   :  { %v2306_v13 = vadd.f32 %v2305_v8, %v1795_v2  ;;  %v1298_v2 = vsub.f32 %v274_v59, %v786_v60  ;;  %v1809_v8 = vmul.f32 %v1297_v61, %v1297_v61  ;;  %v287_v60 = vld [vmem:[%s5711_s0 + $0x870] sm:$0xff] }
 0x1ea   :  { %v799_v61 = vld [vmem:[%s5712_s1 + $0x870] sm:$0xff] }
 0x1eb   :  { %v2307_v18 = vadd.f32 %v2306_v13, %v1796_v7  ;;  %v1299_v7 = vsub.f32 %v275_v0, %v787_v1  ;;  %v1810_v13 = vmul.f32 %v1298_v2, %v1298_v2  ;;  %v288_v1 = vld [vmem:[%s5711_s0 + $0x878] sm:$0xff] }
 0x1ec   :  { %v800_v2 = vld [vmem:[%s5712_s1 + $0x878] sm:$0xff] }
 0x1ed   :  { %v2308_v23 = vadd.f32 %v2307_v18, %v1797_v12  ;;  %v1300_v12 = vsub.f32 %v276_v5, %v788_v6  ;;  %v1811_v18 = vmul.f32 %v1299_v7, %v1299_v7  ;;  %v289_v6 = vld [vmem:[%s5711_s0 + $0x880] sm:$0xff] }
 0x1ee   :  { %v801_v7 = vld [vmem:[%s5712_s1 + $0x880] sm:$0xff] }
 0x1ef   :  { %v2309_v28 = vadd.f32 %v2308_v23, %v1798_v17  ;;  %v1301_v17 = vsub.f32 %v277_v10, %v789_v11  ;;  %v1812_v23 = vmul.f32 %v1300_v12, %v1300_v12  ;;  %v290_v11 = vld [vmem:[%s5711_s0 + $0x888] sm:$0xff] }
 0x1f0   :  { %v802_v12 = vld [vmem:[%s5712_s1 + $0x888] sm:$0xff] }
 0x1f1   :  { %v2310_v33 = vadd.f32 %v2309_v28, %v1799_v22  ;;  %v1302_v22 = vsub.f32 %v278_v15, %v790_v16  ;;  %v1813_v28 = vmul.f32 %v1301_v17, %v1301_v17  ;;  %v291_v16 = vld [vmem:[%s5711_s0 + $0x890] sm:$0xff] }
 0x1f2   :  { %v803_v17 = vld [vmem:[%s5712_s1 + $0x890] sm:$0xff] }
 0x1f3   :  { %v2311_v38 = vadd.f32 %v2310_v33, %v1800_v27  ;;  %v1303_v27 = vsub.f32 %v279_v20, %v791_v21  ;;  %v1814_v33 = vmul.f32 %v1302_v22, %v1302_v22  ;;  %v292_v21 = vld [vmem:[%s5711_s0 + $0x898] sm:$0xff] }
 0x1f4   :  { %v804_v22 = vld [vmem:[%s5712_s1 + $0x898] sm:$0xff] }
 0x1f5   :  { %v2312_v43 = vadd.f32 %v2311_v38, %v1801_v32  ;;  %v1304_v32 = vsub.f32 %v280_v25, %v792_v26  ;;  %v1815_v38 = vmul.f32 %v1303_v27, %v1303_v27  ;;  %v293_v26 = vld [vmem:[%s5711_s0 + $0x8a0] sm:$0xff] }
 0x1f6   :  { %v805_v27 = vld [vmem:[%s5712_s1 + $0x8a0] sm:$0xff] }
 0x1f7   :  { %v2313_v48 = vadd.f32 %v2312_v43, %v1802_v37  ;;  %v1305_v37 = vsub.f32 %v281_v30, %v793_v31  ;;  %v1816_v43 = vmul.f32 %v1304_v32, %v1304_v32  ;;  %v294_v31 = vld [vmem:[%s5711_s0 + $0x8a8] sm:$0xff] }
 0x1f8   :  { %v806_v32 = vld [vmem:[%s5712_s1 + $0x8a8] sm:$0xff] }
 0x1f9   :  { %v2314_v53 = vadd.f32 %v2313_v48, %v1803_v42  ;;  %v1306_v42 = vsub.f32 %v282_v35, %v794_v36  ;;  %v1817_v48 = vmul.f32 %v1305_v37, %v1305_v37  ;;  %v295_v36 = vld [vmem:[%s5711_s0 + $0x8b0] sm:$0xff] }
 0x1fa   :  { %v807_v37 = vld [vmem:[%s5712_s1 + $0x8b0] sm:$0xff] }
 0x1fb   :  { %v2315_v58 = vadd.f32 %v2314_v53, %v1804_v47  ;;  %v1307_v47 = vsub.f32 %v283_v40, %v795_v41  ;;  %v1818_v53 = vmul.f32 %v1306_v42, %v1306_v42  ;;  %v296_v41 = vld [vmem:[%s5711_s0 + $0x8b8] sm:$0xff] }
 0x1fc   :  { %v808_v42 = vld [vmem:[%s5712_s1 + $0x8b8] sm:$0xff] }
 0x1fd   :  { %v2316_v63 = vadd.f32 %v2315_v58, %v1805_v52  ;;  %v1308_v52 = vsub.f32 %v284_v45, %v796_v46  ;;  %v1819_v58 = vmul.f32 %v1307_v47, %v1307_v47  ;;  %v297_v46 = vld [vmem:[%s5711_s0 + $0x8c0] sm:$0xff] }
 0x1fe   :  { %v809_v47 = vld [vmem:[%s5712_s1 + $0x8c0] sm:$0xff] }
 0x1ff   :  { %v2317_v4 = vadd.f32 %v2316_v63, %v1806_v57  ;;  %v1309_v57 = vsub.f32 %v285_v50, %v797_v51  ;;  %v1820_v63 = vmul.f32 %v1308_v52, %v1308_v52  ;;  %v298_v51 = vld [vmem:[%s5711_s0 + $0x8c8] sm:$0xff] }
 0x200   :  { %v810_v52 = vld [vmem:[%s5712_s1 + $0x8c8] sm:$0xff] }
 0x201   :  { %v2318_v9 = vadd.f32 %v2317_v4, %v1807_v62  ;;  %v1310_v62 = vsub.f32 %v286_v55, %v798_v56  ;;  %v1821_v4 = vmul.f32 %v1309_v57, %v1309_v57  ;;  %v299_v56 = vld [vmem:[%s5711_s0 + $0x8d0] sm:$0xff] }
 0x202   :  { %v811_v57 = vld [vmem:[%s5712_s1 + $0x8d0] sm:$0xff] }
 0x203   :  { %v2319_v14 = vadd.f32 %v2318_v9, %v1808_v3  ;;  %v1311_v3 = vsub.f32 %v287_v60, %v799_v61  ;;  %v1822_v9 = vmul.f32 %v1310_v62, %v1310_v62  ;;  %v300_v61 = vld [vmem:[%s5711_s0 + $0x8d8] sm:$0xff] }
 0x204   :  { %v812_v62 = vld [vmem:[%s5712_s1 + $0x8d8] sm:$0xff] }
 0x205   :  { %v2320_v19 = vadd.f32 %v2319_v14, %v1809_v8  ;;  %v1312_v8 = vsub.f32 %v288_v1, %v800_v2  ;;  %v1823_v14 = vmul.f32 %v1311_v3, %v1311_v3  ;;  %v301_v2 = vld [vmem:[%s5711_s0 + $0x8e0] sm:$0xff] }
 0x206   :  { %v813_v3 = vld [vmem:[%s5712_s1 + $0x8e0] sm:$0xff] }
 0x207   :  { %v2321_v24 = vadd.f32 %v2320_v19, %v1810_v13  ;;  %v1313_v13 = vsub.f32 %v289_v6, %v801_v7  ;;  %v1824_v19 = vmul.f32 %v1312_v8, %v1312_v8  ;;  %v302_v7 = vld [vmem:[%s5711_s0 + $0x8e8] sm:$0xff] }
 0x208   :  { %v814_v8 = vld [vmem:[%s5712_s1 + $0x8e8] sm:$0xff] }
 0x209   :  { %v2322_v29 = vadd.f32 %v2321_v24, %v1811_v18  ;;  %v1314_v18 = vsub.f32 %v290_v11, %v802_v12  ;;  %v1825_v24 = vmul.f32 %v1313_v13, %v1313_v13  ;;  %v303_v12 = vld [vmem:[%s5711_s0 + $0x8f0] sm:$0xff] }
 0x20a   :  { %v815_v13 = vld [vmem:[%s5712_s1 + $0x8f0] sm:$0xff] }
 0x20b   :  { %v2323_v34 = vadd.f32 %v2322_v29, %v1812_v23  ;;  %v1315_v23 = vsub.f32 %v291_v16, %v803_v17  ;;  %v1826_v29 = vmul.f32 %v1314_v18, %v1314_v18  ;;  %v304_v17 = vld [vmem:[%s5711_s0 + $0x8f8] sm:$0xff] }
 0x20c   :  { %v816_v18 = vld [vmem:[%s5712_s1 + $0x8f8] sm:$0xff] }
 0x20d   :  { %v2324_v39 = vadd.f32 %v2323_v34, %v1813_v28  ;;  %v1316_v28 = vsub.f32 %v292_v21, %v804_v22  ;;  %v1827_v34 = vmul.f32 %v1315_v23, %v1315_v23  ;;  %v305_v22 = vld [vmem:[%s5711_s0 + $0x900] sm:$0xff] }
 0x20e   :  { %v817_v23 = vld [vmem:[%s5712_s1 + $0x900] sm:$0xff] }
 0x20f   :  { %v2325_v44 = vadd.f32 %v2324_v39, %v1814_v33  ;;  %v1317_v33 = vsub.f32 %v293_v26, %v805_v27  ;;  %v1828_v39 = vmul.f32 %v1316_v28, %v1316_v28  ;;  %v306_v27 = vld [vmem:[%s5711_s0 + $0x908] sm:$0xff] }
 0x210   :  { %v818_v28 = vld [vmem:[%s5712_s1 + $0x908] sm:$0xff] }
 0x211   :  { %v2326_v49 = vadd.f32 %v2325_v44, %v1815_v38  ;;  %v1318_v38 = vsub.f32 %v294_v31, %v806_v32  ;;  %v1829_v44 = vmul.f32 %v1317_v33, %v1317_v33  ;;  %v307_v32 = vld [vmem:[%s5711_s0 + $0x910] sm:$0xff] }
 0x212   :  { %v819_v33 = vld [vmem:[%s5712_s1 + $0x910] sm:$0xff] }
 0x213   :  { %v2327_v54 = vadd.f32 %v2326_v49, %v1816_v43  ;;  %v1319_v43 = vsub.f32 %v295_v36, %v807_v37  ;;  %v1830_v49 = vmul.f32 %v1318_v38, %v1318_v38  ;;  %v308_v37 = vld [vmem:[%s5711_s0 + $0x918] sm:$0xff] }
 0x214   :  { %v820_v38 = vld [vmem:[%s5712_s1 + $0x918] sm:$0xff] }
 0x215   :  { %v2328_v59 = vadd.f32 %v2327_v54, %v1817_v48  ;;  %v1320_v48 = vsub.f32 %v296_v41, %v808_v42  ;;  %v1831_v54 = vmul.f32 %v1319_v43, %v1319_v43  ;;  %v309_v42 = vld [vmem:[%s5711_s0 + $0x920] sm:$0xff] }
 0x216   :  { %v821_v43 = vld [vmem:[%s5712_s1 + $0x920] sm:$0xff] }
 0x217   :  { %v2329_v0 = vadd.f32 %v2328_v59, %v1818_v53  ;;  %v1321_v53 = vsub.f32 %v297_v46, %v809_v47  ;;  %v1832_v59 = vmul.f32 %v1320_v48, %v1320_v48  ;;  %v310_v47 = vld [vmem:[%s5711_s0 + $0x928] sm:$0xff] }
 0x218   :  { %v822_v48 = vld [vmem:[%s5712_s1 + $0x928] sm:$0xff] }
 0x219   :  { %v2330_v5 = vadd.f32 %v2329_v0, %v1819_v58  ;;  %v1322_v58 = vsub.f32 %v298_v51, %v810_v52  ;;  %v1833_v0 = vmul.f32 %v1321_v53, %v1321_v53  ;;  %v311_v52 = vld [vmem:[%s5711_s0 + $0x930] sm:$0xff] }
 0x21a   :  { %v823_v53 = vld [vmem:[%s5712_s1 + $0x930] sm:$0xff] }
 0x21b   :  { %v2331_v10 = vadd.f32 %v2330_v5, %v1820_v63  ;;  %v1323_v63 = vsub.f32 %v299_v56, %v811_v57  ;;  %v1834_v5 = vmul.f32 %v1322_v58, %v1322_v58  ;;  %v312_v57 = vld [vmem:[%s5711_s0 + $0x938] sm:$0xff] }
 0x21c   :  { %v824_v58 = vld [vmem:[%s5712_s1 + $0x938] sm:$0xff] }
 0x21d   :  { %v2332_v15 = vadd.f32 %v2331_v10, %v1821_v4  ;;  %v1324_v4 = vsub.f32 %v300_v61, %v812_v62  ;;  %v1835_v10 = vmul.f32 %v1323_v63, %v1323_v63  ;;  %v313_v62 = vld [vmem:[%s5711_s0 + $0x940] sm:$0xff] }
 0x21e   :  { %v825_v63 = vld [vmem:[%s5712_s1 + $0x940] sm:$0xff] }
 0x21f   :  { %v2333_v20 = vadd.f32 %v2332_v15, %v1822_v9  ;;  %v1325_v9 = vsub.f32 %v301_v2, %v813_v3  ;;  %v1836_v15 = vmul.f32 %v1324_v4, %v1324_v4  ;;  %v314_v3 = vld [vmem:[%s5711_s0 + $0x948] sm:$0xff] }
 0x220   :  { %v826_v4 = vld [vmem:[%s5712_s1 + $0x948] sm:$0xff] }
 0x221   :  { %v2334_v25 = vadd.f32 %v2333_v20, %v1823_v14  ;;  %v1326_v14 = vsub.f32 %v302_v7, %v814_v8  ;;  %v1837_v20 = vmul.f32 %v1325_v9, %v1325_v9  ;;  %v315_v8 = vld [vmem:[%s5711_s0 + $0x950] sm:$0xff] }
 0x222   :  { %v827_v9 = vld [vmem:[%s5712_s1 + $0x950] sm:$0xff] }
 0x223   :  { %v2335_v30 = vadd.f32 %v2334_v25, %v1824_v19  ;;  %v1327_v19 = vsub.f32 %v303_v12, %v815_v13  ;;  %v1838_v25 = vmul.f32 %v1326_v14, %v1326_v14  ;;  %v316_v13 = vld [vmem:[%s5711_s0 + $0x958] sm:$0xff] }
 0x224   :  { %v828_v14 = vld [vmem:[%s5712_s1 + $0x958] sm:$0xff] }
 0x225   :  { %v2336_v35 = vadd.f32 %v2335_v30, %v1825_v24  ;;  %v1328_v24 = vsub.f32 %v304_v17, %v816_v18  ;;  %v1839_v30 = vmul.f32 %v1327_v19, %v1327_v19  ;;  %v317_v18 = vld [vmem:[%s5711_s0 + $0x960] sm:$0xff] }
 0x226   :  { %v829_v19 = vld [vmem:[%s5712_s1 + $0x960] sm:$0xff] }
 0x227   :  { %v2337_v40 = vadd.f32 %v2336_v35, %v1826_v29  ;;  %v1329_v29 = vsub.f32 %v305_v22, %v817_v23  ;;  %v1840_v35 = vmul.f32 %v1328_v24, %v1328_v24  ;;  %v318_v23 = vld [vmem:[%s5711_s0 + $0x968] sm:$0xff] }
 0x228   :  { %v830_v24 = vld [vmem:[%s5712_s1 + $0x968] sm:$0xff] }
 0x229   :  { %v2338_v45 = vadd.f32 %v2337_v40, %v1827_v34  ;;  %v1330_v34 = vsub.f32 %v306_v27, %v818_v28  ;;  %v1841_v40 = vmul.f32 %v1329_v29, %v1329_v29  ;;  %v319_v28 = vld [vmem:[%s5711_s0 + $0x970] sm:$0xff] }
 0x22a   :  { %v831_v29 = vld [vmem:[%s5712_s1 + $0x970] sm:$0xff] }
 0x22b   :  { %v2339_v50 = vadd.f32 %v2338_v45, %v1828_v39  ;;  %v1331_v39 = vsub.f32 %v307_v32, %v819_v33  ;;  %v1842_v45 = vmul.f32 %v1330_v34, %v1330_v34  ;;  %v320_v33 = vld [vmem:[%s5711_s0 + $0x978] sm:$0xff] }
 0x22c   :  { %v832_v34 = vld [vmem:[%s5712_s1 + $0x978] sm:$0xff] }
 0x22d   :  { %v2340_v55 = vadd.f32 %v2339_v50, %v1829_v44  ;;  %v1332_v44 = vsub.f32 %v308_v37, %v820_v38  ;;  %v1843_v50 = vmul.f32 %v1331_v39, %v1331_v39  ;;  %v321_v38 = vld [vmem:[%s5711_s0 + $0x980] sm:$0xff] }
 0x22e   :  { %v833_v39 = vld [vmem:[%s5712_s1 + $0x980] sm:$0xff] }
 0x22f   :  { %v2341_v60 = vadd.f32 %v2340_v55, %v1830_v49  ;;  %v1333_v49 = vsub.f32 %v309_v42, %v821_v43  ;;  %v1844_v55 = vmul.f32 %v1332_v44, %v1332_v44  ;;  %v322_v43 = vld [vmem:[%s5711_s0 + $0x988] sm:$0xff] }
 0x230   :  { %v834_v44 = vld [vmem:[%s5712_s1 + $0x988] sm:$0xff] }
 0x231   :  { %v2342_v1 = vadd.f32 %v2341_v60, %v1831_v54  ;;  %v1334_v54 = vsub.f32 %v310_v47, %v822_v48  ;;  %v1845_v60 = vmul.f32 %v1333_v49, %v1333_v49  ;;  %v323_v48 = vld [vmem:[%s5711_s0 + $0x990] sm:$0xff] }
 0x232   :  { %v835_v49 = vld [vmem:[%s5712_s1 + $0x990] sm:$0xff] }
 0x233   :  { %v2343_v6 = vadd.f32 %v2342_v1, %v1832_v59  ;;  %v1335_v59 = vsub.f32 %v311_v52, %v823_v53  ;;  %v1846_v1 = vmul.f32 %v1334_v54, %v1334_v54  ;;  %v324_v53 = vld [vmem:[%s5711_s0 + $0x998] sm:$0xff] }
 0x234   :  { %v836_v54 = vld [vmem:[%s5712_s1 + $0x998] sm:$0xff] }
 0x235   :  { %v2344_v11 = vadd.f32 %v2343_v6, %v1833_v0  ;;  %v1336_v0 = vsub.f32 %v312_v57, %v824_v58  ;;  %v1847_v6 = vmul.f32 %v1335_v59, %v1335_v59  ;;  %v325_v58 = vld [vmem:[%s5711_s0 + $0x9a0] sm:$0xff] }
 0x236   :  { %v837_v59 = vld [vmem:[%s5712_s1 + $0x9a0] sm:$0xff] }
 0x237   :  { %v2345_v16 = vadd.f32 %v2344_v11, %v1834_v5  ;;  %v1337_v5 = vsub.f32 %v313_v62, %v825_v63  ;;  %v1848_v11 = vmul.f32 %v1336_v0, %v1336_v0  ;;  %v326_v63 = vld [vmem:[%s5711_s0 + $0x9a8] sm:$0xff] }
 0x238   :  { %v838_v0 = vld [vmem:[%s5712_s1 + $0x9a8] sm:$0xff] }
 0x239   :  { %v2346_v21 = vadd.f32 %v2345_v16, %v1835_v10  ;;  %v1338_v10 = vsub.f32 %v314_v3, %v826_v4  ;;  %v1849_v16 = vmul.f32 %v1337_v5, %v1337_v5  ;;  %v327_v4 = vld [vmem:[%s5711_s0 + $0x9b0] sm:$0xff] }
 0x23a   :  { %v839_v5 = vld [vmem:[%s5712_s1 + $0x9b0] sm:$0xff] }
 0x23b   :  { %v2347_v26 = vadd.f32 %v2346_v21, %v1836_v15  ;;  %v1339_v15 = vsub.f32 %v315_v8, %v827_v9  ;;  %v1850_v21 = vmul.f32 %v1338_v10, %v1338_v10  ;;  %v328_v9 = vld [vmem:[%s5711_s0 + $0x9b8] sm:$0xff] }
 0x23c   :  { %v840_v10 = vld [vmem:[%s5712_s1 + $0x9b8] sm:$0xff] }
 0x23d   :  { %v2348_v31 = vadd.f32 %v2347_v26, %v1837_v20  ;;  %v1340_v20 = vsub.f32 %v316_v13, %v828_v14  ;;  %v1851_v26 = vmul.f32 %v1339_v15, %v1339_v15  ;;  %v329_v14 = vld [vmem:[%s5711_s0 + $0x9c0] sm:$0xff] }
 0x23e   :  { %v841_v15 = vld [vmem:[%s5712_s1 + $0x9c0] sm:$0xff] }
 0x23f   :  { %v2349_v36 = vadd.f32 %v2348_v31, %v1838_v25  ;;  %v1341_v25 = vsub.f32 %v317_v18, %v829_v19  ;;  %v1852_v31 = vmul.f32 %v1340_v20, %v1340_v20  ;;  %v330_v19 = vld [vmem:[%s5711_s0 + $0x9c8] sm:$0xff] }
 0x240   :  { %v842_v20 = vld [vmem:[%s5712_s1 + $0x9c8] sm:$0xff] }
 0x241   :  { %v2350_v41 = vadd.f32 %v2349_v36, %v1839_v30  ;;  %v1342_v30 = vsub.f32 %v318_v23, %v830_v24  ;;  %v1853_v36 = vmul.f32 %v1341_v25, %v1341_v25  ;;  %v331_v24 = vld [vmem:[%s5711_s0 + $0x9d0] sm:$0xff] }
 0x242   :  { %v843_v25 = vld [vmem:[%s5712_s1 + $0x9d0] sm:$0xff] }
 0x243   :  { %v2351_v46 = vadd.f32 %v2350_v41, %v1840_v35  ;;  %v1343_v35 = vsub.f32 %v319_v28, %v831_v29  ;;  %v1854_v41 = vmul.f32 %v1342_v30, %v1342_v30  ;;  %v332_v29 = vld [vmem:[%s5711_s0 + $0x9d8] sm:$0xff] }
 0x244   :  { %v844_v30 = vld [vmem:[%s5712_s1 + $0x9d8] sm:$0xff] }
 0x245   :  { %v2352_v51 = vadd.f32 %v2351_v46, %v1841_v40  ;;  %v1344_v40 = vsub.f32 %v320_v33, %v832_v34  ;;  %v1855_v46 = vmul.f32 %v1343_v35, %v1343_v35  ;;  %v333_v34 = vld [vmem:[%s5711_s0 + $0x9e0] sm:$0xff] }
 0x246   :  { %v845_v35 = vld [vmem:[%s5712_s1 + $0x9e0] sm:$0xff] }
 0x247   :  { %v2353_v56 = vadd.f32 %v2352_v51, %v1842_v45  ;;  %v1345_v45 = vsub.f32 %v321_v38, %v833_v39  ;;  %v1856_v51 = vmul.f32 %v1344_v40, %v1344_v40  ;;  %v334_v39 = vld [vmem:[%s5711_s0 + $0x9e8] sm:$0xff] }
 0x248   :  { %v846_v40 = vld [vmem:[%s5712_s1 + $0x9e8] sm:$0xff] }
 0x249   :  { %v2354_v61 = vadd.f32 %v2353_v56, %v1843_v50  ;;  %v1346_v50 = vsub.f32 %v322_v43, %v834_v44  ;;  %v1857_v56 = vmul.f32 %v1345_v45, %v1345_v45  ;;  %v335_v44 = vld [vmem:[%s5711_s0 + $0x9f0] sm:$0xff] }
 0x24a   :  { %v847_v45 = vld [vmem:[%s5712_s1 + $0x9f0] sm:$0xff] }
 0x24b   :  { %v2355_v2 = vadd.f32 %v2354_v61, %v1844_v55  ;;  %v1347_v55 = vsub.f32 %v323_v48, %v835_v49  ;;  %v1858_v61 = vmul.f32 %v1346_v50, %v1346_v50  ;;  %v336_v49 = vld [vmem:[%s5711_s0 + $0x9f8] sm:$0xff] }
 0x24c   :  { %v848_v50 = vld [vmem:[%s5712_s1 + $0x9f8] sm:$0xff] }
 0x24d   :  { %v2356_v7 = vadd.f32 %v2355_v2, %v1845_v60  ;;  %v1348_v60 = vsub.f32 %v324_v53, %v836_v54  ;;  %v1859_v2 = vmul.f32 %v1347_v55, %v1347_v55  ;;  %v337_v54 = vld [vmem:[%s5711_s0 + $0xa00] sm:$0xff] }
 0x24e   :  { %v849_v55 = vld [vmem:[%s5712_s1 + $0xa00] sm:$0xff] }
 0x24f   :  { %v2357_v12 = vadd.f32 %v2356_v7, %v1846_v1  ;;  %v1349_v1 = vsub.f32 %v325_v58, %v837_v59  ;;  %v1860_v7 = vmul.f32 %v1348_v60, %v1348_v60  ;;  %v338_v59 = vld [vmem:[%s5711_s0 + $0xa08] sm:$0xff] }
 0x250   :  { %v850_v60 = vld [vmem:[%s5712_s1 + $0xa08] sm:$0xff] }
 0x251   :  { %v2358_v17 = vadd.f32 %v2357_v12, %v1847_v6  ;;  %v1350_v6 = vsub.f32 %v326_v63, %v838_v0  ;;  %v1861_v12 = vmul.f32 %v1349_v1, %v1349_v1  ;;  %v339_v0 = vld [vmem:[%s5711_s0 + $0xa10] sm:$0xff] }
 0x252   :  { %v851_v1 = vld [vmem:[%s5712_s1 + $0xa10] sm:$0xff] }
 0x253   :  { %v2359_v22 = vadd.f32 %v2358_v17, %v1848_v11  ;;  %v1351_v11 = vsub.f32 %v327_v4, %v839_v5  ;;  %v1862_v17 = vmul.f32 %v1350_v6, %v1350_v6  ;;  %v340_v5 = vld [vmem:[%s5711_s0 + $0xa18] sm:$0xff] }
 0x254   :  { %v852_v6 = vld [vmem:[%s5712_s1 + $0xa18] sm:$0xff] }
 0x255   :  { %v2360_v27 = vadd.f32 %v2359_v22, %v1849_v16  ;;  %v1352_v16 = vsub.f32 %v328_v9, %v840_v10  ;;  %v1863_v22 = vmul.f32 %v1351_v11, %v1351_v11  ;;  %v341_v10 = vld [vmem:[%s5711_s0 + $0xa20] sm:$0xff] }
 0x256   :  { %v853_v11 = vld [vmem:[%s5712_s1 + $0xa20] sm:$0xff] }
 0x257   :  { %v2361_v32 = vadd.f32 %v2360_v27, %v1850_v21  ;;  %v1353_v21 = vsub.f32 %v329_v14, %v841_v15  ;;  %v1864_v27 = vmul.f32 %v1352_v16, %v1352_v16  ;;  %v342_v15 = vld [vmem:[%s5711_s0 + $0xa28] sm:$0xff] }
 0x258   :  { %v854_v16 = vld [vmem:[%s5712_s1 + $0xa28] sm:$0xff] }
 0x259   :  { %v2362_v37 = vadd.f32 %v2361_v32, %v1851_v26  ;;  %v1354_v26 = vsub.f32 %v330_v19, %v842_v20  ;;  %v1865_v32 = vmul.f32 %v1353_v21, %v1353_v21  ;;  %v343_v20 = vld [vmem:[%s5711_s0 + $0xa30] sm:$0xff] }
 0x25a   :  { %v855_v21 = vld [vmem:[%s5712_s1 + $0xa30] sm:$0xff] }
 0x25b   :  { %v2363_v42 = vadd.f32 %v2362_v37, %v1852_v31  ;;  %v1355_v31 = vsub.f32 %v331_v24, %v843_v25  ;;  %v1866_v37 = vmul.f32 %v1354_v26, %v1354_v26  ;;  %v344_v25 = vld [vmem:[%s5711_s0 + $0xa38] sm:$0xff] }
 0x25c   :  { %v856_v26 = vld [vmem:[%s5712_s1 + $0xa38] sm:$0xff] }
 0x25d   :  { %v2364_v47 = vadd.f32 %v2363_v42, %v1853_v36  ;;  %v1356_v36 = vsub.f32 %v332_v29, %v844_v30  ;;  %v1867_v42 = vmul.f32 %v1355_v31, %v1355_v31  ;;  %v345_v30 = vld [vmem:[%s5711_s0 + $0xa40] sm:$0xff] }
 0x25e   :  { %v857_v31 = vld [vmem:[%s5712_s1 + $0xa40] sm:$0xff] }
 0x25f   :  { %v2365_v52 = vadd.f32 %v2364_v47, %v1854_v41  ;;  %v1357_v41 = vsub.f32 %v333_v34, %v845_v35  ;;  %v1868_v47 = vmul.f32 %v1356_v36, %v1356_v36  ;;  %v346_v35 = vld [vmem:[%s5711_s0 + $0xa48] sm:$0xff] }
 0x260   :  { %v858_v36 = vld [vmem:[%s5712_s1 + $0xa48] sm:$0xff] }
 0x261   :  { %v2366_v57 = vadd.f32 %v2365_v52, %v1855_v46  ;;  %v1358_v46 = vsub.f32 %v334_v39, %v846_v40  ;;  %v1869_v52 = vmul.f32 %v1357_v41, %v1357_v41  ;;  %v347_v40 = vld [vmem:[%s5711_s0 + $0xa50] sm:$0xff] }
 0x262   :  { %v859_v41 = vld [vmem:[%s5712_s1 + $0xa50] sm:$0xff] }
 0x263   :  { %v2367_v62 = vadd.f32 %v2366_v57, %v1856_v51  ;;  %v1359_v51 = vsub.f32 %v335_v44, %v847_v45  ;;  %v1870_v57 = vmul.f32 %v1358_v46, %v1358_v46  ;;  %v348_v45 = vld [vmem:[%s5711_s0 + $0xa58] sm:$0xff] }
 0x264   :  { %v860_v46 = vld [vmem:[%s5712_s1 + $0xa58] sm:$0xff] }
 0x265   :  { %v2368_v3 = vadd.f32 %v2367_v62, %v1857_v56  ;;  %v1360_v56 = vsub.f32 %v336_v49, %v848_v50  ;;  %v1871_v62 = vmul.f32 %v1359_v51, %v1359_v51  ;;  %v349_v50 = vld [vmem:[%s5711_s0 + $0xa60] sm:$0xff] }
 0x266   :  { %v861_v51 = vld [vmem:[%s5712_s1 + $0xa60] sm:$0xff] }
 0x267   :  { %v2369_v8 = vadd.f32 %v2368_v3, %v1858_v61  ;;  %v1361_v61 = vsub.f32 %v337_v54, %v849_v55  ;;  %v1872_v3 = vmul.f32 %v1360_v56, %v1360_v56  ;;  %v350_v55 = vld [vmem:[%s5711_s0 + $0xa68] sm:$0xff] }
 0x268   :  { %v862_v56 = vld [vmem:[%s5712_s1 + $0xa68] sm:$0xff] }
 0x269   :  { %v2370_v13 = vadd.f32 %v2369_v8, %v1859_v2  ;;  %v1362_v2 = vsub.f32 %v338_v59, %v850_v60  ;;  %v1873_v8 = vmul.f32 %v1361_v61, %v1361_v61  ;;  %v351_v60 = vld [vmem:[%s5711_s0 + $0xa70] sm:$0xff] }
 0x26a   :  { %v863_v61 = vld [vmem:[%s5712_s1 + $0xa70] sm:$0xff] }
 0x26b   :  { %v2371_v18 = vadd.f32 %v2370_v13, %v1860_v7  ;;  %v1363_v7 = vsub.f32 %v339_v0, %v851_v1  ;;  %v1874_v13 = vmul.f32 %v1362_v2, %v1362_v2  ;;  %v352_v1 = vld [vmem:[%s5711_s0 + $0xa78] sm:$0xff] }
 0x26c   :  { %v864_v2 = vld [vmem:[%s5712_s1 + $0xa78] sm:$0xff] }
 0x26d   :  { %v2372_v23 = vadd.f32 %v2371_v18, %v1861_v12  ;;  %v1364_v12 = vsub.f32 %v340_v5, %v852_v6  ;;  %v1875_v18 = vmul.f32 %v1363_v7, %v1363_v7  ;;  %v353_v6 = vld [vmem:[%s5711_s0 + $0xa80] sm:$0xff] }
 0x26e   :  { %v865_v7 = vld [vmem:[%s5712_s1 + $0xa80] sm:$0xff] }
 0x26f   :  { %v2373_v28 = vadd.f32 %v2372_v23, %v1862_v17  ;;  %v1365_v17 = vsub.f32 %v341_v10, %v853_v11  ;;  %v1876_v23 = vmul.f32 %v1364_v12, %v1364_v12  ;;  %v354_v11 = vld [vmem:[%s5711_s0 + $0xa88] sm:$0xff] }
 0x270   :  { %v866_v12 = vld [vmem:[%s5712_s1 + $0xa88] sm:$0xff] }
 0x271   :  { %v2374_v33 = vadd.f32 %v2373_v28, %v1863_v22  ;;  %v1366_v22 = vsub.f32 %v342_v15, %v854_v16  ;;  %v1877_v28 = vmul.f32 %v1365_v17, %v1365_v17  ;;  %v355_v16 = vld [vmem:[%s5711_s0 + $0xa90] sm:$0xff] }
 0x272   :  { %v867_v17 = vld [vmem:[%s5712_s1 + $0xa90] sm:$0xff] }
 0x273   :  { %v2375_v38 = vadd.f32 %v2374_v33, %v1864_v27  ;;  %v1367_v27 = vsub.f32 %v343_v20, %v855_v21  ;;  %v1878_v33 = vmul.f32 %v1366_v22, %v1366_v22  ;;  %v356_v21 = vld [vmem:[%s5711_s0 + $0xa98] sm:$0xff] }
 0x274   :  { %v868_v22 = vld [vmem:[%s5712_s1 + $0xa98] sm:$0xff] }
 0x275   :  { %v2376_v43 = vadd.f32 %v2375_v38, %v1865_v32  ;;  %v1368_v32 = vsub.f32 %v344_v25, %v856_v26  ;;  %v1879_v38 = vmul.f32 %v1367_v27, %v1367_v27  ;;  %v357_v26 = vld [vmem:[%s5711_s0 + $0xaa0] sm:$0xff] }
 0x276   :  { %v869_v27 = vld [vmem:[%s5712_s1 + $0xaa0] sm:$0xff] }
 0x277   :  { %v2377_v48 = vadd.f32 %v2376_v43, %v1866_v37  ;;  %v1369_v37 = vsub.f32 %v345_v30, %v857_v31  ;;  %v1880_v43 = vmul.f32 %v1368_v32, %v1368_v32  ;;  %v358_v31 = vld [vmem:[%s5711_s0 + $0xaa8] sm:$0xff] }
 0x278   :  { %v870_v32 = vld [vmem:[%s5712_s1 + $0xaa8] sm:$0xff] }
 0x279   :  { %v2378_v53 = vadd.f32 %v2377_v48, %v1867_v42  ;;  %v1370_v42 = vsub.f32 %v346_v35, %v858_v36  ;;  %v1881_v48 = vmul.f32 %v1369_v37, %v1369_v37  ;;  %v359_v36 = vld [vmem:[%s5711_s0 + $0xab0] sm:$0xff] }
 0x27a   :  { %v871_v37 = vld [vmem:[%s5712_s1 + $0xab0] sm:$0xff] }
 0x27b   :  { %v2379_v58 = vadd.f32 %v2378_v53, %v1868_v47  ;;  %v1371_v47 = vsub.f32 %v347_v40, %v859_v41  ;;  %v1882_v53 = vmul.f32 %v1370_v42, %v1370_v42  ;;  %v360_v41 = vld [vmem:[%s5711_s0 + $0xab8] sm:$0xff] }
 0x27c   :  { %v872_v42 = vld [vmem:[%s5712_s1 + $0xab8] sm:$0xff] }
 0x27d   :  { %v2380_v63 = vadd.f32 %v2379_v58, %v1869_v52  ;;  %v1372_v52 = vsub.f32 %v348_v45, %v860_v46  ;;  %v1883_v58 = vmul.f32 %v1371_v47, %v1371_v47  ;;  %v361_v46 = vld [vmem:[%s5711_s0 + $0xac0] sm:$0xff] }
 0x27e   :  { %v873_v47 = vld [vmem:[%s5712_s1 + $0xac0] sm:$0xff] }
 0x27f   :  { %v2381_v4 = vadd.f32 %v2380_v63, %v1870_v57  ;;  %v1373_v57 = vsub.f32 %v349_v50, %v861_v51  ;;  %v1884_v63 = vmul.f32 %v1372_v52, %v1372_v52  ;;  %v362_v51 = vld [vmem:[%s5711_s0 + $0xac8] sm:$0xff] }
 0x280   :  { %v874_v52 = vld [vmem:[%s5712_s1 + $0xac8] sm:$0xff] }
 0x281   :  { %v2382_v9 = vadd.f32 %v2381_v4, %v1871_v62  ;;  %v1374_v62 = vsub.f32 %v350_v55, %v862_v56  ;;  %v1885_v4 = vmul.f32 %v1373_v57, %v1373_v57  ;;  %v363_v56 = vld [vmem:[%s5711_s0 + $0xad0] sm:$0xff] }
 0x282   :  { %v875_v57 = vld [vmem:[%s5712_s1 + $0xad0] sm:$0xff] }
 0x283   :  { %v2383_v14 = vadd.f32 %v2382_v9, %v1872_v3  ;;  %v1375_v3 = vsub.f32 %v351_v60, %v863_v61  ;;  %v1886_v9 = vmul.f32 %v1374_v62, %v1374_v62  ;;  %v364_v61 = vld [vmem:[%s5711_s0 + $0xad8] sm:$0xff] }
 0x284   :  { %v876_v62 = vld [vmem:[%s5712_s1 + $0xad8] sm:$0xff] }
 0x285   :  { %v2384_v19 = vadd.f32 %v2383_v14, %v1873_v8  ;;  %v1376_v8 = vsub.f32 %v352_v1, %v864_v2  ;;  %v1887_v14 = vmul.f32 %v1375_v3, %v1375_v3  ;;  %v365_v2 = vld [vmem:[%s5711_s0 + $0xae0] sm:$0xff] }
 0x286   :  { %v877_v3 = vld [vmem:[%s5712_s1 + $0xae0] sm:$0xff] }
 0x287   :  { %v2385_v24 = vadd.f32 %v2384_v19, %v1874_v13  ;;  %v1377_v13 = vsub.f32 %v353_v6, %v865_v7  ;;  %v1888_v19 = vmul.f32 %v1376_v8, %v1376_v8  ;;  %v366_v7 = vld [vmem:[%s5711_s0 + $0xae8] sm:$0xff] }
 0x288   :  { %v878_v8 = vld [vmem:[%s5712_s1 + $0xae8] sm:$0xff] }
 0x289   :  { %v2386_v29 = vadd.f32 %v2385_v24, %v1875_v18  ;;  %v1378_v18 = vsub.f32 %v354_v11, %v866_v12  ;;  %v1889_v24 = vmul.f32 %v1377_v13, %v1377_v13  ;;  %v367_v12 = vld [vmem:[%s5711_s0 + $0xaf0] sm:$0xff] }
 0x28a   :  { %v879_v13 = vld [vmem:[%s5712_s1 + $0xaf0] sm:$0xff] }
 0x28b   :  { %v2387_v34 = vadd.f32 %v2386_v29, %v1876_v23  ;;  %v1379_v23 = vsub.f32 %v355_v16, %v867_v17  ;;  %v1890_v29 = vmul.f32 %v1378_v18, %v1378_v18  ;;  %v368_v17 = vld [vmem:[%s5711_s0 + $0xaf8] sm:$0xff] }
 0x28c   :  { %v880_v18 = vld [vmem:[%s5712_s1 + $0xaf8] sm:$0xff] }
 0x28d   :  { %v2388_v39 = vadd.f32 %v2387_v34, %v1877_v28  ;;  %v1380_v28 = vsub.f32 %v356_v21, %v868_v22  ;;  %v1891_v34 = vmul.f32 %v1379_v23, %v1379_v23  ;;  %v369_v22 = vld [vmem:[%s5711_s0 + $0xb00] sm:$0xff] }
 0x28e   :  { %v881_v23 = vld [vmem:[%s5712_s1 + $0xb00] sm:$0xff] }
 0x28f   :  { %v2389_v44 = vadd.f32 %v2388_v39, %v1878_v33  ;;  %v1381_v33 = vsub.f32 %v357_v26, %v869_v27  ;;  %v1892_v39 = vmul.f32 %v1380_v28, %v1380_v28  ;;  %v370_v27 = vld [vmem:[%s5711_s0 + $0xb08] sm:$0xff] }
 0x290   :  { %v882_v28 = vld [vmem:[%s5712_s1 + $0xb08] sm:$0xff] }
 0x291   :  { %v2390_v49 = vadd.f32 %v2389_v44, %v1879_v38  ;;  %v1382_v38 = vsub.f32 %v358_v31, %v870_v32  ;;  %v1893_v44 = vmul.f32 %v1381_v33, %v1381_v33  ;;  %v371_v32 = vld [vmem:[%s5711_s0 + $0xb10] sm:$0xff] }
 0x292   :  { %v883_v33 = vld [vmem:[%s5712_s1 + $0xb10] sm:$0xff] }
 0x293   :  { %v2391_v54 = vadd.f32 %v2390_v49, %v1880_v43  ;;  %v1383_v43 = vsub.f32 %v359_v36, %v871_v37  ;;  %v1894_v49 = vmul.f32 %v1382_v38, %v1382_v38  ;;  %v372_v37 = vld [vmem:[%s5711_s0 + $0xb18] sm:$0xff] }
 0x294   :  { %v884_v38 = vld [vmem:[%s5712_s1 + $0xb18] sm:$0xff] }
 0x295   :  { %v2392_v59 = vadd.f32 %v2391_v54, %v1881_v48  ;;  %v1384_v48 = vsub.f32 %v360_v41, %v872_v42  ;;  %v1895_v54 = vmul.f32 %v1383_v43, %v1383_v43  ;;  %v373_v42 = vld [vmem:[%s5711_s0 + $0xb20] sm:$0xff] }
 0x296   :  { %v885_v43 = vld [vmem:[%s5712_s1 + $0xb20] sm:$0xff] }
 0x297   :  { %v2393_v0 = vadd.f32 %v2392_v59, %v1882_v53  ;;  %v1385_v53 = vsub.f32 %v361_v46, %v873_v47  ;;  %v1896_v59 = vmul.f32 %v1384_v48, %v1384_v48  ;;  %v374_v47 = vld [vmem:[%s5711_s0 + $0xb28] sm:$0xff] }
 0x298   :  { %v886_v48 = vld [vmem:[%s5712_s1 + $0xb28] sm:$0xff] }
 0x299   :  { %v2394_v5 = vadd.f32 %v2393_v0, %v1883_v58  ;;  %v1386_v58 = vsub.f32 %v362_v51, %v874_v52  ;;  %v1897_v0 = vmul.f32 %v1385_v53, %v1385_v53  ;;  %v375_v52 = vld [vmem:[%s5711_s0 + $0xb30] sm:$0xff] }
 0x29a   :  { %v887_v53 = vld [vmem:[%s5712_s1 + $0xb30] sm:$0xff] }
 0x29b   :  { %v2395_v10 = vadd.f32 %v2394_v5, %v1884_v63  ;;  %v1387_v63 = vsub.f32 %v363_v56, %v875_v57  ;;  %v1898_v5 = vmul.f32 %v1386_v58, %v1386_v58  ;;  %v376_v57 = vld [vmem:[%s5711_s0 + $0xb38] sm:$0xff] }
 0x29c   :  { %v888_v58 = vld [vmem:[%s5712_s1 + $0xb38] sm:$0xff] }
 0x29d   :  { %v2396_v15 = vadd.f32 %v2395_v10, %v1885_v4  ;;  %v1388_v4 = vsub.f32 %v364_v61, %v876_v62  ;;  %v1899_v10 = vmul.f32 %v1387_v63, %v1387_v63  ;;  %v377_v62 = vld [vmem:[%s5711_s0 + $0xb40] sm:$0xff] }
 0x29e   :  { %v889_v63 = vld [vmem:[%s5712_s1 + $0xb40] sm:$0xff] }
 0x29f   :  { %v2397_v20 = vadd.f32 %v2396_v15, %v1886_v9  ;;  %v1389_v9 = vsub.f32 %v365_v2, %v877_v3  ;;  %v1900_v15 = vmul.f32 %v1388_v4, %v1388_v4  ;;  %v378_v3 = vld [vmem:[%s5711_s0 + $0xb48] sm:$0xff] }
 0x2a0   :  { %v890_v4 = vld [vmem:[%s5712_s1 + $0xb48] sm:$0xff] }
 0x2a1   :  { %v2398_v25 = vadd.f32 %v2397_v20, %v1887_v14  ;;  %v1390_v14 = vsub.f32 %v366_v7, %v878_v8  ;;  %v1901_v20 = vmul.f32 %v1389_v9, %v1389_v9  ;;  %v379_v8 = vld [vmem:[%s5711_s0 + $0xb50] sm:$0xff] }
 0x2a2   :  { %v891_v9 = vld [vmem:[%s5712_s1 + $0xb50] sm:$0xff] }
 0x2a3   :  { %v2399_v30 = vadd.f32 %v2398_v25, %v1888_v19  ;;  %v1391_v19 = vsub.f32 %v367_v12, %v879_v13  ;;  %v1902_v25 = vmul.f32 %v1390_v14, %v1390_v14  ;;  %v380_v13 = vld [vmem:[%s5711_s0 + $0xb58] sm:$0xff] }
 0x2a4   :  { %v892_v14 = vld [vmem:[%s5712_s1 + $0xb58] sm:$0xff] }
 0x2a5   :  { %v2400_v35 = vadd.f32 %v2399_v30, %v1889_v24  ;;  %v1392_v24 = vsub.f32 %v368_v17, %v880_v18  ;;  %v1903_v30 = vmul.f32 %v1391_v19, %v1391_v19  ;;  %v381_v18 = vld [vmem:[%s5711_s0 + $0xb60] sm:$0xff] }
 0x2a6   :  { %v893_v19 = vld [vmem:[%s5712_s1 + $0xb60] sm:$0xff] }
 0x2a7   :  { %v2401_v40 = vadd.f32 %v2400_v35, %v1890_v29  ;;  %v1393_v29 = vsub.f32 %v369_v22, %v881_v23  ;;  %v1904_v35 = vmul.f32 %v1392_v24, %v1392_v24  ;;  %v382_v23 = vld [vmem:[%s5711_s0 + $0xb68] sm:$0xff] }
 0x2a8   :  { %v894_v24 = vld [vmem:[%s5712_s1 + $0xb68] sm:$0xff] }
 0x2a9   :  { %v2402_v45 = vadd.f32 %v2401_v40, %v1891_v34  ;;  %v1394_v34 = vsub.f32 %v370_v27, %v882_v28  ;;  %v1905_v40 = vmul.f32 %v1393_v29, %v1393_v29  ;;  %v383_v28 = vld [vmem:[%s5711_s0 + $0xb70] sm:$0xff] }
 0x2aa   :  { %v895_v29 = vld [vmem:[%s5712_s1 + $0xb70] sm:$0xff] }
 0x2ab   :  { %v2403_v50 = vadd.f32 %v2402_v45, %v1892_v39  ;;  %v1395_v39 = vsub.f32 %v371_v32, %v883_v33  ;;  %v1906_v45 = vmul.f32 %v1394_v34, %v1394_v34  ;;  %v384_v33 = vld [vmem:[%s5711_s0 + $0xb78] sm:$0xff] }
 0x2ac   :  { %v896_v34 = vld [vmem:[%s5712_s1 + $0xb78] sm:$0xff] }
 0x2ad   :  { %v2404_v55 = vadd.f32 %v2403_v50, %v1893_v44  ;;  %v1396_v44 = vsub.f32 %v372_v37, %v884_v38  ;;  %v1907_v50 = vmul.f32 %v1395_v39, %v1395_v39  ;;  %v385_v38 = vld [vmem:[%s5711_s0 + $0xb80] sm:$0xff] }
 0x2ae   :  { %v897_v39 = vld [vmem:[%s5712_s1 + $0xb80] sm:$0xff] }
 0x2af   :  { %v2405_v60 = vadd.f32 %v2404_v55, %v1894_v49  ;;  %v1397_v49 = vsub.f32 %v373_v42, %v885_v43  ;;  %v1908_v55 = vmul.f32 %v1396_v44, %v1396_v44  ;;  %v386_v43 = vld [vmem:[%s5711_s0 + $0xb88] sm:$0xff] }
 0x2b0   :  { %v898_v44 = vld [vmem:[%s5712_s1 + $0xb88] sm:$0xff] }
 0x2b1   :  { %v2406_v1 = vadd.f32 %v2405_v60, %v1895_v54  ;;  %v1398_v54 = vsub.f32 %v374_v47, %v886_v48  ;;  %v1909_v60 = vmul.f32 %v1397_v49, %v1397_v49  ;;  %v387_v48 = vld [vmem:[%s5711_s0 + $0xb90] sm:$0xff] }
 0x2b2   :  { %v899_v49 = vld [vmem:[%s5712_s1 + $0xb90] sm:$0xff] }
 0x2b3   :  { %v2407_v6 = vadd.f32 %v2406_v1, %v1896_v59  ;;  %v1399_v59 = vsub.f32 %v375_v52, %v887_v53  ;;  %v1910_v1 = vmul.f32 %v1398_v54, %v1398_v54  ;;  %v388_v53 = vld [vmem:[%s5711_s0 + $0xb98] sm:$0xff] }
 0x2b4   :  { %v900_v54 = vld [vmem:[%s5712_s1 + $0xb98] sm:$0xff] }
 0x2b5   :  { %v2408_v11 = vadd.f32 %v2407_v6, %v1897_v0  ;;  %v1400_v0 = vsub.f32 %v376_v57, %v888_v58  ;;  %v1911_v6 = vmul.f32 %v1399_v59, %v1399_v59  ;;  %v389_v58 = vld [vmem:[%s5711_s0 + $0xba0] sm:$0xff] }
 0x2b6   :  { %v901_v59 = vld [vmem:[%s5712_s1 + $0xba0] sm:$0xff] }
 0x2b7   :  { %v2409_v16 = vadd.f32 %v2408_v11, %v1898_v5  ;;  %v1401_v5 = vsub.f32 %v377_v62, %v889_v63  ;;  %v1912_v11 = vmul.f32 %v1400_v0, %v1400_v0  ;;  %v390_v63 = vld [vmem:[%s5711_s0 + $0xba8] sm:$0xff] }
 0x2b8   :  { %v902_v0 = vld [vmem:[%s5712_s1 + $0xba8] sm:$0xff] }
 0x2b9   :  { %v2410_v21 = vadd.f32 %v2409_v16, %v1899_v10  ;;  %v1402_v10 = vsub.f32 %v378_v3, %v890_v4  ;;  %v1913_v16 = vmul.f32 %v1401_v5, %v1401_v5  ;;  %v391_v4 = vld [vmem:[%s5711_s0 + $0xbb0] sm:$0xff] }
 0x2ba   :  { %v903_v5 = vld [vmem:[%s5712_s1 + $0xbb0] sm:$0xff] }
 0x2bb   :  { %v2411_v26 = vadd.f32 %v2410_v21, %v1900_v15  ;;  %v1403_v15 = vsub.f32 %v379_v8, %v891_v9  ;;  %v1914_v21 = vmul.f32 %v1402_v10, %v1402_v10  ;;  %v392_v9 = vld [vmem:[%s5711_s0 + $0xbb8] sm:$0xff] }
 0x2bc   :  { %v904_v10 = vld [vmem:[%s5712_s1 + $0xbb8] sm:$0xff] }
 0x2bd   :  { %v2412_v31 = vadd.f32 %v2411_v26, %v1901_v20  ;;  %v1404_v20 = vsub.f32 %v380_v13, %v892_v14  ;;  %v1915_v26 = vmul.f32 %v1403_v15, %v1403_v15  ;;  %v393_v14 = vld [vmem:[%s5711_s0 + $0xbc0] sm:$0xff] }
 0x2be   :  { %v905_v15 = vld [vmem:[%s5712_s1 + $0xbc0] sm:$0xff] }
 0x2bf   :  { %v2413_v36 = vadd.f32 %v2412_v31, %v1902_v25  ;;  %v1405_v25 = vsub.f32 %v381_v18, %v893_v19  ;;  %v1916_v31 = vmul.f32 %v1404_v20, %v1404_v20  ;;  %v394_v19 = vld [vmem:[%s5711_s0 + $0xbc8] sm:$0xff] }
 0x2c0   :  { %v906_v20 = vld [vmem:[%s5712_s1 + $0xbc8] sm:$0xff] }
 0x2c1   :  { %v2414_v41 = vadd.f32 %v2413_v36, %v1903_v30  ;;  %v1406_v30 = vsub.f32 %v382_v23, %v894_v24  ;;  %v1917_v36 = vmul.f32 %v1405_v25, %v1405_v25  ;;  %v395_v24 = vld [vmem:[%s5711_s0 + $0xbd0] sm:$0xff] }
 0x2c2   :  { %v907_v25 = vld [vmem:[%s5712_s1 + $0xbd0] sm:$0xff] }
 0x2c3   :  { %v2415_v46 = vadd.f32 %v2414_v41, %v1904_v35  ;;  %v1407_v35 = vsub.f32 %v383_v28, %v895_v29  ;;  %v1918_v41 = vmul.f32 %v1406_v30, %v1406_v30  ;;  %v396_v29 = vld [vmem:[%s5711_s0 + $0xbd8] sm:$0xff] }
 0x2c4   :  { %v908_v30 = vld [vmem:[%s5712_s1 + $0xbd8] sm:$0xff] }
 0x2c5   :  { %v2416_v51 = vadd.f32 %v2415_v46, %v1905_v40  ;;  %v1408_v40 = vsub.f32 %v384_v33, %v896_v34  ;;  %v1919_v46 = vmul.f32 %v1407_v35, %v1407_v35  ;;  %v397_v34 = vld [vmem:[%s5711_s0 + $0xbe0] sm:$0xff] }
 0x2c6   :  { %v909_v35 = vld [vmem:[%s5712_s1 + $0xbe0] sm:$0xff] }
 0x2c7   :  { %v2417_v56 = vadd.f32 %v2416_v51, %v1906_v45  ;;  %v1409_v45 = vsub.f32 %v385_v38, %v897_v39  ;;  %v1920_v51 = vmul.f32 %v1408_v40, %v1408_v40  ;;  %v398_v39 = vld [vmem:[%s5711_s0 + $0xbe8] sm:$0xff] }
 0x2c8   :  { %v910_v40 = vld [vmem:[%s5712_s1 + $0xbe8] sm:$0xff] }
 0x2c9   :  { %v2418_v61 = vadd.f32 %v2417_v56, %v1907_v50  ;;  %v1410_v50 = vsub.f32 %v386_v43, %v898_v44  ;;  %v1921_v56 = vmul.f32 %v1409_v45, %v1409_v45  ;;  %v399_v44 = vld [vmem:[%s5711_s0 + $0xbf0] sm:$0xff] }
 0x2ca   :  { %v911_v45 = vld [vmem:[%s5712_s1 + $0xbf0] sm:$0xff] }
 0x2cb   :  { %v2419_v2 = vadd.f32 %v2418_v61, %v1908_v55  ;;  %v1411_v55 = vsub.f32 %v387_v48, %v899_v49  ;;  %v1922_v61 = vmul.f32 %v1410_v50, %v1410_v50  ;;  %v400_v49 = vld [vmem:[%s5711_s0 + $0xbf8] sm:$0xff] }
 0x2cc   :  { %v912_v50 = vld [vmem:[%s5712_s1 + $0xbf8] sm:$0xff] }
 0x2cd   :  { %v2420_v7 = vadd.f32 %v2419_v2, %v1909_v60  ;;  %v1412_v60 = vsub.f32 %v388_v53, %v900_v54  ;;  %v1923_v2 = vmul.f32 %v1411_v55, %v1411_v55  ;;  %v401_v54 = vld [vmem:[%s5711_s0 + $0xc00] sm:$0xff] }
 0x2ce   :  { %v913_v55 = vld [vmem:[%s5712_s1 + $0xc00] sm:$0xff] }
 0x2cf   :  { %v2421_v12 = vadd.f32 %v2420_v7, %v1910_v1  ;;  %v1413_v1 = vsub.f32 %v389_v58, %v901_v59  ;;  %v1924_v7 = vmul.f32 %v1412_v60, %v1412_v60  ;;  %v402_v59 = vld [vmem:[%s5711_s0 + $0xc08] sm:$0xff] }
 0x2d0   :  { %v914_v60 = vld [vmem:[%s5712_s1 + $0xc08] sm:$0xff] }
 0x2d1   :  { %v2422_v17 = vadd.f32 %v2421_v12, %v1911_v6  ;;  %v1414_v6 = vsub.f32 %v390_v63, %v902_v0  ;;  %v1925_v12 = vmul.f32 %v1413_v1, %v1413_v1  ;;  %v403_v0 = vld [vmem:[%s5711_s0 + $0xc10] sm:$0xff] }
 0x2d2   :  { %v915_v1 = vld [vmem:[%s5712_s1 + $0xc10] sm:$0xff] }
 0x2d3   :  { %v2423_v22 = vadd.f32 %v2422_v17, %v1912_v11  ;;  %v1415_v11 = vsub.f32 %v391_v4, %v903_v5  ;;  %v1926_v17 = vmul.f32 %v1414_v6, %v1414_v6  ;;  %v404_v5 = vld [vmem:[%s5711_s0 + $0xc18] sm:$0xff] }
 0x2d4   :  { %v916_v6 = vld [vmem:[%s5712_s1 + $0xc18] sm:$0xff] }
 0x2d5   :  { %v2424_v27 = vadd.f32 %v2423_v22, %v1913_v16  ;;  %v1416_v16 = vsub.f32 %v392_v9, %v904_v10  ;;  %v1927_v22 = vmul.f32 %v1415_v11, %v1415_v11  ;;  %v405_v10 = vld [vmem:[%s5711_s0 + $0xc20] sm:$0xff] }
 0x2d6   :  { %v917_v11 = vld [vmem:[%s5712_s1 + $0xc20] sm:$0xff] }
 0x2d7   :  { %v2425_v32 = vadd.f32 %v2424_v27, %v1914_v21  ;;  %v1417_v21 = vsub.f32 %v393_v14, %v905_v15  ;;  %v1928_v27 = vmul.f32 %v1416_v16, %v1416_v16  ;;  %v406_v15 = vld [vmem:[%s5711_s0 + $0xc28] sm:$0xff] }
 0x2d8   :  { %v918_v16 = vld [vmem:[%s5712_s1 + $0xc28] sm:$0xff] }
 0x2d9   :  { %v2426_v37 = vadd.f32 %v2425_v32, %v1915_v26  ;;  %v1418_v26 = vsub.f32 %v394_v19, %v906_v20  ;;  %v1929_v32 = vmul.f32 %v1417_v21, %v1417_v21  ;;  %v407_v20 = vld [vmem:[%s5711_s0 + $0xc30] sm:$0xff] }
 0x2da   :  { %v919_v21 = vld [vmem:[%s5712_s1 + $0xc30] sm:$0xff] }
 0x2db   :  { %v2427_v42 = vadd.f32 %v2426_v37, %v1916_v31  ;;  %v1419_v31 = vsub.f32 %v395_v24, %v907_v25  ;;  %v1930_v37 = vmul.f32 %v1418_v26, %v1418_v26  ;;  %v408_v25 = vld [vmem:[%s5711_s0 + $0xc38] sm:$0xff] }
 0x2dc   :  { %v920_v26 = vld [vmem:[%s5712_s1 + $0xc38] sm:$0xff] }
 0x2dd   :  { %v2428_v47 = vadd.f32 %v2427_v42, %v1917_v36  ;;  %v1420_v36 = vsub.f32 %v396_v29, %v908_v30  ;;  %v1931_v42 = vmul.f32 %v1419_v31, %v1419_v31  ;;  %v409_v30 = vld [vmem:[%s5711_s0 + $0xc40] sm:$0xff] }
 0x2de   :  { %v921_v31 = vld [vmem:[%s5712_s1 + $0xc40] sm:$0xff] }
 0x2df   :  { %v2429_v52 = vadd.f32 %v2428_v47, %v1918_v41  ;;  %v1421_v41 = vsub.f32 %v397_v34, %v909_v35  ;;  %v1932_v47 = vmul.f32 %v1420_v36, %v1420_v36  ;;  %v410_v35 = vld [vmem:[%s5711_s0 + $0xc48] sm:$0xff] }
 0x2e0   :  { %v922_v36 = vld [vmem:[%s5712_s1 + $0xc48] sm:$0xff] }
 0x2e1   :  { %v2430_v57 = vadd.f32 %v2429_v52, %v1919_v46  ;;  %v1422_v46 = vsub.f32 %v398_v39, %v910_v40  ;;  %v1933_v52 = vmul.f32 %v1421_v41, %v1421_v41  ;;  %v411_v40 = vld [vmem:[%s5711_s0 + $0xc50] sm:$0xff] }
 0x2e2   :  { %v923_v41 = vld [vmem:[%s5712_s1 + $0xc50] sm:$0xff] }
 0x2e3   :  { %v2431_v62 = vadd.f32 %v2430_v57, %v1920_v51  ;;  %v1423_v51 = vsub.f32 %v399_v44, %v911_v45  ;;  %v1934_v57 = vmul.f32 %v1422_v46, %v1422_v46  ;;  %v412_v45 = vld [vmem:[%s5711_s0 + $0xc58] sm:$0xff] }
 0x2e4   :  { %v924_v46 = vld [vmem:[%s5712_s1 + $0xc58] sm:$0xff] }
 0x2e5   :  { %v2432_v3 = vadd.f32 %v2431_v62, %v1921_v56  ;;  %v1424_v56 = vsub.f32 %v400_v49, %v912_v50  ;;  %v1935_v62 = vmul.f32 %v1423_v51, %v1423_v51  ;;  %v413_v50 = vld [vmem:[%s5711_s0 + $0xc60] sm:$0xff] }
 0x2e6   :  { %v925_v51 = vld [vmem:[%s5712_s1 + $0xc60] sm:$0xff] }
 0x2e7   :  { %v2433_v8 = vadd.f32 %v2432_v3, %v1922_v61  ;;  %v1425_v61 = vsub.f32 %v401_v54, %v913_v55  ;;  %v1936_v3 = vmul.f32 %v1424_v56, %v1424_v56  ;;  %v414_v55 = vld [vmem:[%s5711_s0 + $0xc68] sm:$0xff] }
 0x2e8   :  { %v926_v56 = vld [vmem:[%s5712_s1 + $0xc68] sm:$0xff] }
 0x2e9   :  { %v2434_v13 = vadd.f32 %v2433_v8, %v1923_v2  ;;  %v1426_v2 = vsub.f32 %v402_v59, %v914_v60  ;;  %v1937_v8 = vmul.f32 %v1425_v61, %v1425_v61  ;;  %v415_v60 = vld [vmem:[%s5711_s0 + $0xc70] sm:$0xff] }
 0x2ea   :  { %v927_v61 = vld [vmem:[%s5712_s1 + $0xc70] sm:$0xff] }
 0x2eb   :  { %v2435_v18 = vadd.f32 %v2434_v13, %v1924_v7  ;;  %v1427_v7 = vsub.f32 %v403_v0, %v915_v1  ;;  %v1938_v13 = vmul.f32 %v1426_v2, %v1426_v2  ;;  %v416_v1 = vld [vmem:[%s5711_s0 + $0xc78] sm:$0xff] }
 0x2ec   :  { %v928_v2 = vld [vmem:[%s5712_s1 + $0xc78] sm:$0xff] }
 0x2ed   :  { %v2436_v23 = vadd.f32 %v2435_v18, %v1925_v12  ;;  %v1428_v12 = vsub.f32 %v404_v5, %v916_v6  ;;  %v1939_v18 = vmul.f32 %v1427_v7, %v1427_v7  ;;  %v417_v6 = vld [vmem:[%s5711_s0 + $0xc80] sm:$0xff] }
 0x2ee   :  { %v929_v7 = vld [vmem:[%s5712_s1 + $0xc80] sm:$0xff] }
 0x2ef   :  { %v2437_v28 = vadd.f32 %v2436_v23, %v1926_v17  ;;  %v1429_v17 = vsub.f32 %v405_v10, %v917_v11  ;;  %v1940_v23 = vmul.f32 %v1428_v12, %v1428_v12  ;;  %v418_v11 = vld [vmem:[%s5711_s0 + $0xc88] sm:$0xff] }
 0x2f0   :  { %v930_v12 = vld [vmem:[%s5712_s1 + $0xc88] sm:$0xff] }
 0x2f1   :  { %v2438_v33 = vadd.f32 %v2437_v28, %v1927_v22  ;;  %v1430_v22 = vsub.f32 %v406_v15, %v918_v16  ;;  %v1941_v28 = vmul.f32 %v1429_v17, %v1429_v17  ;;  %v419_v16 = vld [vmem:[%s5711_s0 + $0xc90] sm:$0xff] }
 0x2f2   :  { %v931_v17 = vld [vmem:[%s5712_s1 + $0xc90] sm:$0xff] }
 0x2f3   :  { %v2439_v38 = vadd.f32 %v2438_v33, %v1928_v27  ;;  %v1431_v27 = vsub.f32 %v407_v20, %v919_v21  ;;  %v1942_v33 = vmul.f32 %v1430_v22, %v1430_v22  ;;  %v420_v21 = vld [vmem:[%s5711_s0 + $0xc98] sm:$0xff] }
 0x2f4   :  { %v932_v22 = vld [vmem:[%s5712_s1 + $0xc98] sm:$0xff] }
 0x2f5   :  { %v2440_v43 = vadd.f32 %v2439_v38, %v1929_v32  ;;  %v1432_v32 = vsub.f32 %v408_v25, %v920_v26  ;;  %v1943_v38 = vmul.f32 %v1431_v27, %v1431_v27  ;;  %v421_v26 = vld [vmem:[%s5711_s0 + $0xca0] sm:$0xff] }
 0x2f6   :  { %v933_v27 = vld [vmem:[%s5712_s1 + $0xca0] sm:$0xff] }
 0x2f7   :  { %v2441_v48 = vadd.f32 %v2440_v43, %v1930_v37  ;;  %v1433_v37 = vsub.f32 %v409_v30, %v921_v31  ;;  %v1944_v43 = vmul.f32 %v1432_v32, %v1432_v32  ;;  %v422_v31 = vld [vmem:[%s5711_s0 + $0xca8] sm:$0xff] }
 0x2f8   :  { %v934_v32 = vld [vmem:[%s5712_s1 + $0xca8] sm:$0xff] }
 0x2f9   :  { %v2442_v53 = vadd.f32 %v2441_v48, %v1931_v42  ;;  %v1434_v42 = vsub.f32 %v410_v35, %v922_v36  ;;  %v1945_v48 = vmul.f32 %v1433_v37, %v1433_v37  ;;  %v423_v36 = vld [vmem:[%s5711_s0 + $0xcb0] sm:$0xff] }
 0x2fa   :  { %v935_v37 = vld [vmem:[%s5712_s1 + $0xcb0] sm:$0xff] }
 0x2fb   :  { %v2443_v58 = vadd.f32 %v2442_v53, %v1932_v47  ;;  %v1435_v47 = vsub.f32 %v411_v40, %v923_v41  ;;  %v1946_v53 = vmul.f32 %v1434_v42, %v1434_v42  ;;  %v424_v41 = vld [vmem:[%s5711_s0 + $0xcb8] sm:$0xff] }
 0x2fc   :  { %v936_v42 = vld [vmem:[%s5712_s1 + $0xcb8] sm:$0xff] }
 0x2fd   :  { %v2444_v63 = vadd.f32 %v2443_v58, %v1933_v52  ;;  %v1436_v52 = vsub.f32 %v412_v45, %v924_v46  ;;  %v1947_v58 = vmul.f32 %v1435_v47, %v1435_v47  ;;  %v425_v46 = vld [vmem:[%s5711_s0 + $0xcc0] sm:$0xff] }
 0x2fe   :  { %v937_v47 = vld [vmem:[%s5712_s1 + $0xcc0] sm:$0xff] }
 0x2ff   :  { %v2445_v4 = vadd.f32 %v2444_v63, %v1934_v57  ;;  %v1437_v57 = vsub.f32 %v413_v50, %v925_v51  ;;  %v1948_v63 = vmul.f32 %v1436_v52, %v1436_v52  ;;  %v426_v51 = vld [vmem:[%s5711_s0 + $0xcc8] sm:$0xff] }
 0x300   :  { %v938_v52 = vld [vmem:[%s5712_s1 + $0xcc8] sm:$0xff] }
 0x301   :  { %v2446_v9 = vadd.f32 %v2445_v4, %v1935_v62  ;;  %v1438_v62 = vsub.f32 %v414_v55, %v926_v56  ;;  %v1949_v4 = vmul.f32 %v1437_v57, %v1437_v57  ;;  %v427_v56 = vld [vmem:[%s5711_s0 + $0xcd0] sm:$0xff] }
 0x302   :  { %v939_v57 = vld [vmem:[%s5712_s1 + $0xcd0] sm:$0xff] }
 0x303   :  { %v2447_v14 = vadd.f32 %v2446_v9, %v1936_v3  ;;  %v1439_v3 = vsub.f32 %v415_v60, %v927_v61  ;;  %v1950_v9 = vmul.f32 %v1438_v62, %v1438_v62  ;;  %v428_v61 = vld [vmem:[%s5711_s0 + $0xcd8] sm:$0xff] }
 0x304   :  { %v940_v62 = vld [vmem:[%s5712_s1 + $0xcd8] sm:$0xff] }
 0x305   :  { %v2448_v19 = vadd.f32 %v2447_v14, %v1937_v8  ;;  %v1440_v8 = vsub.f32 %v416_v1, %v928_v2  ;;  %v1951_v14 = vmul.f32 %v1439_v3, %v1439_v3  ;;  %v429_v2 = vld [vmem:[%s5711_s0 + $0xce0] sm:$0xff] }
 0x306   :  { %v941_v3 = vld [vmem:[%s5712_s1 + $0xce0] sm:$0xff] }
 0x307   :  { %v2449_v24 = vadd.f32 %v2448_v19, %v1938_v13  ;;  %v1441_v13 = vsub.f32 %v417_v6, %v929_v7  ;;  %v1952_v19 = vmul.f32 %v1440_v8, %v1440_v8  ;;  %v430_v7 = vld [vmem:[%s5711_s0 + $0xce8] sm:$0xff] }
 0x308   :  { %v942_v8 = vld [vmem:[%s5712_s1 + $0xce8] sm:$0xff] }
 0x309   :  { %v2450_v29 = vadd.f32 %v2449_v24, %v1939_v18  ;;  %v1442_v18 = vsub.f32 %v418_v11, %v930_v12  ;;  %v1953_v24 = vmul.f32 %v1441_v13, %v1441_v13  ;;  %v431_v12 = vld [vmem:[%s5711_s0 + $0xcf0] sm:$0xff] }
 0x30a   :  { %v943_v13 = vld [vmem:[%s5712_s1 + $0xcf0] sm:$0xff] }
 0x30b   :  { %v2451_v34 = vadd.f32 %v2450_v29, %v1940_v23  ;;  %v1443_v23 = vsub.f32 %v419_v16, %v931_v17  ;;  %v1954_v29 = vmul.f32 %v1442_v18, %v1442_v18  ;;  %v432_v17 = vld [vmem:[%s5711_s0 + $0xcf8] sm:$0xff] }
 0x30c   :  { %v944_v18 = vld [vmem:[%s5712_s1 + $0xcf8] sm:$0xff] }
 0x30d   :  { %v2452_v39 = vadd.f32 %v2451_v34, %v1941_v28  ;;  %v1444_v28 = vsub.f32 %v420_v21, %v932_v22  ;;  %v1955_v34 = vmul.f32 %v1443_v23, %v1443_v23  ;;  %v433_v22 = vld [vmem:[%s5711_s0 + $0xd00] sm:$0xff] }
 0x30e   :  { %v945_v23 = vld [vmem:[%s5712_s1 + $0xd00] sm:$0xff] }
 0x30f   :  { %v2453_v44 = vadd.f32 %v2452_v39, %v1942_v33  ;;  %v1445_v33 = vsub.f32 %v421_v26, %v933_v27  ;;  %v1956_v39 = vmul.f32 %v1444_v28, %v1444_v28  ;;  %v434_v27 = vld [vmem:[%s5711_s0 + $0xd08] sm:$0xff] }
 0x310   :  { %v946_v28 = vld [vmem:[%s5712_s1 + $0xd08] sm:$0xff] }
 0x311   :  { %v2454_v49 = vadd.f32 %v2453_v44, %v1943_v38  ;;  %v1446_v38 = vsub.f32 %v422_v31, %v934_v32  ;;  %v1957_v44 = vmul.f32 %v1445_v33, %v1445_v33  ;;  %v435_v32 = vld [vmem:[%s5711_s0 + $0xd10] sm:$0xff] }
 0x312   :  { %v947_v33 = vld [vmem:[%s5712_s1 + $0xd10] sm:$0xff] }
 0x313   :  { %v2455_v54 = vadd.f32 %v2454_v49, %v1944_v43  ;;  %v1447_v43 = vsub.f32 %v423_v36, %v935_v37  ;;  %v1958_v49 = vmul.f32 %v1446_v38, %v1446_v38  ;;  %v436_v37 = vld [vmem:[%s5711_s0 + $0xd18] sm:$0xff] }
 0x314   :  { %v948_v38 = vld [vmem:[%s5712_s1 + $0xd18] sm:$0xff] }
 0x315   :  { %v2456_v59 = vadd.f32 %v2455_v54, %v1945_v48  ;;  %v1448_v48 = vsub.f32 %v424_v41, %v936_v42  ;;  %v1959_v54 = vmul.f32 %v1447_v43, %v1447_v43  ;;  %v437_v42 = vld [vmem:[%s5711_s0 + $0xd20] sm:$0xff] }
 0x316   :  { %v949_v43 = vld [vmem:[%s5712_s1 + $0xd20] sm:$0xff] }
 0x317   :  { %v2457_v0 = vadd.f32 %v2456_v59, %v1946_v53  ;;  %v1449_v53 = vsub.f32 %v425_v46, %v937_v47  ;;  %v1960_v59 = vmul.f32 %v1448_v48, %v1448_v48  ;;  %v438_v47 = vld [vmem:[%s5711_s0 + $0xd28] sm:$0xff] }
 0x318   :  { %v950_v48 = vld [vmem:[%s5712_s1 + $0xd28] sm:$0xff] }
 0x319   :  { %v2458_v5 = vadd.f32 %v2457_v0, %v1947_v58  ;;  %v1450_v58 = vsub.f32 %v426_v51, %v938_v52  ;;  %v1961_v0 = vmul.f32 %v1449_v53, %v1449_v53  ;;  %v439_v52 = vld [vmem:[%s5711_s0 + $0xd30] sm:$0xff] }
 0x31a   :  { %v951_v53 = vld [vmem:[%s5712_s1 + $0xd30] sm:$0xff] }
 0x31b   :  { %v2459_v10 = vadd.f32 %v2458_v5, %v1948_v63  ;;  %v1451_v63 = vsub.f32 %v427_v56, %v939_v57  ;;  %v1962_v5 = vmul.f32 %v1450_v58, %v1450_v58  ;;  %v440_v57 = vld [vmem:[%s5711_s0 + $0xd38] sm:$0xff] }
 0x31c   :  { %v952_v58 = vld [vmem:[%s5712_s1 + $0xd38] sm:$0xff] }
 0x31d   :  { %v2460_v15 = vadd.f32 %v2459_v10, %v1949_v4  ;;  %v1452_v4 = vsub.f32 %v428_v61, %v940_v62  ;;  %v1963_v10 = vmul.f32 %v1451_v63, %v1451_v63  ;;  %v441_v62 = vld [vmem:[%s5711_s0 + $0xd40] sm:$0xff] }
 0x31e   :  { %v953_v63 = vld [vmem:[%s5712_s1 + $0xd40] sm:$0xff] }
 0x31f   :  { %v2461_v20 = vadd.f32 %v2460_v15, %v1950_v9  ;;  %v1453_v9 = vsub.f32 %v429_v2, %v941_v3  ;;  %v1964_v15 = vmul.f32 %v1452_v4, %v1452_v4  ;;  %v442_v3 = vld [vmem:[%s5711_s0 + $0xd48] sm:$0xff] }
 0x320   :  { %v954_v4 = vld [vmem:[%s5712_s1 + $0xd48] sm:$0xff] }
 0x321   :  { %v2462_v25 = vadd.f32 %v2461_v20, %v1951_v14  ;;  %v1454_v14 = vsub.f32 %v430_v7, %v942_v8  ;;  %v1965_v20 = vmul.f32 %v1453_v9, %v1453_v9  ;;  %v443_v8 = vld [vmem:[%s5711_s0 + $0xd50] sm:$0xff] }
 0x322   :  { %v955_v9 = vld [vmem:[%s5712_s1 + $0xd50] sm:$0xff] }
 0x323   :  { %v2463_v30 = vadd.f32 %v2462_v25, %v1952_v19  ;;  %v1455_v19 = vsub.f32 %v431_v12, %v943_v13  ;;  %v1966_v25 = vmul.f32 %v1454_v14, %v1454_v14  ;;  %v444_v13 = vld [vmem:[%s5711_s0 + $0xd58] sm:$0xff] }
 0x324   :  { %v956_v14 = vld [vmem:[%s5712_s1 + $0xd58] sm:$0xff] }
 0x325   :  { %v2464_v35 = vadd.f32 %v2463_v30, %v1953_v24  ;;  %v1456_v24 = vsub.f32 %v432_v17, %v944_v18  ;;  %v1967_v30 = vmul.f32 %v1455_v19, %v1455_v19  ;;  %v445_v18 = vld [vmem:[%s5711_s0 + $0xd60] sm:$0xff] }
 0x326   :  { %v957_v19 = vld [vmem:[%s5712_s1 + $0xd60] sm:$0xff] }
 0x327   :  { %v2465_v40 = vadd.f32 %v2464_v35, %v1954_v29  ;;  %v1457_v29 = vsub.f32 %v433_v22, %v945_v23  ;;  %v1968_v35 = vmul.f32 %v1456_v24, %v1456_v24  ;;  %v446_v23 = vld [vmem:[%s5711_s0 + $0xd68] sm:$0xff] }
 0x328   :  { %v958_v24 = vld [vmem:[%s5712_s1 + $0xd68] sm:$0xff] }
 0x329   :  { %v2466_v45 = vadd.f32 %v2465_v40, %v1955_v34  ;;  %v1458_v34 = vsub.f32 %v434_v27, %v946_v28  ;;  %v1969_v40 = vmul.f32 %v1457_v29, %v1457_v29  ;;  %v447_v28 = vld [vmem:[%s5711_s0 + $0xd70] sm:$0xff] }
 0x32a   :  { %v959_v29 = vld [vmem:[%s5712_s1 + $0xd70] sm:$0xff] }
 0x32b   :  { %v2467_v50 = vadd.f32 %v2466_v45, %v1956_v39  ;;  %v1459_v39 = vsub.f32 %v435_v32, %v947_v33  ;;  %v1970_v45 = vmul.f32 %v1458_v34, %v1458_v34  ;;  %v448_v33 = vld [vmem:[%s5711_s0 + $0xd78] sm:$0xff] }
 0x32c   :  { %v960_v34 = vld [vmem:[%s5712_s1 + $0xd78] sm:$0xff] }
 0x32d   :  { %v2468_v55 = vadd.f32 %v2467_v50, %v1957_v44  ;;  %v1460_v44 = vsub.f32 %v436_v37, %v948_v38  ;;  %v1971_v50 = vmul.f32 %v1459_v39, %v1459_v39  ;;  %v449_v38 = vld [vmem:[%s5711_s0 + $0xd80] sm:$0xff] }
 0x32e   :  { %v961_v39 = vld [vmem:[%s5712_s1 + $0xd80] sm:$0xff] }
 0x32f   :  { %v2469_v60 = vadd.f32 %v2468_v55, %v1958_v49  ;;  %v1461_v49 = vsub.f32 %v437_v42, %v949_v43  ;;  %v1972_v55 = vmul.f32 %v1460_v44, %v1460_v44  ;;  %v450_v43 = vld [vmem:[%s5711_s0 + $0xd88] sm:$0xff] }
 0x330   :  { %v962_v44 = vld [vmem:[%s5712_s1 + $0xd88] sm:$0xff] }
 0x331   :  { %v2470_v1 = vadd.f32 %v2469_v60, %v1959_v54  ;;  %v1462_v54 = vsub.f32 %v438_v47, %v950_v48  ;;  %v1973_v60 = vmul.f32 %v1461_v49, %v1461_v49  ;;  %v451_v48 = vld [vmem:[%s5711_s0 + $0xd90] sm:$0xff] }
 0x332   :  { %v963_v49 = vld [vmem:[%s5712_s1 + $0xd90] sm:$0xff] }
 0x333   :  { %v2471_v6 = vadd.f32 %v2470_v1, %v1960_v59  ;;  %v1463_v59 = vsub.f32 %v439_v52, %v951_v53  ;;  %v1974_v1 = vmul.f32 %v1462_v54, %v1462_v54  ;;  %v452_v53 = vld [vmem:[%s5711_s0 + $0xd98] sm:$0xff] }
 0x334   :  { %v964_v54 = vld [vmem:[%s5712_s1 + $0xd98] sm:$0xff] }
 0x335   :  { %v2472_v11 = vadd.f32 %v2471_v6, %v1961_v0  ;;  %v1464_v0 = vsub.f32 %v440_v57, %v952_v58  ;;  %v1975_v6 = vmul.f32 %v1463_v59, %v1463_v59  ;;  %v453_v58 = vld [vmem:[%s5711_s0 + $0xda0] sm:$0xff] }
 0x336   :  { %v965_v59 = vld [vmem:[%s5712_s1 + $0xda0] sm:$0xff] }
 0x337   :  { %v2473_v16 = vadd.f32 %v2472_v11, %v1962_v5  ;;  %v1465_v5 = vsub.f32 %v441_v62, %v953_v63  ;;  %v1976_v11 = vmul.f32 %v1464_v0, %v1464_v0  ;;  %v454_v63 = vld [vmem:[%s5711_s0 + $0xda8] sm:$0xff] }
 0x338   :  { %v966_v0 = vld [vmem:[%s5712_s1 + $0xda8] sm:$0xff] }
 0x339   :  { %v2474_v21 = vadd.f32 %v2473_v16, %v1963_v10  ;;  %v1466_v10 = vsub.f32 %v442_v3, %v954_v4  ;;  %v1977_v16 = vmul.f32 %v1465_v5, %v1465_v5  ;;  %v455_v4 = vld [vmem:[%s5711_s0 + $0xdb0] sm:$0xff] }
 0x33a   :  { %v967_v5 = vld [vmem:[%s5712_s1 + $0xdb0] sm:$0xff] }
 0x33b   :  { %v2475_v26 = vadd.f32 %v2474_v21, %v1964_v15  ;;  %v1467_v15 = vsub.f32 %v443_v8, %v955_v9  ;;  %v1978_v21 = vmul.f32 %v1466_v10, %v1466_v10  ;;  %v456_v9 = vld [vmem:[%s5711_s0 + $0xdb8] sm:$0xff] }
 0x33c   :  { %v968_v10 = vld [vmem:[%s5712_s1 + $0xdb8] sm:$0xff] }
 0x33d   :  { %v2476_v31 = vadd.f32 %v2475_v26, %v1965_v20  ;;  %v1468_v20 = vsub.f32 %v444_v13, %v956_v14  ;;  %v1979_v26 = vmul.f32 %v1467_v15, %v1467_v15  ;;  %v457_v14 = vld [vmem:[%s5711_s0 + $0xdc0] sm:$0xff] }
 0x33e   :  { %v969_v15 = vld [vmem:[%s5712_s1 + $0xdc0] sm:$0xff] }
 0x33f   :  { %v2477_v36 = vadd.f32 %v2476_v31, %v1966_v25  ;;  %v1469_v25 = vsub.f32 %v445_v18, %v957_v19  ;;  %v1980_v31 = vmul.f32 %v1468_v20, %v1468_v20  ;;  %v458_v19 = vld [vmem:[%s5711_s0 + $0xdc8] sm:$0xff] }
 0x340   :  { %v970_v20 = vld [vmem:[%s5712_s1 + $0xdc8] sm:$0xff] }
 0x341   :  { %v2478_v41 = vadd.f32 %v2477_v36, %v1967_v30  ;;  %v1470_v30 = vsub.f32 %v446_v23, %v958_v24  ;;  %v1981_v36 = vmul.f32 %v1469_v25, %v1469_v25  ;;  %v459_v24 = vld [vmem:[%s5711_s0 + $0xdd0] sm:$0xff] }
 0x342   :  { %v971_v25 = vld [vmem:[%s5712_s1 + $0xdd0] sm:$0xff] }
 0x343   :  { %v2479_v46 = vadd.f32 %v2478_v41, %v1968_v35  ;;  %v1471_v35 = vsub.f32 %v447_v28, %v959_v29  ;;  %v1982_v41 = vmul.f32 %v1470_v30, %v1470_v30  ;;  %v460_v29 = vld [vmem:[%s5711_s0 + $0xdd8] sm:$0xff] }
 0x344   :  { %v972_v30 = vld [vmem:[%s5712_s1 + $0xdd8] sm:$0xff] }
 0x345   :  { %v2480_v51 = vadd.f32 %v2479_v46, %v1969_v40  ;;  %v1472_v40 = vsub.f32 %v448_v33, %v960_v34  ;;  %v1983_v46 = vmul.f32 %v1471_v35, %v1471_v35  ;;  %v461_v34 = vld [vmem:[%s5711_s0 + $0xde0] sm:$0xff] }
 0x346   :  { %v973_v35 = vld [vmem:[%s5712_s1 + $0xde0] sm:$0xff] }
 0x347   :  { %v2481_v56 = vadd.f32 %v2480_v51, %v1970_v45  ;;  %v1473_v45 = vsub.f32 %v449_v38, %v961_v39  ;;  %v1984_v51 = vmul.f32 %v1472_v40, %v1472_v40  ;;  %v462_v39 = vld [vmem:[%s5711_s0 + $0xde8] sm:$0xff] }
 0x348   :  { %v974_v40 = vld [vmem:[%s5712_s1 + $0xde8] sm:$0xff] }
 0x349   :  { %v2482_v61 = vadd.f32 %v2481_v56, %v1971_v50  ;;  %v1474_v50 = vsub.f32 %v450_v43, %v962_v44  ;;  %v1985_v56 = vmul.f32 %v1473_v45, %v1473_v45  ;;  %v463_v44 = vld [vmem:[%s5711_s0 + $0xdf0] sm:$0xff] }
 0x34a   :  { %v975_v45 = vld [vmem:[%s5712_s1 + $0xdf0] sm:$0xff] }
 0x34b   :  { %v2483_v2 = vadd.f32 %v2482_v61, %v1972_v55  ;;  %v1475_v55 = vsub.f32 %v451_v48, %v963_v49  ;;  %v1986_v61 = vmul.f32 %v1474_v50, %v1474_v50  ;;  %v464_v49 = vld [vmem:[%s5711_s0 + $0xdf8] sm:$0xff] }
 0x34c   :  { %v976_v50 = vld [vmem:[%s5712_s1 + $0xdf8] sm:$0xff] }
 0x34d   :  { %v2484_v7 = vadd.f32 %v2483_v2, %v1973_v60  ;;  %v1476_v60 = vsub.f32 %v452_v53, %v964_v54  ;;  %v1987_v2 = vmul.f32 %v1475_v55, %v1475_v55  ;;  %v465_v54 = vld [vmem:[%s5711_s0 + $0xe00] sm:$0xff] }
 0x34e   :  { %v977_v55 = vld [vmem:[%s5712_s1 + $0xe00] sm:$0xff] }
 0x34f   :  { %v2485_v12 = vadd.f32 %v2484_v7, %v1974_v1  ;;  %v1477_v1 = vsub.f32 %v453_v58, %v965_v59  ;;  %v1988_v7 = vmul.f32 %v1476_v60, %v1476_v60  ;;  %v466_v59 = vld [vmem:[%s5711_s0 + $0xe08] sm:$0xff] }
 0x350   :  { %v978_v60 = vld [vmem:[%s5712_s1 + $0xe08] sm:$0xff] }
 0x351   :  { %v2486_v17 = vadd.f32 %v2485_v12, %v1975_v6  ;;  %v1478_v6 = vsub.f32 %v454_v63, %v966_v0  ;;  %v1989_v12 = vmul.f32 %v1477_v1, %v1477_v1  ;;  %v467_v0 = vld [vmem:[%s5711_s0 + $0xe10] sm:$0xff] }
 0x352   :  { %v979_v1 = vld [vmem:[%s5712_s1 + $0xe10] sm:$0xff] }
 0x353   :  { %v2487_v22 = vadd.f32 %v2486_v17, %v1976_v11  ;;  %v1479_v11 = vsub.f32 %v455_v4, %v967_v5  ;;  %v1990_v17 = vmul.f32 %v1478_v6, %v1478_v6  ;;  %v468_v5 = vld [vmem:[%s5711_s0 + $0xe18] sm:$0xff] }
 0x354   :  { %v980_v6 = vld [vmem:[%s5712_s1 + $0xe18] sm:$0xff] }
 0x355   :  { %v2488_v27 = vadd.f32 %v2487_v22, %v1977_v16  ;;  %v1480_v16 = vsub.f32 %v456_v9, %v968_v10  ;;  %v1991_v22 = vmul.f32 %v1479_v11, %v1479_v11  ;;  %v469_v10 = vld [vmem:[%s5711_s0 + $0xe20] sm:$0xff] }
 0x356   :  { %v981_v11 = vld [vmem:[%s5712_s1 + $0xe20] sm:$0xff] }
 0x357   :  { %v2489_v32 = vadd.f32 %v2488_v27, %v1978_v21  ;;  %v1481_v21 = vsub.f32 %v457_v14, %v969_v15  ;;  %v1992_v27 = vmul.f32 %v1480_v16, %v1480_v16  ;;  %v470_v15 = vld [vmem:[%s5711_s0 + $0xe28] sm:$0xff] }
 0x358   :  { %v982_v16 = vld [vmem:[%s5712_s1 + $0xe28] sm:$0xff] }
 0x359   :  { %v2490_v37 = vadd.f32 %v2489_v32, %v1979_v26  ;;  %v1482_v26 = vsub.f32 %v458_v19, %v970_v20  ;;  %v1993_v32 = vmul.f32 %v1481_v21, %v1481_v21  ;;  %v471_v20 = vld [vmem:[%s5711_s0 + $0xe30] sm:$0xff] }
 0x35a   :  { %v983_v21 = vld [vmem:[%s5712_s1 + $0xe30] sm:$0xff] }
 0x35b   :  { %v2491_v42 = vadd.f32 %v2490_v37, %v1980_v31  ;;  %v1483_v31 = vsub.f32 %v459_v24, %v971_v25  ;;  %v1994_v37 = vmul.f32 %v1482_v26, %v1482_v26  ;;  %v472_v25 = vld [vmem:[%s5711_s0 + $0xe38] sm:$0xff] }
 0x35c   :  { %v984_v26 = vld [vmem:[%s5712_s1 + $0xe38] sm:$0xff] }
 0x35d   :  { %v2492_v47 = vadd.f32 %v2491_v42, %v1981_v36  ;;  %v1484_v36 = vsub.f32 %v460_v29, %v972_v30  ;;  %v1995_v42 = vmul.f32 %v1483_v31, %v1483_v31  ;;  %v473_v30 = vld [vmem:[%s5711_s0 + $0xe40] sm:$0xff] }
 0x35e   :  { %v985_v31 = vld [vmem:[%s5712_s1 + $0xe40] sm:$0xff] }
 0x35f   :  { %v2493_v52 = vadd.f32 %v2492_v47, %v1982_v41  ;;  %v1485_v41 = vsub.f32 %v461_v34, %v973_v35  ;;  %v1996_v47 = vmul.f32 %v1484_v36, %v1484_v36  ;;  %v474_v35 = vld [vmem:[%s5711_s0 + $0xe48] sm:$0xff] }
 0x360   :  { %v986_v36 = vld [vmem:[%s5712_s1 + $0xe48] sm:$0xff] }
 0x361   :  { %v2494_v57 = vadd.f32 %v2493_v52, %v1983_v46  ;;  %v1486_v46 = vsub.f32 %v462_v39, %v974_v40  ;;  %v1997_v52 = vmul.f32 %v1485_v41, %v1485_v41  ;;  %v475_v40 = vld [vmem:[%s5711_s0 + $0xe50] sm:$0xff] }
 0x362   :  { %v987_v41 = vld [vmem:[%s5712_s1 + $0xe50] sm:$0xff] }
 0x363   :  { %v2495_v62 = vadd.f32 %v2494_v57, %v1984_v51  ;;  %v1487_v51 = vsub.f32 %v463_v44, %v975_v45  ;;  %v1998_v57 = vmul.f32 %v1486_v46, %v1486_v46  ;;  %v476_v45 = vld [vmem:[%s5711_s0 + $0xe58] sm:$0xff] }
 0x364   :  { %v988_v46 = vld [vmem:[%s5712_s1 + $0xe58] sm:$0xff] }
 0x365   :  { %v2496_v3 = vadd.f32 %v2495_v62, %v1985_v56  ;;  %v1488_v56 = vsub.f32 %v464_v49, %v976_v50  ;;  %v1999_v62 = vmul.f32 %v1487_v51, %v1487_v51  ;;  %v477_v50 = vld [vmem:[%s5711_s0 + $0xe60] sm:$0xff] }
 0x366   :  { %v989_v51 = vld [vmem:[%s5712_s1 + $0xe60] sm:$0xff] }
 0x367   :  { %v2497_v8 = vadd.f32 %v2496_v3, %v1986_v61  ;;  %v1489_v61 = vsub.f32 %v465_v54, %v977_v55  ;;  %v2000_v3 = vmul.f32 %v1488_v56, %v1488_v56  ;;  %v478_v55 = vld [vmem:[%s5711_s0 + $0xe68] sm:$0xff] }
 0x368   :  { %v990_v56 = vld [vmem:[%s5712_s1 + $0xe68] sm:$0xff] }
 0x369   :  { %v2498_v13 = vadd.f32 %v2497_v8, %v1987_v2  ;;  %v1490_v2 = vsub.f32 %v466_v59, %v978_v60  ;;  %v2001_v8 = vmul.f32 %v1489_v61, %v1489_v61  ;;  %v479_v60 = vld [vmem:[%s5711_s0 + $0xe70] sm:$0xff] }
 0x36a   :  { %v991_v61 = vld [vmem:[%s5712_s1 + $0xe70] sm:$0xff] }
 0x36b   :  { %v2499_v18 = vadd.f32 %v2498_v13, %v1988_v7  ;;  %v1491_v7 = vsub.f32 %v467_v0, %v979_v1  ;;  %v2002_v13 = vmul.f32 %v1490_v2, %v1490_v2  ;;  %v480_v1 = vld [vmem:[%s5711_s0 + $0xe78] sm:$0xff] }
 0x36c   :  { %v992_v2 = vld [vmem:[%s5712_s1 + $0xe78] sm:$0xff] }
 0x36d   :  { %v2500_v23 = vadd.f32 %v2499_v18, %v1989_v12  ;;  %v1492_v12 = vsub.f32 %v468_v5, %v980_v6  ;;  %v2003_v18 = vmul.f32 %v1491_v7, %v1491_v7  ;;  %v481_v6 = vld [vmem:[%s5711_s0 + $0xe80] sm:$0xff] }
 0x36e   :  { %v993_v7 = vld [vmem:[%s5712_s1 + $0xe80] sm:$0xff] }
 0x36f   :  { %v2501_v28 = vadd.f32 %v2500_v23, %v1990_v17  ;;  %v1493_v17 = vsub.f32 %v469_v10, %v981_v11  ;;  %v2004_v23 = vmul.f32 %v1492_v12, %v1492_v12  ;;  %v482_v11 = vld [vmem:[%s5711_s0 + $0xe88] sm:$0xff] }
 0x370   :  { %v994_v12 = vld [vmem:[%s5712_s1 + $0xe88] sm:$0xff] }
 0x371   :  { %v2502_v33 = vadd.f32 %v2501_v28, %v1991_v22  ;;  %v1494_v22 = vsub.f32 %v470_v15, %v982_v16  ;;  %v2005_v28 = vmul.f32 %v1493_v17, %v1493_v17  ;;  %v483_v16 = vld [vmem:[%s5711_s0 + $0xe90] sm:$0xff] }
 0x372   :  { %v995_v17 = vld [vmem:[%s5712_s1 + $0xe90] sm:$0xff] }
 0x373   :  { %v2503_v38 = vadd.f32 %v2502_v33, %v1992_v27  ;;  %v1495_v27 = vsub.f32 %v471_v20, %v983_v21  ;;  %v2006_v33 = vmul.f32 %v1494_v22, %v1494_v22  ;;  %v484_v21 = vld [vmem:[%s5711_s0 + $0xe98] sm:$0xff] }
 0x374   :  { %v996_v22 = vld [vmem:[%s5712_s1 + $0xe98] sm:$0xff] }
 0x375   :  { %v2504_v43 = vadd.f32 %v2503_v38, %v1993_v32  ;;  %v1496_v32 = vsub.f32 %v472_v25, %v984_v26  ;;  %v2007_v38 = vmul.f32 %v1495_v27, %v1495_v27  ;;  %v485_v26 = vld [vmem:[%s5711_s0 + $0xea0] sm:$0xff] }
 0x376   :  { %v997_v27 = vld [vmem:[%s5712_s1 + $0xea0] sm:$0xff] }
 0x377   :  { %v2505_v48 = vadd.f32 %v2504_v43, %v1994_v37  ;;  %v1497_v37 = vsub.f32 %v473_v30, %v985_v31  ;;  %v2008_v43 = vmul.f32 %v1496_v32, %v1496_v32  ;;  %v486_v31 = vld [vmem:[%s5711_s0 + $0xea8] sm:$0xff] }
 0x378   :  { %v998_v32 = vld [vmem:[%s5712_s1 + $0xea8] sm:$0xff] }
 0x379   :  { %v2506_v53 = vadd.f32 %v2505_v48, %v1995_v42  ;;  %v1498_v42 = vsub.f32 %v474_v35, %v986_v36  ;;  %v2009_v48 = vmul.f32 %v1497_v37, %v1497_v37  ;;  %v487_v36 = vld [vmem:[%s5711_s0 + $0xeb0] sm:$0xff] }
 0x37a   :  { %v999_v37 = vld [vmem:[%s5712_s1 + $0xeb0] sm:$0xff] }
 0x37b   :  { %v2507_v58 = vadd.f32 %v2506_v53, %v1996_v47  ;;  %v1499_v47 = vsub.f32 %v475_v40, %v987_v41  ;;  %v2010_v53 = vmul.f32 %v1498_v42, %v1498_v42  ;;  %v488_v41 = vld [vmem:[%s5711_s0 + $0xeb8] sm:$0xff] }
 0x37c   :  { %v1000_v42 = vld [vmem:[%s5712_s1 + $0xeb8] sm:$0xff] }
 0x37d   :  { %v2508_v63 = vadd.f32 %v2507_v58, %v1997_v52  ;;  %v1500_v52 = vsub.f32 %v476_v45, %v988_v46  ;;  %v2011_v58 = vmul.f32 %v1499_v47, %v1499_v47  ;;  %v489_v46 = vld [vmem:[%s5711_s0 + $0xec0] sm:$0xff] }
 0x37e   :  { %v1001_v47 = vld [vmem:[%s5712_s1 + $0xec0] sm:$0xff] }
 0x37f   :  { %v2509_v4 = vadd.f32 %v2508_v63, %v1998_v57  ;;  %v1501_v57 = vsub.f32 %v477_v50, %v989_v51  ;;  %v2012_v63 = vmul.f32 %v1500_v52, %v1500_v52  ;;  %v490_v51 = vld [vmem:[%s5711_s0 + $0xec8] sm:$0xff] }
 0x380   :  { %v1002_v52 = vld [vmem:[%s5712_s1 + $0xec8] sm:$0xff] }
 0x381   :  { %v2510_v9 = vadd.f32 %v2509_v4, %v1999_v62  ;;  %v1502_v62 = vsub.f32 %v478_v55, %v990_v56  ;;  %v2013_v4 = vmul.f32 %v1501_v57, %v1501_v57  ;;  %v491_v56 = vld [vmem:[%s5711_s0 + $0xed0] sm:$0xff] }
 0x382   :  { %v1003_v57 = vld [vmem:[%s5712_s1 + $0xed0] sm:$0xff] }
 0x383   :  { %v2511_v14 = vadd.f32 %v2510_v9, %v2000_v3  ;;  %v1503_v3 = vsub.f32 %v479_v60, %v991_v61  ;;  %v2014_v9 = vmul.f32 %v1502_v62, %v1502_v62  ;;  %v492_v61 = vld [vmem:[%s5711_s0 + $0xed8] sm:$0xff] }
 0x384   :  { %v1004_v62 = vld [vmem:[%s5712_s1 + $0xed8] sm:$0xff] }
 0x385   :  { %v2512_v19 = vadd.f32 %v2511_v14, %v2001_v8  ;;  %v1504_v8 = vsub.f32 %v480_v1, %v992_v2  ;;  %v2015_v14 = vmul.f32 %v1503_v3, %v1503_v3  ;;  %v493_v2 = vld [vmem:[%s5711_s0 + $0xee0] sm:$0xff] }
 0x386   :  { %v1005_v3 = vld [vmem:[%s5712_s1 + $0xee0] sm:$0xff] }
 0x387   :  { %v2513_v24 = vadd.f32 %v2512_v19, %v2002_v13  ;;  %v1505_v13 = vsub.f32 %v481_v6, %v993_v7  ;;  %v2016_v19 = vmul.f32 %v1504_v8, %v1504_v8  ;;  %v494_v7 = vld [vmem:[%s5711_s0 + $0xee8] sm:$0xff] }
 0x388   :  { %v1006_v8 = vld [vmem:[%s5712_s1 + $0xee8] sm:$0xff] }
 0x389   :  { %v2514_v29 = vadd.f32 %v2513_v24, %v2003_v18  ;;  %v1506_v18 = vsub.f32 %v482_v11, %v994_v12  ;;  %v2017_v24 = vmul.f32 %v1505_v13, %v1505_v13  ;;  %v495_v12 = vld [vmem:[%s5711_s0 + $0xef0] sm:$0xff] }
 0x38a   :  { %v1007_v13 = vld [vmem:[%s5712_s1 + $0xef0] sm:$0xff] }
 0x38b   :  { %v2515_v34 = vadd.f32 %v2514_v29, %v2004_v23  ;;  %v1507_v23 = vsub.f32 %v483_v16, %v995_v17  ;;  %v2018_v29 = vmul.f32 %v1506_v18, %v1506_v18  ;;  %v496_v17 = vld [vmem:[%s5711_s0 + $0xef8] sm:$0xff] }
 0x38c   :  { %v1008_v18 = vld [vmem:[%s5712_s1 + $0xef8] sm:$0xff] }
 0x38d   :  { %v2516_v39 = vadd.f32 %v2515_v34, %v2005_v28  ;;  %v1508_v28 = vsub.f32 %v484_v21, %v996_v22  ;;  %v2019_v34 = vmul.f32 %v1507_v23, %v1507_v23  ;;  %v497_v22 = vld [vmem:[%s5711_s0 + $0xf00] sm:$0xff] }
 0x38e   :  { %v1009_v23 = vld [vmem:[%s5712_s1 + $0xf00] sm:$0xff] }
 0x38f   :  { %v2517_v44 = vadd.f32 %v2516_v39, %v2006_v33  ;;  %v1509_v33 = vsub.f32 %v485_v26, %v997_v27  ;;  %v2020_v39 = vmul.f32 %v1508_v28, %v1508_v28  ;;  %v498_v27 = vld [vmem:[%s5711_s0 + $0xf08] sm:$0xff] }
 0x390   :  { %v1010_v28 = vld [vmem:[%s5712_s1 + $0xf08] sm:$0xff] }
 0x391   :  { %v2518_v49 = vadd.f32 %v2517_v44, %v2007_v38  ;;  %v1510_v38 = vsub.f32 %v486_v31, %v998_v32  ;;  %v2021_v44 = vmul.f32 %v1509_v33, %v1509_v33  ;;  %v499_v32 = vld [vmem:[%s5711_s0 + $0xf10] sm:$0xff] }
 0x392   :  { %v1011_v33 = vld [vmem:[%s5712_s1 + $0xf10] sm:$0xff] }
 0x393   :  { %v2519_v54 = vadd.f32 %v2518_v49, %v2008_v43  ;;  %v1511_v43 = vsub.f32 %v487_v36, %v999_v37  ;;  %v2022_v49 = vmul.f32 %v1510_v38, %v1510_v38  ;;  %v500_v37 = vld [vmem:[%s5711_s0 + $0xf18] sm:$0xff] }
 0x394   :  { %v1012_v38 = vld [vmem:[%s5712_s1 + $0xf18] sm:$0xff] }
 0x395   :  { %v2520_v59 = vadd.f32 %v2519_v54, %v2009_v48  ;;  %v1512_v48 = vsub.f32 %v488_v41, %v1000_v42  ;;  %v2023_v54 = vmul.f32 %v1511_v43, %v1511_v43  ;;  %v501_v42 = vld [vmem:[%s5711_s0 + $0xf20] sm:$0xff] }
 0x396   :  { %v1013_v43 = vld [vmem:[%s5712_s1 + $0xf20] sm:$0xff] }
 0x397   :  { %v2521_v0 = vadd.f32 %v2520_v59, %v2010_v53  ;;  %v1513_v53 = vsub.f32 %v489_v46, %v1001_v47  ;;  %v2024_v59 = vmul.f32 %v1512_v48, %v1512_v48  ;;  %v502_v47 = vld [vmem:[%s5711_s0 + $0xf28] sm:$0xff] }
 0x398   :  { %v1014_v48 = vld [vmem:[%s5712_s1 + $0xf28] sm:$0xff] }
 0x399   :  { %v2522_v5 = vadd.f32 %v2521_v0, %v2011_v58  ;;  %v1514_v58 = vsub.f32 %v490_v51, %v1002_v52  ;;  %v2025_v0 = vmul.f32 %v1513_v53, %v1513_v53  ;;  %v503_v52 = vld [vmem:[%s5711_s0 + $0xf30] sm:$0xff] }
 0x39a   :  { %v1015_v53 = vld [vmem:[%s5712_s1 + $0xf30] sm:$0xff] }
 0x39b   :  { %v2523_v10 = vadd.f32 %v2522_v5, %v2012_v63  ;;  %v1515_v63 = vsub.f32 %v491_v56, %v1003_v57  ;;  %v2026_v5 = vmul.f32 %v1514_v58, %v1514_v58  ;;  %v504_v57 = vld [vmem:[%s5711_s0 + $0xf38] sm:$0xff] }
 0x39c   :  { %v1016_v58 = vld [vmem:[%s5712_s1 + $0xf38] sm:$0xff] }
 0x39d   :  { %v2524_v15 = vadd.f32 %v2523_v10, %v2013_v4  ;;  %v1516_v4 = vsub.f32 %v492_v61, %v1004_v62  ;;  %v2027_v10 = vmul.f32 %v1515_v63, %v1515_v63  ;;  %v505_v62 = vld [vmem:[%s5711_s0 + $0xf40] sm:$0xff] }
 0x39e   :  { %v1017_v63 = vld [vmem:[%s5712_s1 + $0xf40] sm:$0xff] }
 0x39f   :  { %v2525_v20 = vadd.f32 %v2524_v15, %v2014_v9  ;;  %v1517_v9 = vsub.f32 %v493_v2, %v1005_v3  ;;  %v2028_v15 = vmul.f32 %v1516_v4, %v1516_v4  ;;  %v506_v3 = vld [vmem:[%s5711_s0 + $0xf48] sm:$0xff] }
 0x3a0   :  { %v1018_v4 = vld [vmem:[%s5712_s1 + $0xf48] sm:$0xff] }
 0x3a1   :  { %v2526_v25 = vadd.f32 %v2525_v20, %v2015_v14  ;;  %v1518_v14 = vsub.f32 %v494_v7, %v1006_v8  ;;  %v2029_v20 = vmul.f32 %v1517_v9, %v1517_v9  ;;  %v507_v8 = vld [vmem:[%s5711_s0 + $0xf50] sm:$0xff] }
 0x3a2   :  { %v1019_v9 = vld [vmem:[%s5712_s1 + $0xf50] sm:$0xff] }
 0x3a3   :  { %v2527_v30 = vadd.f32 %v2526_v25, %v2016_v19  ;;  %v1519_v19 = vsub.f32 %v495_v12, %v1007_v13  ;;  %v2030_v25 = vmul.f32 %v1518_v14, %v1518_v14  ;;  %v508_v13 = vld [vmem:[%s5711_s0 + $0xf58] sm:$0xff] }
 0x3a4   :  { %v1020_v14 = vld [vmem:[%s5712_s1 + $0xf58] sm:$0xff] }
 0x3a5   :  { %v2528_v35 = vadd.f32 %v2527_v30, %v2017_v24  ;;  %v1520_v24 = vsub.f32 %v496_v17, %v1008_v18  ;;  %v2031_v30 = vmul.f32 %v1519_v19, %v1519_v19  ;;  %v509_v18 = vld [vmem:[%s5711_s0 + $0xf60] sm:$0xff] }
 0x3a6   :  { %v1021_v19 = vld [vmem:[%s5712_s1 + $0xf60] sm:$0xff] }
 0x3a7   :  { %v2529_v40 = vadd.f32 %v2528_v35, %v2018_v29  ;;  %v1521_v29 = vsub.f32 %v497_v22, %v1009_v23  ;;  %v2032_v35 = vmul.f32 %v1520_v24, %v1520_v24  ;;  %v510_v23 = vld [vmem:[%s5711_s0 + $0xf68] sm:$0xff] }
 0x3a8   :  { %v1022_v24 = vld [vmem:[%s5712_s1 + $0xf68] sm:$0xff] }
 0x3a9   :  { %v2530_v45 = vadd.f32 %v2529_v40, %v2019_v34  ;;  %v1522_v34 = vsub.f32 %v498_v27, %v1010_v28  ;;  %v2033_v40 = vmul.f32 %v1521_v29, %v1521_v29  ;;  %v511_v28 = vld [vmem:[%s5711_s0 + $0xf70] sm:$0xff] }
 0x3aa   :  { %v1023_v29 = vld [vmem:[%s5712_s1 + $0xf70] sm:$0xff] }
 0x3ab   :  { %v2531_v50 = vadd.f32 %v2530_v45, %v2020_v39  ;;  %v1523_v39 = vsub.f32 %v499_v32, %v1011_v33  ;;  %v2034_v45 = vmul.f32 %v1522_v34, %v1522_v34  ;;  %v512_v33 = vld [vmem:[%s5711_s0 + $0xf78] sm:$0xff] }
 0x3ac   :  { %v1024_v34 = vld [vmem:[%s5712_s1 + $0xf78] sm:$0xff] }
 0x3ad   :  { %v2532_v55 = vadd.f32 %v2531_v50, %v2021_v44  ;;  %v1524_v44 = vsub.f32 %v500_v37, %v1012_v38  ;;  %v2035_v50 = vmul.f32 %v1523_v39, %v1523_v39  ;;  %v513_v38 = vld [vmem:[%s5711_s0 + $0xf80] sm:$0xff] }
 0x3ae   :  { %v1025_v39 = vld [vmem:[%s5712_s1 + $0xf80] sm:$0xff] }
 0x3af   :  { %v2533_v60 = vadd.f32 %v2532_v55, %v2022_v49  ;;  %v1525_v49 = vsub.f32 %v501_v42, %v1013_v43  ;;  %v2036_v55 = vmul.f32 %v1524_v44, %v1524_v44  ;;  %v514_v43 = vld [vmem:[%s5711_s0 + $0xf88] sm:$0xff] }
 0x3b0   :  { %v1026_v44 = vld [vmem:[%s5712_s1 + $0xf88] sm:$0xff] }
 0x3b1   :  { %v2534_v1 = vadd.f32 %v2533_v60, %v2023_v54  ;;  %v1526_v54 = vsub.f32 %v502_v47, %v1014_v48  ;;  %v2037_v60 = vmul.f32 %v1525_v49, %v1525_v49  ;;  %v515_v48 = vld [vmem:[%s5711_s0 + $0xf90] sm:$0xff] }
 0x3b2   :  { %v1027_v49 = vld [vmem:[%s5712_s1 + $0xf90] sm:$0xff] }
 0x3b3   :  { %v2535_v6 = vadd.f32 %v2534_v1, %v2024_v59  ;;  %v1527_v59 = vsub.f32 %v503_v52, %v1015_v53  ;;  %v2038_v1 = vmul.f32 %v1526_v54, %v1526_v54  ;;  %v516_v53 = vld [vmem:[%s5711_s0 + $0xf98] sm:$0xff] }
 0x3b4   :  { %v1028_v54 = vld [vmem:[%s5712_s1 + $0xf98] sm:$0xff] }
 0x3b5   :  { %v2536_v11 = vadd.f32 %v2535_v6, %v2025_v0  ;;  %v1528_v0 = vsub.f32 %v504_v57, %v1016_v58  ;;  %v2039_v6 = vmul.f32 %v1527_v59, %v1527_v59  ;;  %v517_v58 = vld [vmem:[%s5711_s0 + $0xfa0] sm:$0xff] }
 0x3b6   :  { %v1029_v59 = vld [vmem:[%s5712_s1 + $0xfa0] sm:$0xff] }
 0x3b7   :  { %v2537_v16 = vadd.f32 %v2536_v11, %v2026_v5  ;;  %v1529_v5 = vsub.f32 %v505_v62, %v1017_v63  ;;  %v2040_v11 = vmul.f32 %v1528_v0, %v1528_v0  ;;  %v518_v63 = vld [vmem:[%s5711_s0 + $0xfa8] sm:$0xff] }
 0x3b8   :  { %v1030_v0 = vld [vmem:[%s5712_s1 + $0xfa8] sm:$0xff] }
 0x3b9   :  { %v2538_v21 = vadd.f32 %v2537_v16, %v2027_v10  ;;  %v1530_v10 = vsub.f32 %v506_v3, %v1018_v4  ;;  %v2041_v16 = vmul.f32 %v1529_v5, %v1529_v5  ;;  %v519_v4 = vld [vmem:[%s5711_s0 + $0xfb0] sm:$0xff] }
 0x3ba   :  { %v1031_v5 = vld [vmem:[%s5712_s1 + $0xfb0] sm:$0xff] }
 0x3bb   :  { %v2539_v26 = vadd.f32 %v2538_v21, %v2028_v15  ;;  %v1531_v15 = vsub.f32 %v507_v8, %v1019_v9  ;;  %v2042_v21 = vmul.f32 %v1530_v10, %v1530_v10  ;;  %v520_v9 = vld [vmem:[%s5711_s0 + $0xfb8] sm:$0xff] }
 0x3bc   :  { %v1032_v10 = vld [vmem:[%s5712_s1 + $0xfb8] sm:$0xff] }
 0x3bd   :  { %v2540_v31 = vadd.f32 %v2539_v26, %v2029_v20  ;;  %v1532_v20 = vsub.f32 %v508_v13, %v1020_v14  ;;  %v2043_v26 = vmul.f32 %v1531_v15, %v1531_v15  ;;  %v521_v14 = vld [vmem:[%s5711_s0 + $0xfc0] sm:$0xff] }
 0x3be   :  { %v1033_v15 = vld [vmem:[%s5712_s1 + $0xfc0] sm:$0xff] }
 0x3bf   :  { %v2541_v36 = vadd.f32 %v2540_v31, %v2030_v25  ;;  %v1533_v25 = vsub.f32 %v509_v18, %v1021_v19  ;;  %v2044_v31 = vmul.f32 %v1532_v20, %v1532_v20  ;;  %v522_v19 = vld [vmem:[%s5711_s0 + $0xfc8] sm:$0xff] }
 0x3c0   :  { %v1034_v20 = vld [vmem:[%s5712_s1 + $0xfc8] sm:$0xff] }
 0x3c1   :  { %v2542_v41 = vadd.f32 %v2541_v36, %v2031_v30  ;;  %v1534_v30 = vsub.f32 %v510_v23, %v1022_v24  ;;  %v2045_v36 = vmul.f32 %v1533_v25, %v1533_v25  ;;  %v523_v24 = vld [vmem:[%s5711_s0 + $0xfd0] sm:$0xff] }
 0x3c2   :  { %v1035_v25 = vld [vmem:[%s5712_s1 + $0xfd0] sm:$0xff] }
 0x3c3   :  { %v2543_v46 = vadd.f32 %v2542_v41, %v2032_v35  ;;  %v1535_v35 = vsub.f32 %v511_v28, %v1023_v29  ;;  %v2046_v41 = vmul.f32 %v1534_v30, %v1534_v30  ;;  %v524_v29 = vld [vmem:[%s5711_s0 + $0xfd8] sm:$0xff] }
 0x3c4   :  { %v1036_v30 = vld [vmem:[%s5712_s1 + $0xfd8] sm:$0xff] }
 0x3c5   :  { %v2544_v51 = vadd.f32 %v2543_v46, %v2033_v40  ;;  %v1536_v40 = vsub.f32 %v512_v33, %v1024_v34  ;;  %v2047_v46 = vmul.f32 %v1535_v35, %v1535_v35  ;;  %v525_v34 = vld [vmem:[%s5711_s0 + $0xfe0] sm:$0xff] }
 0x3c6   :  { %v1037_v35 = vld [vmem:[%s5712_s1 + $0xfe0] sm:$0xff] }
 0x3c7   :  { %v2545_v56 = vadd.f32 %v2544_v51, %v2034_v45  ;;  %v1537_v45 = vsub.f32 %v513_v38, %v1025_v39  ;;  %v2048_v51 = vmul.f32 %v1536_v40, %v1536_v40  ;;  %v526_v39 = vld [vmem:[%s5711_s0 + $0xfe8] sm:$0xff] }
 0x3c8   :  { %v1038_v40 = vld [vmem:[%s5712_s1 + $0xfe8] sm:$0xff] }
 0x3c9   :  { %v2546_v61 = vadd.f32 %v2545_v56, %v2035_v50  ;;  %v1538_v50 = vsub.f32 %v514_v43, %v1026_v44  ;;  %v2049_v56 = vmul.f32 %v1537_v45, %v1537_v45  ;;  %v527_v44 = vld [vmem:[%s5711_s0 + $0xff0] sm:$0xff] }
 0x3ca   :  { %v1039_v45 = vld [vmem:[%s5712_s1 + $0xff0] sm:$0xff] }
 0x3cb   :  { %v2547_v2 = vadd.f32 %v2546_v61, %v2036_v55  ;;  %v1539_v55 = vsub.f32 %v515_v48, %v1027_v49  ;;  %v2050_v61 = vmul.f32 %v1538_v50, %v1538_v50  ;;  %v528_v49 = vld [vmem:[%s5711_s0 + $0xff8] sm:$0xff] }
 0x3cc   :  { %v1040_v50 = vld [vmem:[%s5712_s1 + $0xff8] sm:$0xff]  ;;  %s2620_s1 = smov [#allocation3]  }
 0x3cd   :  { %v2548_v7 = vadd.f32 %v2547_v2, %v2037_v60  ;;  %v1540_v60 = vsub.f32 %v516_v53, %v1028_v54  ;;  %v2051_v2 = vmul.f32 %v1539_v55, %v1539_v55  ;;  %v1552_v54 = vsub.f32 %v528_v49, %v1040_v50 }
 0x3cf   :  { %v2549_v12 = vadd.f32 %v2548_v7, %v2038_v1  ;;  %v1541_v1 = vsub.f32 %v517_v58, %v1029_v59  ;;  %v2052_v7 = vmul.f32 %v1540_v60, %v1540_v60  ;;  %v2064_v59 = vmul.f32 %v1552_v54, %v1552_v54 }
 0x3d1   :  { %v2550_v17 = vadd.f32 %v2549_v12, %v2039_v6  ;;  %v1542_v6 = vsub.f32 %v518_v63, %v1030_v0  ;;  %v2053_v12 = vmul.f32 %v1541_v1, %v1541_v1 }
 0x3d3   :  { %v2551_v22 = vadd.f32 %v2550_v17, %v2040_v11  ;;  %v1543_v11 = vsub.f32 %v519_v4, %v1031_v5  ;;  %v2054_v17 = vmul.f32 %v1542_v6, %v1542_v6 }
 0x3d5   :  { %v2552_v27 = vadd.f32 %v2551_v22, %v2041_v16  ;;  %v1544_v16 = vsub.f32 %v520_v9, %v1032_v10  ;;  %v2055_v22 = vmul.f32 %v1543_v11, %v1543_v11 }
 0x3d7   :  { %v2553_v32 = vadd.f32 %v2552_v27, %v2042_v21  ;;  %v1545_v21 = vsub.f32 %v521_v14, %v1033_v15  ;;  %v2056_v27 = vmul.f32 %v1544_v16, %v1544_v16 }
 0x3d9   :  { %v2554_v37 = vadd.f32 %v2553_v32, %v2043_v26  ;;  %v1546_v26 = vsub.f32 %v522_v19, %v1034_v20  ;;  %v2057_v32 = vmul.f32 %v1545_v21, %v1545_v21 }
 0x3db   :  { %v2555_v42 = vadd.f32 %v2554_v37, %v2044_v31  ;;  %v1547_v31 = vsub.f32 %v523_v24, %v1035_v25  ;;  %v2058_v37 = vmul.f32 %v1546_v26, %v1546_v26 }
 0x3dd   :  { %v2556_v47 = vadd.f32 %v2555_v42, %v2045_v36  ;;  %v1548_v36 = vsub.f32 %v524_v29, %v1036_v30  ;;  %v2059_v42 = vmul.f32 %v1547_v31, %v1547_v31 }
 0x3df   :  { %v2557_v52 = vadd.f32 %v2556_v47, %v2046_v41  ;;  %v1549_v41 = vsub.f32 %v525_v34, %v1037_v35  ;;  %v2060_v47 = vmul.f32 %v1548_v36, %v1548_v36 }
 0x3e1   :  { %v2558_v57 = vadd.f32 %v2557_v52, %v2047_v46  ;;  %v1550_v46 = vsub.f32 %v526_v39, %v1038_v40  ;;  %v2061_v52 = vmul.f32 %v1549_v41, %v1549_v41 }
 0x3e3   :  { %v2559_v62 = vadd.f32 %v2558_v57, %v2048_v51  ;;  %v1551_v51 = vsub.f32 %v527_v44, %v1039_v45  ;;  %v2062_v55 = vmul.f32 %v1550_v46, %v1550_v46 }
 0x3e5   :  { %v2560_v3 = vadd.f32 %v2559_v62, %v2049_v56  ;;  %v2063_v57 = vmul.f32 %v1551_v51, %v1551_v51 }
 0x3e7   :  { %v2561_v8 = vadd.f32 %v2560_v3, %v2050_v61 }
 0x3e9   :  { %v2562_v13 = vadd.f32 %v2561_v8, %v2051_v2 }
 0x3eb   :  { %v2563_v18 = vadd.f32 %v2562_v13, %v2052_v7 }
 0x3ed   :  { %v2564_v23 = vadd.f32 %v2563_v18, %v2053_v12 }
 0x3ef   :  { %v2565_v28 = vadd.f32 %v2564_v23, %v2054_v17 }
 0x3f1   :  { %v2566_v33 = vadd.f32 %v2565_v28, %v2055_v22 }
 0x3f3   :  { %v2567_v38 = vadd.f32 %v2566_v33, %v2056_v27 }
 0x3f5   :  { %v2568_v43 = vadd.f32 %v2567_v38, %v2057_v32 }
 0x3f7   :  { %v2569_v48 = vadd.f32 %v2568_v43, %v2058_v37 }
 0x3f9   :  { %v2570_v53 = vadd.f32 %v2569_v48, %v2059_v42 }
 0x3fb   :  { %v2571_v56 = vadd.f32 %v2570_v53, %v2060_v47 }
 0x3fd   :  { %v2572_v58 = vadd.f32 %v2571_v56, %v2061_v52 }
 0x3ff   :  { %v2573_v60 = vadd.f32 %v2572_v58, %v2062_v55 }
 0x401   :  { %v2574_v61 = vadd.f32 %v2573_v60, %v2063_v57 }
 0x403   :  { %v2575_v62 = vadd.f32 %v2574_v61, %v2064_v59 }
 0x405   :  { %2583 = vadd.xlane.f32.xlu0 %v2575_v62 }
 0x48e   :  { %v2584_v63 = vpop.xlane.xlu0 %2583 }
 0x48f   :  { %v2585_v0 = vrot.slane %v2584_v63, 4 }
 0x491   :  { %v2586_v1 = vadd.f32 %v2585_v0, %v2584_v63 }
 0x493   :  { %v2587_v2 = vrot.slane %v2586_v1, 2 }
 0x495   :  { %v2588_v3 = vadd.f32 %v2587_v2, %v2586_v1 }
 0x497   :  { %v2589_v4 = vrot.slane %v2588_v3, 1 }
 0x499   :  { %v2590_v5 = vadd.f32 %v2589_v4, %v2588_v3 }
 0x49b   :  { %2607 = vpush %v2590_v5 }
 0x4cc   :  { %s2608_s0 = spop %2607 }
 0x4cd   :  { %2593 = sst [smem:[#allocation3]] %s2608_s0 }
 0x4ce   :  { %2601 = dma.smem_to_hbm %s2620_s1, 16, %s5713_s2, [#allocation4]  }
 0x4cf   :  { %2618 = dma.done.wait [#allocation4], 16  }
 0x4d0   :  { %2619 = vsyncadd [#allocation4], 4294967280 }
 0x4d1   :  { %2605 = sfence }
 0x4d2   :  { %2606 = vsyncpa [#allocation4], 1 }

</bundles_post_ra>
